<compile_context>
chip_gen: v5e
topology: v5e:2x2
jax: 0.10.0
libtpu: 0.0.40
codegen_flags: <defaults>
</compile_context>

<pallas_src>
import functools

import jax
import jax.numpy as jnp
from jax.experimental import pallas as pl
from jax.experimental.pallas import tpu as pltpu

TEXT_DIM = 300
TEXT_DIM_PAD = 384   # K padded to a multiple of 128 (MXU depth / lane alignment)
IMG_DIM = 1280
HIDDEN = 512
NUM_CLASSES = 6
OUT_PAD = 128        # lane-dense padded classifier width (sliced back to 6 outside)


def _round_up(x, m):
    return (x + m - 1) // m * m


def _choose_batch_tile(B, block_b):
    """Pick the batch tile: multiple of 8, <= block_b, >= 2 grid steps when
    B > 8 (so v7x's two TensorCores both get work), bounded padding waste."""
    if B <= 8:
        return 8
    tb = min(block_b, _round_up(pl.cdiv(B, 2), 8))
    # Shrink (in multiples of 8) if rounding B up to whole tiles wastes rows.
    while tb > 8 and (_round_up(B, tb) - B) > max(0.125 * B, 8):
        tb -= 8
    return tb


def _mmnet3_kernel(
    text_ref, img_ref,
    wt_ref, bt_ref,          # text_proj  Linear(384-padded -> 512)  (bf16 W, f32 b)
    wi_ref, bi_ref,          # img_proj   Linear(1280 -> 512)
    wf_ref, bf_ref,          # fusion     Linear(512 -> 512)
    wc_ref, bc_ref,          # classifier Linear(512 -> 128-padded, cols >= 6 are 0)
    out_ref,
):
    # Inputs and weights arrive as bf16 (MXU-native); accumulate in f32.
    # text_proj / img_proj: Linear + ReLU (Dropout = identity in eval).
    t = jnp.maximum(
        jnp.dot(text_ref[...], wt_ref[...], preferred_element_type=jnp.float32)
        + bt_ref[...], 0.0)
    i = jnp.maximum(
        jnp.dot(img_ref[...], wi_ref[...], preferred_element_type=jnp.float32)
        + bi_ref[...], 0.0)

    # Cast once to bf16 and reuse for both the fusion-matmul operand and the
    # residual sum (fewer (tb, 512) f32 temporaries -> less VMEM / vst traffic).
    t16 = t.astype(jnp.bfloat16)
    i16 = i.astype(jnp.bfloat16)

    # fusion: Linear(text_out * img_out) + ReLU
    f = jnp.maximum(
        jnp.dot(t16 * i16, wf_ref[...], preferred_element_type=jnp.float32)
        + bf_ref[...], 0.0)

    fused = t16 + i16 + f.astype(jnp.bfloat16)

    # classifier (lane-dense padded output slab, bf16 writeback)
    out_ref[...] = (
        jnp.dot(fused, wc_ref[...], preferred_element_type=jnp.float32)
        + bc_ref[...]
    ).astype(out_ref.dtype)


def prepare_params(p_f32):
    """One-time host-side conversion: bf16 weights, K-padded text weight,
    lane-padded classifier weight/bias (pad columns are zero)."""
    wt = jnp.pad(p_f32["wt"], ((0, TEXT_DIM_PAD - TEXT_DIM), (0, 0)))
    wc = jnp.pad(p_f32["wc"], ((0, 0), (0, OUT_PAD - NUM_CLASSES)))
    bc = jnp.pad(p_f32["bc"], ((0, 0), (0, OUT_PAD - NUM_CLASSES)))
    return dict(
        wt=wt.astype(jnp.bfloat16), bt=p_f32["bt"].astype(jnp.float32),
        wi=p_f32["wi"].astype(jnp.bfloat16), bi=p_f32["bi"].astype(jnp.float32),
        wf=p_f32["wf"].astype(jnp.bfloat16), bf=p_f32["bf"].astype(jnp.float32),
        wc=wc.astype(jnp.bfloat16), bc=bc.astype(jnp.float32),
    )


@functools.partial(jax.jit, static_argnames=("block_b",))
def multimodal_net3(text_feat, img_feat, params, *, block_b=1024):
    """Fused MultiModalNet3 forward (eval mode) as one Pallas call.

    Preferred input: bf16 activations with text already zero-padded to 384
    columns (producer-side).  f32 / 300-wide inputs are accepted but cost an
    extra XLA pad/cast pass over the activation stream.
    """
    B = text_feat.shape[0]
    if text_feat.shape[1] == TEXT_DIM:
        # Fallback path: pad K 300 -> 384 here (prefer producer-side padding).
        text_feat = jnp.pad(text_feat, ((0, 0), (0, TEXT_DIM_PAD - TEXT_DIM)))
    assert text_feat.shape[1] == TEXT_DIM_PAD, text_feat.shape
    text_feat = text_feat.astype(jnp.bfloat16)   # no-op if already bf16
    img_feat = img_feat.astype(jnp.bfloat16)

    tb = _choose_batch_tile(B, block_b)
    b_pad = _round_up(B, tb)
    if b_pad != B:
        text_feat = jnp.pad(text_feat, ((0, b_pad - B), (0, 0)))
        img_feat = jnp.pad(img_feat, ((0, b_pad - B), (0, 0)))
    grid = (b_pad // tb,)

    def batch_spec(d):
        return pl.BlockSpec((tb, d), lambda i: (i, 0))

    def const_spec(r, c):
        # Weights/biases: constant index_map -> DMA'd once, VMEM-resident.
        # Single-buffered: no dead second pipeline copy (saves VMEM on v7x).
        return pl.BlockSpec((r, c), lambda i: (0, 0),
                            pipeline_mode=pl.Buffered(1))

    weight_bytes = sum(int(v.size) * v.dtype.itemsize for v in params.values())
    # VMEM footprint: double-buffered bf16 activation tiles (in + out),
    # single-buffered weights, plus (tb, 512) f32/bf16 compute temporaries.
    act_bytes = 2 * tb * (TEXT_DIM_PAD + IMG_DIM + OUT_PAD) * 2
    scratch_bytes = tb * HIDDEN * 24
    vmem_limit = int(1.5 * (weight_bytes + act_bytes + scratch_bytes)) + (8 << 20)
    vmem_limit = max(32 << 20, min(vmem_limit, 100 << 20))

    flops = 2 * b_pad * HIDDEN * (TEXT_DIM_PAD + IMG_DIM + HIDDEN + OUT_PAD)
    bytes_accessed = int(
        b_pad * (TEXT_DIM_PAD + IMG_DIM + OUT_PAD) * 2 + weight_bytes)

    out = pl.pallas_call(
        _mmnet3_kernel,
        out_shape=jax.ShapeDtypeStruct((b_pad, OUT_PAD), jnp.bfloat16),
        grid=grid,
        in_specs=[
            batch_spec(TEXT_DIM_PAD),                                # text tile
            batch_spec(IMG_DIM),                                     # img tile
            const_spec(TEXT_DIM_PAD, HIDDEN), const_spec(1, HIDDEN),  # text_proj
            const_spec(IMG_DIM, HIDDEN), const_spec(1, HIDDEN),       # img_proj
            const_spec(HIDDEN, HIDDEN), const_spec(1, HIDDEN),        # fusion
            const_spec(HIDDEN, OUT_PAD), const_spec(1, OUT_PAD),      # classifier
        ],
        out_specs=pl.BlockSpec((tb, OUT_PAD), lambda i: (i, 0)),
        compiler_params=pltpu.CompilerParams(
            dimension_semantics=("parallel",),      # shard batch tiles over TCs
            vmem_limit_bytes=vmem_limit,            # sized from the tile footprint
        ),
        cost_estimate=pl.CostEstimate(
            flops=flops, transcendentals=0, bytes_accessed=bytes_accessed),
    )(
        text_feat, img_feat,
        params["wt"], params["bt"],
        params["wi"], params["bi"],
        params["wf"], params["bf"],
        params["wc"], params["bc"],
    )
    return out[:B, :NUM_CLASSES].astype(jnp.float32)


def init_params(key):
    """Deterministic f32 parameter init (PyTorch-style uniform bounds)."""
    def linear(key, fan_in, fan_out):
        kw, kb = jax.random.split(key)
        bound = 1.0 / jnp.sqrt(float(fan_in))
        w = jax.random.uniform(kw, (fan_in, fan_out), jnp.float32, -bound, bound)
        b = jax.random.uniform(kb, (1, fan_out), jnp.float32, -bound, bound)
        return w, b

    k1, k2, k3, k4 = jax.random.split(key, 4)
    wt, bt = linear(k1, TEXT_DIM, HIDDEN)
    wi, bi = linear(k2, IMG_DIM, HIDDEN)
    wf, bf = linear(k3, HIDDEN, HIDDEN)
    wc, bc = linear(k4, HIDDEN, NUM_CLASSES)
    return dict(wt=wt, bt=bt, wi=wi, bi=bi, wf=wf, bf=bf, wc=wc, bc=bc)


def reference_forward(text_feat, img_feat, p):
    """Pure-JAX f32 reference for correctness checking (eval-mode dropout)."""
    t = jnp.maximum(text_feat @ p["wt"] + p["bt"], 0.0)
    i = jnp.maximum(img_feat @ p["wi"] + p["bi"], 0.0)
    f = jnp.maximum((t * i) @ p["wf"] + p["bf"], 0.0)
    fused = t + i + f
    return fused @ p["wc"] + p["bc"]


if __name__ == "__main__":
    key = jax.random.PRNGKey(0)
    kp, kt, ki = jax.random.split(key, 3)

    B = 16  # small batch; multiple of 8, gives a 2-step grid (both v7x cores)
    params_f32 = init_params(kp)
    kernel_params = prepare_params(params_f32)

    text_f32 = jax.random.normal(kt, (B, TEXT_DIM), jnp.float32)
    img_f32 = jax.random.normal(ki, (B, IMG_DIM), jnp.float32)

    # Producer-side preferred format: bf16, text K-padded to 384.
    text_feat = jnp.pad(
        text_f32, ((0, 0), (0, TEXT_DIM_PAD - TEXT_DIM))).astype(jnp.bfloat16)
    img_feat = img_f32.astype(jnp.bfloat16)

    out = multimodal_net3(text_feat, img_feat, kernel_params)
    out = jax.block_until_ready(out)

    # Reference sees the same bf16-rounded inputs, but f32 weights/math.
    ref = reference_forward(
        text_feat[:, :TEXT_DIM].astype(jnp.float32),
        img_feat.astype(jnp.float32), params_f32)

    assert out.shape == (B, NUM_CLASSES), out.shape
    # bf16 weights/activations inside the kernel -> looser tolerance vs f32 ref.
    assert jnp.allclose(out, ref, atol=5e-2, rtol=5e-2), "mismatch vs reference"

    print("KERNEL_OK")
</pallas_src>

<mosaic_0001>
module attributes {stable_mosaic.version = 11 : i64} {
  func.func @_mmnet3_kernel(%arg0: i32, %arg1: memref<8x384xbf16, #tpu.memory_space<vmem>>, %arg2: memref<8x1280xbf16, #tpu.memory_space<vmem>>, %arg3: memref<384x512xbf16, #tpu.memory_space<vmem>>, %arg4: memref<1x512xf32, #tpu.memory_space<vmem>>, %arg5: memref<1280x512xbf16, #tpu.memory_space<vmem>>, %arg6: memref<1x512xf32, #tpu.memory_space<vmem>>, %arg7: memref<512x512xbf16, #tpu.memory_space<vmem>>, %arg8: memref<1x512xf32, #tpu.memory_space<vmem>>, %arg9: memref<512x128xbf16, #tpu.memory_space<vmem>>, %arg10: memref<1x128xf32, #tpu.memory_space<vmem>>, %arg11: memref<8x128xbf16, #tpu.memory_space<vmem>>) attributes {dimension_semantics = [#tpu.dimension_semantics<parallel>], iteration_bounds = array<i64: 2>, scalar_prefetch = 0 : i64, scratch_operands = 0 : i64, tpu.core_type = #tpu.core_type<tc>, window_params = [{transform_indices = @transform_0, window_bounds = array<i64: 8, 384>}, {transform_indices = @transform_1, window_bounds = array<i64: 8, 1280>}, {pipeline_mode = #tpu.pipeline_mode<synchronous>, transform_indices = @transform_2, window_bounds = array<i64: 384, 512>}, {pipeline_mode = #tpu.pipeline_mode<synchronous>, transform_indices = @transform_3, window_bounds = array<i64: 1, 512>}, {pipeline_mode = #tpu.pipeline_mode<synchronous>, transform_indices = @transform_4, window_bounds = array<i64: 1280, 512>}, {pipeline_mode = #tpu.pipeline_mode<synchronous>, transform_indices = @transform_5, window_bounds = array<i64: 1, 512>}, {pipeline_mode = #tpu.pipeline_mode<synchronous>, transform_indices = @transform_6, window_bounds = array<i64: 512, 512>}, {pipeline_mode = #tpu.pipeline_mode<synchronous>, transform_indices = @transform_7, window_bounds = array<i64: 1, 512>}, {pipeline_mode = #tpu.pipeline_mode<synchronous>, transform_indices = @transform_8, window_bounds = array<i64: 512, 128>}, {pipeline_mode = #tpu.pipeline_mode<synchronous>, transform_indices = @transform_9, window_bounds = array<i64: 1, 128>}, {transform_indices = @transform_10, window_bounds = array<i64: 8, 128>}]} {
    %c0 = arith.constant 0 : index
    %c0_0 = arith.constant 0 : index
    %0 = vector.load %arg1[%c0, %c0_0] : memref<8x384xbf16, #tpu.memory_space<vmem>>, vector<8x384xbf16>
    %c0_1 = arith.constant 0 : index
    %c0_2 = arith.constant 0 : index
    %1 = vector.load %arg3[%c0_1, %c0_2] : memref<384x512xbf16, #tpu.memory_space<vmem>>, vector<384x512xbf16>
    %cst = arith.constant dense<0.000000e+00> : vector<8x512xf32>
    %2 = tpu.matmul %0, %1, %cst {dimension_numbers = #tpu.dot_dimension_numbers<[1], [0], [0], [1], [0, 0, 1, 1], [], []>} : vector<8x384xbf16>, vector<384x512xbf16>, vector<8x512xf32> -> vector<8x512xf32>
    %c0_3 = arith.constant 0 : index
    %c0_4 = arith.constant 0 : index
    %3 = vector.load %arg4[%c0_3, %c0_4] : memref<1x512xf32, #tpu.memory_space<vmem>>, vector<1x512xf32>
    %4 = vector.broadcast %3 : vector<1x512xf32> to vector<8x512xf32>
    %5 = arith.addf %2, %4 : vector<8x512xf32>
    %cst_5 = arith.constant 0.000000e+00 : f32
    %6 = vector.broadcast %cst_5 : f32 to vector<8x512xf32>
    %7 = arith.maximumf %5, %6 : vector<8x512xf32>
    %c0_6 = arith.constant 0 : index
    %c0_7 = arith.constant 0 : index
    %8 = vector.load %arg2[%c0_6, %c0_7] : memref<8x1280xbf16, #tpu.memory_space<vmem>>, vector<8x1280xbf16>
    %c0_8 = arith.constant 0 : index
    %c0_9 = arith.constant 0 : index
    %9 = vector.load %arg5[%c0_8, %c0_9] : memref<1280x512xbf16, #tpu.memory_space<vmem>>, vector<1280x512xbf16>
    %cst_10 = arith.constant dense<0.000000e+00> : vector<8x512xf32>
    %10 = tpu.matmul %8, %9, %cst_10 {dimension_numbers = #tpu.dot_dimension_numbers<[1], [0], [0], [1], [0, 0, 1, 1], [], []>} : vector<8x1280xbf16>, vector<1280x512xbf16>, vector<8x512xf32> -> vector<8x512xf32>
    %c0_11 = arith.constant 0 : index
    %c0_12 = arith.constant 0 : index
    %11 = vector.load %arg6[%c0_11, %c0_12] : memref<1x512xf32, #tpu.memory_space<vmem>>, vector<1x512xf32>
    %12 = vector.broadcast %11 : vector<1x512xf32> to vector<8x512xf32>
    %13 = arith.addf %10, %12 : vector<8x512xf32>
    %cst_13 = arith.constant 0.000000e+00 : f32
    %14 = vector.broadcast %cst_13 : f32 to vector<8x512xf32>
    %15 = arith.maximumf %13, %14 : vector<8x512xf32>
    %16 = arith.truncf %7 : vector<8x512xf32> to vector<8x512xbf16>
    %17 = arith.truncf %15 : vector<8x512xf32> to vector<8x512xbf16>
    %18 = arith.mulf %16, %17 : vector<8x512xbf16>
    %c0_14 = arith.constant 0 : index
    %c0_15 = arith.constant 0 : index
    %19 = vector.load %arg7[%c0_14, %c0_15] : memref<512x512xbf16, #tpu.memory_space<vmem>>, vector<512x512xbf16>
    %cst_16 = arith.constant dense<0.000000e+00> : vector<8x512xf32>
    %20 = tpu.matmul %18, %19, %cst_16 {dimension_numbers = #tpu.dot_dimension_numbers<[1], [0], [0], [1], [0, 0, 1, 1], [], []>} : vector<8x512xbf16>, vector<512x512xbf16>, vector<8x512xf32> -> vector<8x512xf32>
    %c0_17 = arith.constant 0 : index
    %c0_18 = arith.constant 0 : index
    %21 = vector.load %arg8[%c0_17, %c0_18] : memref<1x512xf32, #tpu.memory_space<vmem>>, vector<1x512xf32>
    %22 = vector.broadcast %21 : vector<1x512xf32> to vector<8x512xf32>
    %23 = arith.addf %20, %22 : vector<8x512xf32>
    %cst_19 = arith.constant 0.000000e+00 : f32
    %24 = vector.broadcast %cst_19 : f32 to vector<8x512xf32>
    %25 = arith.maximumf %23, %24 : vector<8x512xf32>
    %26 = arith.addf %16, %17 : vector<8x512xbf16>
    %27 = arith.truncf %25 : vector<8x512xf32> to vector<8x512xbf16>
    %28 = arith.addf %26, %27 : vector<8x512xbf16>
    %c0_20 = arith.constant 0 : index
    %c0_21 = arith.constant 0 : index
    %29 = vector.load %arg9[%c0_20, %c0_21] : memref<512x128xbf16, #tpu.memory_space<vmem>>, vector<512x128xbf16>
    %cst_22 = arith.constant dense<0.000000e+00> : vector<8x128xf32>
    %30 = tpu.matmul %28, %29, %cst_22 {dimension_numbers = #tpu.dot_dimension_numbers<[1], [0], [0], [1], [0, 0, 1, 1], [], []>} : vector<8x512xbf16>, vector<512x128xbf16>, vector<8x128xf32> -> vector<8x128xf32>
    %c0_23 = arith.constant 0 : index
    %c0_24 = arith.constant 0 : index
    %31 = vector.load %arg10[%c0_23, %c0_24] : memref<1x128xf32, #tpu.memory_space<vmem>>, vector<1x128xf32>
    %32 = vector.broadcast %31 : vector<1x128xf32> to vector<8x128xf32>
    %33 = arith.addf %30, %32 : vector<8x128xf32>
    %34 = arith.truncf %33 : vector<8x128xf32> to vector<8x128xbf16>
    %c0_25 = arith.constant 0 : index
    %c0_26 = arith.constant 0 : index
    %35 = vector.load %arg11[%c0_25, %c0_26] : memref<8x128xbf16, #tpu.memory_space<vmem>>, vector<8x128xbf16>
    tpu.vector_store %arg11[%c0_25, %c0_26], %34 {strides = array<i32>} : memref<8x128xbf16, #tpu.memory_space<vmem>>, vector<8x128xbf16>,
    return
  }
  func.func @transform_0(%arg0: i32) -> (i32, i32) {
    %c0_i32 = arith.constant 0 : i32
    %c0_i32_0 = arith.constant 0 : i32
    return %arg0, %c0_i32 : i32, i32
  }
  func.func @transform_1(%arg0: i32) -> (i32, i32) {
    %c0_i32 = arith.constant 0 : i32
    %c0_i32_0 = arith.constant 0 : i32
    return %arg0, %c0_i32 : i32, i32
  }
  func.func @transform_2(%arg0: i32) -> (i32, i32) {
    %c0_i32 = arith.constant 0 : i32
    %c0_i32_0 = arith.constant 0 : i32
    %c0_i32_1 = arith.constant 0 : i32
    return %c0_i32, %c0_i32_0 : i32, i32
  }
  func.func @transform_3(%arg0: i32) -> (i32, i32) {
    %c0_i32 = arith.constant 0 : i32
    %c0_i32_0 = arith.constant 0 : i32
    %c0_i32_1 = arith.constant 0 : i32
    return %c0_i32, %c0_i32_0 : i32, i32
  }
  func.func @transform_4(%arg0: i32) -> (i32, i32) {
    %c0_i32 = arith.constant 0 : i32
    %c0_i32_0 = arith.constant 0 : i32
    %c0_i32_1 = arith.constant 0 : i32
    return %c0_i32, %c0_i32_0 : i32, i32
  }
  func.func @transform_5(%arg0: i32) -> (i32, i32) {
    %c0_i32 = arith.constant 0 : i32
    %c0_i32_0 = arith.constant 0 : i32
    %c0_i32_1 = arith.constant 0 : i32
    return %c0_i32, %c0_i32_0 : i32, i32
  }
  func.func @transform_6(%arg0: i32) -> (i32, i32) {
    %c0_i32 = arith.constant 0 : i32
    %c0_i32_0 = arith.constant 0 : i32
    %c0_i32_1 = arith.constant 0 : i32
    return %c0_i32, %c0_i32_0 : i32, i32
  }
  func.func @transform_7(%arg0: i32) -> (i32, i32) {
    %c0_i32 = arith.constant 0 : i32
    %c0_i32_0 = arith.constant 0 : i32
    %c0_i32_1 = arith.constant 0 : i32
    return %c0_i32, %c0_i32_0 : i32, i32
  }
  func.func @transform_8(%arg0: i32) -> (i32, i32) {
    %c0_i32 = arith.constant 0 : i32
    %c0_i32_0 = arith.constant 0 : i32
    %c0_i32_1 = arith.constant 0 : i32
    return %c0_i32, %c0_i32_0 : i32, i32
  }
  func.func @transform_9(%arg0: i32) -> (i32, i32) {
    %c0_i32 = arith.constant 0 : i32
    %c0_i32_0 = arith.constant 0 : i32
    %c0_i32_1 = arith.constant 0 : i32
    return %c0_i32, %c0_i32_0 : i32, i32
  }
  func.func @transform_10(%arg0: i32) -> (i32, i32) {
    %c0_i32 = arith.constant 0 : i32
    %c0_i32_0 = arith.constant 0 : i32
    return %arg0, %c0_i32 : i32, i32
  }
}

</mosaic_0001>

<bundles_post_ra>
// kernel: multimodal_net3.1
= control target key start
LH: loop header
LB: loop body
LE: loop exit
PB: predicated region body
PF: predicated region fallthrough
CT: control target
= control target key end

     0   :  { %s9200_s0 = inlined_call_operand.hbm [shape: bf16[16,384], index: 0, kind: input, shape index: {}]   ;;  %s9201_s1 = inlined_call_operand.hbm [shape: bf16[16,1280], index: 1, kind: input, shape index: {}]   ;;  %s9202_s2 = inlined_call_operand.hbm [shape: bf16[384,512], index: 2, kind: input, shape index: {}]   ;;  %s9203_s3 = inlined_call_operand.hbm [shape: f32[1,512], index: 3, kind: input, shape index: {}]   ;;  %s9204_s4 = inlined_call_operand.hbm [shape: bf16[1280,512], index: 4, kind: input, shape index: {}]   ;;  %s9205_s5 = inlined_call_operand.hbm [shape: f32[1,512], index: 5, kind: input, shape index: {}]   ;;  %s9206_s6 = inlined_call_operand.hbm [shape: bf16[512,512], index: 6, kind: input, shape index: {}]   ;;  %s9207_s7 = inlined_call_operand.hbm [shape: f32[1,512], index: 7, kind: input, shape index: {}]   ;;  %s9208_s8 = inlined_call_operand.hbm [shape: bf16[512,128], index: 8, kind: input, shape index: {}]   ;;  %s9209_s9 = inlined_call_operand.hbm [shape: f32[1,128], index: 9, kind: input, shape index: {}]   ;;  %s9210_s10 = inlined_call_operand.vmem [shape: bf16[16,128], index: 10, kind: output, shape index: {}]  }
   0x1   :  { %9211 = sst [smem:[#allocation25_spill]] %s9200_s0 }
   0x2   :  { %9212 = sst [smem:[#allocation26_spill]] %s9202_s2 }
   0x3   :  { %9213 = sst [smem:[#allocation27_spill]] %s9203_s3 }
   0x4   :  { %9214 = sst [smem:[#allocation28_spill]] %s9204_s4 }
   0x5   :  { %9215 = sst [smem:[#allocation29_spill]] %s9205_s5 }
   0x6   :  { %15 = vsyncpa [#allocation3], 0 }
   0x7   :  { %17 = vsyncpa [#allocation3 + $0x1], 0 }
   0x8   :  { %18 = vsyncpa [#allocation5], 0 }
   0x9   :  { %20 = vsyncpa [#allocation5 + $0x1], 0 }
   0xa   :  { %21 = vsyncpa [#allocation8], 0 }
   0xb   :  { %22 = vsyncpa [#allocation11], 0 }
   0xc   :  { %23 = vsyncpa [#allocation14], 0 }
   0xd   :  { %24 = vsyncpa [#allocation17], 0  ;;  %s8776_s13 = smov 0   ;;  %s8778_s14 = smov 0  }
   0xe   :  { %s8780_s15 = smov 0   ;;  %s8782_s16 = smov 0  }
   0xf LB: > { %s9216_s2 = sld [smem:[#allocation26_spill]]  ;;  %s8800_s20 = sadd.s32 4294967295, %s8707_s16   ;;  %s8707_s16 = sphi %s8782_s16, %s9228_s16   ;;  %s8703_s15 = sphi %s8780_s15, %s9227_s15   ;;  %s8699_s14 = sphi %s8778_s14, %s9226_s14   ;;  %s8695_s13 = sphi %s8776_s13, %s9225_s13  }
  0x10   : > { %p5308_p0 = scmp.ge.s32.totalorder %s8707_s16, 1  ;;  %p51_p1 = scmp.eq.s32.totalorder %s8800_s20, 0 }
  0x11   : > { %p281_p2 = scmp.lt.s32.totalorder %s8707_s16, 3  ;;  %s8709_s22 = smov [#allocation6]  }
  0x12   : > { %s294_s23 = sshll.u32 %s8709_s22, 4  ;;  %s9218_s3 = sld [smem:[#allocation27_spill]]  ;;  %s295_s23 = int_to_ptr.vmem [resolvable:$true] %s294_s23 }
  0x13   : > { %p8805_p3 = pnand %p5308_p0, %p281_p2  ;;  %s9220_s5 = sld [smem:[#allocation29_spill]] }
  0x14   : > { %s8710_s11 = smov [#allocation7]   ;;  %s8711_s17 = smov 256  }
  0x15   : > { %s292_s19 = sshll.u32 %s9216_s2, 4  ;;  %p8254_p4 = pneg %p8805_p3  ;;  %s293_s19 = int_to_ptr.hbm [resolvable:$true] %s292_s19 }
  0x16   : > { %s309_s12 = sshll.u32 %s8710_s11, 4  ;;  %s8712_s18 = smov 16   ;;  %s310_s12 = int_to_ptr.vmem [resolvable:$true] %s309_s12 }
  0x17   : > { %p8816_p5 = pnand %p8254_p4, %p51_p1  ;;  %s359_s25 = sshll.u32 %s9207_s7, 4  ;;  %s360_s25 = int_to_ptr.hbm [resolvable:$true] %s359_s25 }
  0x18   : > { %s307_s26 = sshll.u32 %s9218_s3, 4  ;;  %s8713_s28 = smov [#allocation10]   ;;  %s308_s26 = int_to_ptr.hbm [resolvable:$true] %s307_s26 }
  0x19   : > { %s333_s30 = sshll.u32 %s9220_s5, 4  ;;  %s335_s29 = sshll.u32 %s8713_s28, 4  ;;  %s334_s30 = int_to_ptr.hbm [resolvable:$true] %s333_s30  ;;  %s336_s29 = int_to_ptr.vmem [resolvable:$true] %s335_s29 }
  0x1a   : > { %8257 = dma.hbm_to_vmem [thread:$0]  (!%p8816_p5), %s293_s19, 12288, %s295_s23, [#allocation5], %s8711_s17, %s8711_s17, %s8712_s18  }
  0x1b   : > { %8260 = dma.hbm_to_vmem [thread:$0]  (!%p8816_p5), %s308_s26, 64, %s310_s12, [#allocation8]  }
  0x1c   : > { %8266 = dma.hbm_to_vmem [thread:$0]  (!%p8816_p5), %s334_s30, 64, %s336_s29, [#allocation11]  }
  0x1d   : > { %s8714_s11 = smov [#allocation13]   ;;  %s9221_s4 = sld [smem:[#allocation28_spill]] }
  0x1e   : > { %s361_s2 = sshll.u32 %s8714_s11, 4  ;;  %s344_s12 = sshll.u32 %s9206_s6, 4  ;;  %s362_s2 = int_to_ptr.vmem [resolvable:$true] %s361_s2  ;;  %s345_s12 = int_to_ptr.hbm [resolvable:$true] %s344_s12 }
  0x1f   : > { %8272 = dma.hbm_to_vmem [thread:$0]  (!%p8816_p5), %s360_s25, 64, %s362_s2, [#allocation14]  }
  0x20   : > { %s8715_s22 = smov [#allocation9]   ;;  %s8716_s3 = smov [#allocation12]  }
  0x21   : > { %s320_s24 = sshll.u32 %s8715_s22, 4  ;;  %s346_s5 = sshll.u32 %s8716_s3, 4  ;;  %s321_s24 = int_to_ptr.vmem [resolvable:$true] %s320_s24  ;;  %s347_s5 = int_to_ptr.vmem [resolvable:$true] %s346_s5 }
  0x22   : > { %s370_s2 = sshll.u32 %s9208_s8, 4  ;;  %s8717_s25 = smov [#allocation15]   ;;  %s371_s2 = int_to_ptr.hbm [resolvable:$true] %s370_s2 }
  0x23   : > { %s318_s19 = sshll.u32 %s9221_s4, 4  ;;  %s372_s29 = sshll.u32 %s8717_s25, 4  ;;  %s319_s19 = int_to_ptr.hbm [resolvable:$true] %s318_s19  ;;  %s373_s29 = int_to_ptr.vmem [resolvable:$true] %s372_s29 }
  0x24   : > { %8263 = dma.hbm_to_vmem [thread:$0]  (!%p8816_p5), %s319_s19, 40960, %s321_s24, [#allocation8], %s8711_s17, %s8711_s17, %s8712_s18  }
  0x25   : > { %8269 = dma.hbm_to_vmem [thread:$0]  (!%p8816_p5), %s345_s12, 16384, %s347_s5, [#allocation11], %s8711_s17, %s8711_s17, %s8712_s18  }
  0x26   : > { %s385_s23 = sshll.u32 %s9209_s9, 4  ;;  %s8718_s26 = smov 64   ;;  %s386_s23 = int_to_ptr.hbm [resolvable:$true] %s385_s23 }
  0x27   : > { %s8719_s22 = smov 4   ;;  %s8720_s17 = smov [#allocation16]  }
  0x28   : > { %8275 = dma.hbm_to_vmem [thread:$0]  (!%p8816_p5), %s371_s2, 4096, %s373_s29, [#allocation14], %s8718_s26, %s8718_s26, %s8719_s22  }
  0x29   : > { %s387_s18 = sshll.u32 %s8720_s17, 4  ;;  %s8864_s12 = sadd.s32 1, %s8707_s16   ;;  %s388_s18 = int_to_ptr.vmem [resolvable:$true] %s387_s18 }
  0x2a   : > { %8278 = dma.hbm_to_vmem [thread:$0]  (!%p8816_p5), %s386_s23, 16, %s388_s18, [#allocation17]  }
  0x2b   : > { %s37_s24 = sadd.s32 1, %s8703_s15  ;;  %s34_s3 = ssub.s32 %s8707_s16, %s8864_s12 }
  0x2c   : > { %p44_p6 = scmp.ne.s32.totalorder %s8703_s15, %s8699_s14  ;;  %p35_p7 = scmp.eq.s32.totalorder %s34_s3, 0 }
  0x2d   : > { %p45_p8 = scmp.eq.s32.totalorder %s8707_s16, 0  ;;  %p50_p9 = scmp.ne.s32.totalorder %s8699_s14, %s8695_s13 }
  0x2e   : > { %p8294_p10 = scmp.lt.s32.totalorder %s8707_s16, 2  ;;  %s8885_s27 = sand.u32 1, %s8703_s15  }
  0x2f   : > { %s8876_s5 = scalar_select %p35_p7, %s8703_s15, %s37_s24  }
  0x30   : > { %p46_p11 = por %p45_p8, %p44_p6  ;;  %p8880_p12 = por %p51_p1, %p50_p9 }
  0x31   : > { %s8213_s28 = smul.u32 12, %s8707_s16  ;;  %s9223_s0 = sld [smem:[#allocation25_spill]] }
  0x32   : > { %s8212_s2 = smul.u32 12, %s8885_s27  ;;  %p8892_p13 = pnand %p8294_p10, %p46_p11 }
  0x33   : > { %s399_s22 = scalar_lea.sflag [#allocation3], %s8885_s27 }
  0x34   : > { %s402_s23 = scalar_lea.vmem [#allocation2], %s8212_s2  ;;  %p8593_p2 = pneg %p8892_p13 }
  0x35   : > { %s411_s26 = sshll.u32 %s402_s23, 4  ;;  %s412_s26 = int_to_ptr.vmem [resolvable:$true] %s411_s26 }
  0x37   : > { %s407_s11 = scalar_lea.hbm %s9223_s0, %s8213_s28  ;;  %s8596_s28 = scalar_lea.hbm %s9223_s0, 24 }
  0x38   : > { %s409_s19 = sshll.u32 %s407_s11, 4  ;;  %s410_s19 = int_to_ptr.hbm [resolvable:$true] %s409_s19 }
  0x39   : > { %s8589_s17 = sshra.s32 %s410_s19, 4  ;;  %s8590_s17 = int_to_ptr.hbm [resolvable:$true] %s8589_s17 }
  0x3a   : > { %s8591_s18 = scalar_lea.hbm %s8590_s17, 12  ;;  %p8597_p6 = scmp.lt.s32.totalorder %s8590_s17, %s9223_s0 }
  0x3b   : > { %p8592_p0 = scmp.ne.s32.totalorder %s8590_s17, %s8591_s18  ;;  %p8598_p7 = scmp.lt.s32.totalorder %s8596_s28, %s8591_s18 }
  0x3d   : > { %p8594_p4 = pnand %p8593_p2, %p8592_p0  ;;  %p8599_p8 = por %p8598_p7, %p8597_p6 }
  0x3f   : > { %p8595_p5 = pneg %p8594_p4 }
  0x41   : > { %p8600_p9 = pnand %p8599_p8, %p8595_p5 }
  0x43   : > { %8603 = shalt.err (!%p8600_p9)
}
  0x44   : > { %8282 = dma.hbm_to_vmem [thread:$0]  (!%p8892_p13), %s410_s19, 192, %s412_s26, %s399_s22  }
  0x45   : > { %s418_s2 = sand.u32 1, %s8707_s16   ;;  %s8214_s11 = smul.u32 40, %s8885_s27 }
  0x46   : > { %s8215_s23 = smul.u32 40, %s8707_s16  ;;  %s419_s28 = scalar_lea.sflag [#allocation5], %s418_s2 }
  0x47   : > { %s422_s25 = scalar_lea.vmem [#allocation4], %s8214_s11  ;;  %s8626_s19 = scalar_lea.hbm %s9201_s1, 80 }
  0x48   : > { %s427_s4 = scalar_lea.hbm %s9201_s1, %s8215_s23  ;;  %s431_s17 = sshll.u32 %s422_s25, 4  ;;  %s432_s17 = int_to_ptr.vmem [resolvable:$true] %s431_s17 }
  0x49   : > { %s429_s18 = sshll.u32 %s427_s4, 4  ;;  %s430_s18 = int_to_ptr.hbm [resolvable:$true] %s429_s18 }
  0x4a   : > { %s8619_s29 = sshra.s32 %s430_s18, 4  ;;  %s8620_s29 = int_to_ptr.hbm [resolvable:$true] %s8619_s29 }
  0x4b   : > { %s8621_s0 = scalar_lea.hbm %s8620_s29, 40  ;;  %p8627_p4 = scmp.lt.s32.totalorder %s8620_s29, %s9201_s1 }
  0x4c   : > { %p8622_p10 = scmp.ne.s32.totalorder %s8620_s29, %s8621_s0  ;;  %p8628_p5 = scmp.lt.s32.totalorder %s8626_s19, %s8621_s0 }
  0x4e   : > { %p8624_p11 = pnand %p8622_p10, %p8593_p2  ;;  %p8629_p6 = por %p8628_p5, %p8627_p4 }
  0x50   : > { %p8625_p0 = pneg %p8624_p11 }
  0x52   : > { %p8630_p7 = pnand %p8629_p6, %p8625_p0 }
  0x54   : > { %8633 = shalt.err (!%p8630_p7)
}
  0x55   : > { %8285 = dma.hbm_to_vmem [thread:$0]  (!%p8892_p13), %s430_s18, 640, %s432_s17, %s419_s28  }
  0x56   : > { %440 = sbr.rel (%p8805_p3) target bundleno = 1022 (0x3fe), region = 60  ;;  %s442_s4 = sand.u32 (!%p8805_p3), 1, %s8699_s14  }
  0x57   : > { %s8216_s2 = smul.u32 (!%p8805_p3), 12, %s442_s4  ;;  %s443_s11 = scalar_lea.sflag (!%p8805_p3), [#allocation3], %s442_s4 }
  0x59   : > { %s8930_s23 = scalar_lea.vmem (!%p8805_p3), [#allocation2], %s8216_s2 }
  0x5b   : > { %8666 = dma.done.wait (%p8880_p12), %s443_s11, 192  }
  0x5c   : > { %8668 = vsyncadd (%p8880_p12), %s443_s11, 4294967104  ;;  %s452_s0 = sand.u32 1, %s8800_s20   ;;  %s8217_s13 = smul.u32 40, %s442_s4 }
  0x5d   : > { %s453_s24 = scalar_lea.sflag [#allocation5], %s452_s0 }
  0x5e   : > { %s8937_s3 = scalar_lea.vmem [#allocation4], %s8217_s13 }
  0x5f   : > { %8670 = dma.done.wait (%p8880_p12), %s453_s24, 640  }
  0x60   : > { %8672 = vsyncadd (%p8880_p12), %s453_s24, 4294966656 }
  0x61   : > { %8674 = dma.done.wait (%p51_p1), [#allocation5], 12288  }
  0x62   : > { %8676 = vsyncadd (%p51_p1), [#allocation5], 4294955008 }
  0x63   : > { %8678 = dma.done.wait (%p51_p1), [#allocation8], 41024  }
  0x64   : > { %8680 = vsyncadd (%p51_p1), [#allocation8], 4294926272 }
  0x65   : > { %8682 = dma.done.wait (%p51_p1), [#allocation11], 16448  }
  0x66   : > { %8684 = vsyncadd (%p51_p1), [#allocation11], 4294950848 }
  0x67   : > { %8686 = dma.done.wait (%p51_p1), [#allocation14], 4160  }
  0x68   : > { %8688 = vsyncadd (%p51_p1), [#allocation14], 4294963136 }
  0x69   : > { %8690 = dma.done.wait (%p51_p1), [#allocation17], 16  }
  0x6a   : > { %8692 = vsyncadd (%p51_p1), [#allocation17], 4294967280  ;;  %v5444_v0 = vld [vmem:[#allocation6 + $0xe0] sm:$0xf]  ;;  %v7666_v1 = vld [vmem:[#allocation6 + $0xec] sm:$0xf0] }
  0x6b   : > { %v5572_v2 = vld [vmem:[#allocation6 + $0x1e0] sm:$0xf]  ;;  %v5445_v3 = vor.u32 %v7666_v1, %v5444_v0  ;;  %v7698_v4 = vld [vmem:[#allocation6 + $0x1ec] sm:$0xf0]  ;;  %v7664_v9 = vld [vmem:[#allocation6 + $0xe4] sm:$0xf] }
  0x6c   : > { %v5700_v5 = vld [vmem:[#allocation6 + $0x2e0] sm:$0xf]  ;;  %v7730_v6 = vld [vmem:[#allocation6 + $0x2ec] sm:$0xf0]  ;;  %v5573_v7 = vor.u32 %v7698_v4, %v5572_v2  ;;  %v5446_v10 = vld [vmem:[#allocation6 + $0xf0] sm:$0xf0] }
  0x6d   : > { %v5701_v8 = vor.u32 %v7730_v6, %v5700_v5  ;;  %v5428_v11 = vld [vmem:[#allocation6 + $0xc0] sm:$0xf]  ;;  %1141 = vmatpush.bf16.msra.mxu0 %v5445_v3  ;;  %v5449_v12 = vor.u32 %v7664_v9, %v5446_v10  ;;  %v7662_v13 = vld [vmem:[#allocation6 + $0xcc] sm:$0xf0]  ;;  %v7660_v20 = vld [vmem:[#allocation6 + $0xc4] sm:$0xf] }
  0x6e   : > { %v5556_v14 = vld [vmem:[#allocation6 + $0x1c0] sm:$0xf]  ;;  %v7694_v15 = vld [vmem:[#allocation6 + $0x1cc] sm:$0xf0]  ;;  %1154 = vmatpush.bf16.msra.mxu1 %v5573_v7  ;;  %v5429_v16 = vor.u32 %v7662_v13, %v5428_v11  ;;  %v5430_v22 = vld [vmem:[#allocation6 + $0xd0] sm:$0xf0] }
  0x6f   : > { %1167 = vmatpush.bf16.msra.mxu2 %v5701_v8  ;;  %v5557_v17 = vor.u32 %v7694_v15, %v5556_v14  ;;  %v5684_v18 = vld [vmem:[#allocation6 + $0x2c0] sm:$0xf]  ;;  %v7726_v19 = vld [vmem:[#allocation6 + $0x2cc] sm:$0xf0]  ;;  %1180 = vmatpush.bf16.msra.mxu3 %v5449_v12  ;;  %v5433_v25 = vor.u32 %v7660_v20, %v5430_v22  ;;  %v7656_v31 = vld [vmem:[#allocation6 + $0xa4] sm:$0xf] }
  0x70   : > { %v5685_v21 = vor.u32 %v7726_v19, %v5684_v18  ;;  %v5412_v23 = vld [vmem:[#allocation6 + $0xa0] sm:$0xf]  ;;  %v7658_v24 = vld [vmem:[#allocation6 + $0xac] sm:$0xf0]  ;;  %v5414_v32 = vld [vmem:[#allocation6 + $0xb0] sm:$0xf0] }
  0x71   : > { %v5540_v26 = vld [vmem:[#allocation6 + $0x1a0] sm:$0xf]  ;;  %v7690_v27 = vld [vmem:[#allocation6 + $0x1ac] sm:$0xf0]  ;;  %1142 = vmatpush.bf16.msra.mxu0 %v5429_v16  ;;  %v5413_v29 = vor.u32 %v7658_v24, %v5412_v23  ;;  %v5417_v38 = vor.u32 %v7656_v31, %v5414_v32  ;;  %v7652_v42 = vld [vmem:[#allocation6 + $0x84] sm:$0xf] }
  0x72   : > { %v5668_v28 = vld [vmem:[#allocation6 + $0x2a0] sm:$0xf]  ;;  %v7722_v30 = vld [vmem:[#allocation6 + $0x2ac] sm:$0xf0]  ;;  %1155 = vmatpush.bf16.msra.mxu1 %v5557_v17  ;;  %v5541_v33 = vor.u32 %v7690_v27, %v5540_v26  ;;  %v5398_v43 = vld [vmem:[#allocation6 + $0x90] sm:$0xf0] }
  0x73   : > { %1168 = vmatpush.bf16.msra.mxu2 %v5685_v21  ;;  %v5669_v34 = vor.u32 %v7722_v30, %v5668_v28  ;;  %v5396_v35 = vld [vmem:[#allocation6 + $0x80] sm:$0xf]  ;;  %v7654_v36 = vld [vmem:[#allocation6 + $0x8c] sm:$0xf0]  ;;  %1181 = vmatpush.bf16.msra.mxu3 %v5433_v25  ;;  %v5401_v50 = vor.u32 %v7652_v42, %v5398_v43  ;;  %v7648_v54 = vld [vmem:[#allocation6 + $0x64] sm:$0xf] }
  0x74   : > { %v5524_v37 = vld [vmem:[#allocation6 + $0x180] sm:$0xf]  ;;  %v7686_v39 = vld [vmem:[#allocation6 + $0x18c] sm:$0xf0]  ;;  %v5397_v44 = vor.u32 %v7654_v36, %v5396_v35  ;;  %v5382_v55 = vld [vmem:[#allocation6 + $0x70] sm:$0xf0] }
  0x75   : > { %v5652_v40 = vld [vmem:[#allocation6 + $0x280] sm:$0xf]  ;;  %v7718_v41 = vld [vmem:[#allocation6 + $0x28c] sm:$0xf0]  ;;  %1143 = vmatpush.bf16.msra.mxu0 %v5413_v29  ;;  %v5525_v45 = vor.u32 %v7686_v39, %v5524_v37  ;;  %v5385_v62 = vor.u32 %v7648_v54, %v5382_v55  ;;  %v7644_v2 = vld [vmem:[#allocation6 + $0x44] sm:$0xf] }
  0x76   : > { %1156 = vmatpush.bf16.msra.mxu1 %v5541_v33  ;;  %v5653_v46 = vor.u32 %v7718_v41, %v5652_v40  ;;  %v5380_v47 = vld [vmem:[#allocation6 + $0x60] sm:$0xf]  ;;  %v7650_v48 = vld [vmem:[#allocation6 + $0x6c] sm:$0xf0]  ;;  %v5366_v3 = vld [vmem:[#allocation6 + $0x50] sm:$0xf0] }
  0x77   : > { %1169 = vmatpush.bf16.msra.mxu2 %v5669_v34  ;;  %v5508_v49 = vld [vmem:[#allocation6 + $0x160] sm:$0xf]  ;;  %1182 = vmatpush.bf16.msra.mxu3 %v5417_v38  ;;  %v7682_v51 = vld [vmem:[#allocation6 + $0x16c] sm:$0xf0]  ;;  %v5381_v56 = vor.u32 %v7650_v48, %v5380_v47  ;;  %v5369_v10 = vor.u32 %v7644_v2, %v5366_v3  ;;  %v7640_v14 = vld [vmem:[#allocation6 + $0x24] sm:$0xf] }
  0x78   : > { %v5636_v52 = vld [vmem:[#allocation6 + $0x260] sm:$0xf]  ;;  %v7714_v53 = vld [vmem:[#allocation6 + $0x26c] sm:$0xf0]  ;;  %v5509_v57 = vor.u32 %v7682_v51, %v5508_v49  ;;  %v5350_v15 = vld [vmem:[#allocation6 + $0x30] sm:$0xf0] }
  0x79   : > { %1144 = vmatpush.bf16.msra.mxu0 %v5397_v44  ;;  %v5637_v58 = vor.u32 %v7714_v53, %v5636_v52  ;;  %v5364_v59 = vld [vmem:[#allocation6 + $0x40] sm:$0xf]  ;;  %v7646_v60 = vld [vmem:[#allocation6 + $0x4c] sm:$0xf0]  ;;  %v5353_v24 = vor.u32 %v7640_v14, %v5350_v15  ;;  %v7636_v26 = vld [vmem:[#allocation6 + $0x4] sm:$0xf] }
  0x7a   : > { %1157 = vmatpush.bf16.msra.mxu1 %v5525_v45  ;;  %v5492_v61 = vld [vmem:[#allocation6 + $0x140] sm:$0xf]  ;;  %v7678_v63 = vld [vmem:[#allocation6 + $0x14c] sm:$0xf0]  ;;  %v5365_v4 = vor.u32 %v7646_v60, %v5364_v59  ;;  %v5334_v27 = vld [vmem:[#allocation6 + $0x10] sm:$0xf0] }
  0x7b   : > { %1170 = vmatpush.bf16.msra.mxu2 %v5653_v46  ;;  %1183 = vmatpush.bf16.msra.mxu3 %v5401_v50  ;;  %v5620_v0 = vld [vmem:[#allocation6 + $0x240] sm:$0xf]  ;;  %v7710_v1 = vld [vmem:[#allocation6 + $0x24c] sm:$0xf0]  ;;  %v5493_v5 = vor.u32 %v7678_v63, %v5492_v61  ;;  %v7696_v28 = vld [vmem:[#allocation6 + $0x1e4] sm:$0xf]  ;;  %v5337_v39 = vor.u32 %v7636_v26, %v5334_v27 }
  0x7c   : > { %v5621_v6 = vor.u32 %v7710_v1, %v5620_v0  ;;  %v5348_v7 = vld [vmem:[#allocation6 + $0x20] sm:$0xf]  ;;  %v7642_v8 = vld [vmem:[#allocation6 + $0x2c] sm:$0xf0]  ;;  %v5574_v29 = vld [vmem:[#allocation6 + $0x1f0] sm:$0xf0] }
  0x7d   : > { %1145 = vmatpush.bf16.msra.mxu0 %v5381_v56  ;;  %v5476_v9 = vld [vmem:[#allocation6 + $0x120] sm:$0xf]  ;;  %v7674_v11 = vld [vmem:[#allocation6 + $0x12c] sm:$0xf0]  ;;  %v5349_v16 = vor.u32 %v7642_v8, %v5348_v7  ;;  %v7728_v30 = vld [vmem:[#allocation6 + $0x2e4] sm:$0xf]  ;;  %v5577_v40 = vor.u32 %v7696_v28, %v5574_v29 }
  0x7e   : > { %1158 = vmatpush.bf16.msra.mxu1 %v5509_v57  ;;  %v5604_v12 = vld [vmem:[#allocation6 + $0x220] sm:$0xf]  ;;  %v7706_v13 = vld [vmem:[#allocation6 + $0x22c] sm:$0xf0]  ;;  %v5477_v19 = vor.u32 %v7674_v11, %v5476_v9  ;;  %v5702_v32 = vld [vmem:[#allocation6 + $0x2f0] sm:$0xf0] }
  0x7f   : > { %1171 = vmatpush.bf16.msra.mxu2 %v5637_v58  ;;  %1184 = vmatpush.bf16.msra.mxu3 %v5385_v62  ;;  %v5332_v17 = vld [vmem:[#allocation6] sm:$0xf]  ;;  %v7638_v18 = vld [vmem:[#allocation6 + $0xc] sm:$0xf0]  ;;  %v5605_v20 = vor.u32 %v7706_v13, %v5604_v12  ;;  %v5452_v33 = vld [vmem:[#allocation6 + $0xe8] sm:$0xf]  ;;  %v5705_v41 = vor.u32 %v7728_v30, %v5702_v32 }
  0x80   : > { %v5460_v21 = vld [vmem:[#allocation6 + $0x100] sm:$0xf]  ;;  %v7670_v22 = vld [vmem:[#allocation6 + $0x10c] sm:$0xf0]  ;;  %v5333_v31 = vor.u32 %v7638_v18, %v5332_v17  ;;  %v7667_v34 = vld [vmem:[#allocation6 + $0xf4] sm:$0xf0] }
  0x81   : > { %1146 = vmatpush.bf16.msra.mxu0 %v5365_v4  ;;  %v5588_v23 = vld [vmem:[#allocation6 + $0x200] sm:$0xf]  ;;  %v7702_v25 = vld [vmem:[#allocation6 + $0x20c] sm:$0xf0]  ;;  %v5461_v35 = vor.u32 %v7670_v22, %v5460_v21  ;;  %v5580_v37 = vld [vmem:[#allocation6 + $0x1e8] sm:$0xf]  ;;  %v5453_v42 = vor.u32 %v7667_v34, %v5452_v33 }
  0x82   : > { %1159 = vmatpush.bf16.msra.mxu1 %v5493_v5  ;;  %v5589_v36 = vor.u32 %v7702_v25, %v5588_v23  ;;  %v7699_v38 = vld [vmem:[#allocation6 + $0x1f4] sm:$0xf0]  ;;  %v7692_v43 = vld [vmem:[#allocation6 + $0x1c4] sm:$0xf]  ;;  %v5558_v44 = vld [vmem:[#allocation6 + $0x1d0] sm:$0xf0] }
  0x83   : > { %1172 = vmatpush.bf16.msra.mxu2 %v5621_v6  ;;  %1185 = vmatpush.bf16.msra.mxu3 %v5369_v10  ;;  %v7724_v45 = vld [vmem:[#allocation6 + $0x2c4] sm:$0xf]  ;;  %v5581_v46 = vor.u32 %v7699_v38, %v5580_v37  ;;  %v5686_v47 = vld [vmem:[#allocation6 + $0x2d0] sm:$0xf0]  ;;  %v5436_v48 = vld [vmem:[#allocation6 + $0xc8] sm:$0xf]  ;;  %v5561_v52 = vor.u32 %v7692_v43, %v5558_v44 }
  0x84   : > { %v7663_v49 = vld [vmem:[#allocation6 + $0xd4] sm:$0xf0]  ;;  %v5564_v50 = vld [vmem:[#allocation6 + $0x1c8] sm:$0xf]  ;;  %v7688_v53 = vld [vmem:[#allocation6 + $0x1a4] sm:$0xf]  ;;  %v5689_v54 = vor.u32 %v7724_v45, %v5686_v47 }
  0x85   : > { %1147 = vmatpush.bf16.msra.mxu0 %v5349_v16  ;;  %v7695_v51 = vld [vmem:[#allocation6 + $0x1d4] sm:$0xf0]  ;;  %v5437_v55 = vor.u32 %v7663_v49, %v5436_v48  ;;  %v5542_v56 = vld [vmem:[#allocation6 + $0x1b0] sm:$0xf0]  ;;  %v7720_v57 = vld [vmem:[#allocation6 + $0x2a4] sm:$0xf] }
  0x86   : > { %1160 = vmatpush.bf16.msra.mxu1 %v5477_v19  ;;  %v542_v58 = vld [vmem:[%s8930_s23] sm:$0xff]  ;;  %v5565_v59 = vor.u32 %v7695_v51, %v5564_v50  ;;  %v5670_v60 = vld [vmem:[#allocation6 + $0x2b0] sm:$0xf0]  ;;  %v5545_v3 = vor.u32 %v7688_v53, %v5542_v56  ;;  %v543_v6 = vld [vmem:[%s8930_s23 + $0x8] sm:$0xf]  ;;  %p538_p1 = scmp.lt.s32.totalorder %s8800_s20, 1 }
  0x87   : > { %1173 = vmatpush.bf16.msra.mxu2 %v5605_v20  ;;  %1186 = vmatpush.bf16.msra.mxu3 %v5353_v24  ;;  %v5420_v61 = vld [vmem:[#allocation6 + $0xa8] sm:$0xf]  ;;  %v7659_v62 = vld [vmem:[#allocation6 + $0xb4] sm:$0xf0]  ;;  %v652_v63 = vunpack.c.l.b16 %v542_v58  ;;  %v653_v0 = vunpack.c.h.b16 %v542_v58  ;;  %v5673_v7 = vor.u32 %v7720_v57, %v5670_v60  ;;  %v7684_v9 = vld [vmem:[#allocation6 + $0x184] sm:$0xf]  ;;  %v654_v12 = vunpack.c.l.b16 %v543_v6 }
  0x88   : > { %v5548_v1 = vld [vmem:[#allocation6 + $0x1a8] sm:$0xf]  ;;  %v7691_v2 = vld [vmem:[#allocation6 + $0x1b4] sm:$0xf0]  ;;  %v5421_v8 = vor.u32 %v7659_v62, %v5420_v61  ;;  %v5526_v10 = vld [vmem:[#allocation6 + $0x190] sm:$0xf0] }
  0x89   : > { %1148 = vmatpush.bf16.msra.mxu0 %v5333_v31  ;;  %v8964_v4 = vpack.c.b16 %v652_v63, %v652_v63  ;;  %v8966_v5 = vpack.c.b16 %v653_v0, %v653_v0  ;;  %v7716_v11 = vld [vmem:[#allocation6 + $0x284] sm:$0xf]  ;;  %v5549_v13 = vor.u32 %v7691_v2, %v5548_v1  ;;  %v5654_v14 = vld [vmem:[#allocation6 + $0x290] sm:$0xf0]  ;;  %v5404_v15 = vld [vmem:[#allocation6 + $0x88] sm:$0xf]  ;;  %v8971_v19 = vpack.c.b16 %v654_v12, %v654_v12 }
  0x8a   : > { %1161 = vmatpush.bf16.msra.mxu1 %v5461_v35  ;;  %v7655_v16 = vld [vmem:[#allocation6 + $0x94] sm:$0xf0]  ;;  %v5532_v17 = vld [vmem:[#allocation6 + $0x188] sm:$0xf]  ;;  %v5529_v20 = vor.u32 %v7684_v9, %v5526_v10  ;;  %v5657_v21 = vor.u32 %v7716_v11, %v5654_v14  ;;  %v7680_v23 = vld [vmem:[#allocation6 + $0x164] sm:$0xf] }
  0x8b   : > { %1174 = vmatpush.bf16.msra.mxu2 %v5589_v36  ;;  %1187 = vmatpush.bf16.msra.mxu3 %v5337_v39  ;;  %v7687_v18 = vld [vmem:[#allocation6 + $0x194] sm:$0xf0]  ;;  %v5405_v22 = vor.u32 %v7655_v16, %v5404_v15  ;;  %v5510_v24 = vld [vmem:[#allocation6 + $0x170] sm:$0xf0]  ;;  %v7712_v25 = vld [vmem:[#allocation6 + $0x264] sm:$0xf] }
  0x8c   : > { %1149 = vmatmul.bf16.vlgmr.msra.gmra.mxu0 %v8964_v4  ;;  %v5533_v26 = vor.u32 %v7687_v18, %v5532_v17  ;;  %v5638_v27 = vld [vmem:[#allocation6 + $0x270] sm:$0xf0]  ;;  %v5388_v28 = vld [vmem:[#allocation6 + $0x68] sm:$0xf]  ;;  %v7651_v29 = vld [vmem:[#allocation6 + $0x74] sm:$0xf0]  ;;  %v5513_v32 = vor.u32 %v7680_v23, %v5510_v24 }
  0x8d   : > { %1193 = vmatpush.bf16.msrb.mxu0 %v5577_v40  ;;  %1162 = vmatmul.bf16.vlgmr.msra.gmra.mxu1 %v8966_v5  ;;  %v5516_v30 = vld [vmem:[#allocation6 + $0x168] sm:$0xf]  ;;  %v7683_v31 = vld [vmem:[#allocation6 + $0x174] sm:$0xf0]  ;;  %v5641_v33 = vor.u32 %v7712_v25, %v5638_v27  ;;  %v5389_v34 = vor.u32 %v7651_v29, %v5388_v28  ;;  %v7676_v35 = vld [vmem:[#allocation6 + $0x144] sm:$0xf] }
  0x8e   : > { %1206 = vmatpush.bf16.msrb.mxu1 %v5705_v41  ;;  %1188 = vmatmul.bf16.vlgmr.msra.gmra.mxu3 %v8964_v4  ;;  %v5494_v36 = vld [vmem:[#allocation6 + $0x150] sm:$0xf0]  ;;  %v7708_v37 = vld [vmem:[#allocation6 + $0x244] sm:$0xf]  ;;  %v5517_v38 = vor.u32 %v7683_v31, %v5516_v30  ;;  %v5372_v40 = vld [vmem:[#allocation6 + $0x48] sm:$0xf] }
  0x8f   : > { %1219 = vmatpush.bf16.msrb.mxu2 %v5453_v42  ;;  %1232 = vmatpush.bf16.msrb.mxu3 %v5581_v46  ;;  %v5622_v39 = vld [vmem:[#allocation6 + $0x250] sm:$0xf0]  ;;  %v7647_v41 = vld [vmem:[#allocation6 + $0x54] sm:$0xf0]  ;;  %v5500_v42 = vld [vmem:[#allocation6 + $0x148] sm:$0xf]  ;;  %v5497_v44 = vor.u32 %v7676_v35, %v5494_v36 }
  0x90   : > { %1175 = vmatmul.bf16.vlgmr.msra.gmra.mxu2 %v8971_v19  ;;  %v7679_v43 = vld [vmem:[#allocation6 + $0x154] sm:$0xf0]  ;;  %v5625_v45 = vor.u32 %v7708_v37, %v5622_v39  ;;  %v5373_v46 = vor.u32 %v7647_v41, %v5372_v40  ;;  %v7672_v47 = vld [vmem:[#allocation6 + $0x124] sm:$0xf]  ;;  %v5478_v48 = vld [vmem:[#allocation6 + $0x130] sm:$0xf0] }
  0x91   : > { %1194 = vmatpush.bf16.msrb.mxu0 %v5561_v52  ;;  %v7704_v49 = vld [vmem:[#allocation6 + $0x224] sm:$0xf]  ;;  %v5501_v50 = vor.u32 %v7679_v43, %v5500_v42  ;;  %v5606_v51 = vld [vmem:[#allocation6 + $0x230] sm:$0xf0]  ;;  %v5356_v52 = vld [vmem:[#allocation6 + $0x28] sm:$0xf]  ;;  %v5481_v56 = vor.u32 %v7672_v47, %v5478_v48 }
  0x92   : > { %1207 = vmatpush.bf16.msrb.mxu1 %v5689_v54  ;;  %v7643_v53 = vld [vmem:[#allocation6 + $0x34] sm:$0xf0]  ;;  %v5484_v54 = vld [vmem:[#allocation6 + $0x128] sm:$0xf]  ;;  %v7668_v57 = vld [vmem:[#allocation6 + $0x104] sm:$0xf] }
  0x93   : > { %1220 = vmatpush.bf16.msrb.mxu2 %v5437_v55  ;;  %1233 = vmatpush.bf16.msrb.mxu3 %v5565_v59  ;;  %v7675_v55 = vld [vmem:[#allocation6 + $0x134] sm:$0xf0]  ;;  %v5462_v58 = vld [vmem:[#allocation6 + $0x110] sm:$0xf0]  ;;  %v5609_v59 = vor.u32 %v7704_v49, %v5606_v51  ;;  %v5357_v60 = vor.u32 %v7643_v53, %v5356_v52  ;;  %v7700_v61 = vld [vmem:[#allocation6 + $0x204] sm:$0xf] }
  0x94   : > { %v5590_v62 = vld [vmem:[#allocation6 + $0x210] sm:$0xf0]  ;;  %v5340_v63 = vld [vmem:[#allocation6 + $0x8] sm:$0xf]  ;;  %v5485_v0 = vor.u32 %v7675_v55, %v5484_v54  ;;  %v7639_v1 = vld [vmem:[#allocation6 + $0x14] sm:$0xf0]  ;;  %v5465_v9 = vor.u32 %v7668_v57, %v5462_v58 }
  0x95   : > { %1195 = vmatpush.bf16.msrb.mxu0 %v5545_v3  ;;  %v5468_v2 = vld [vmem:[#allocation6 + $0x108] sm:$0xf]  ;;  %v7671_v3 = vld [vmem:[#allocation6 + $0x114] sm:$0xf0]  ;;  %v5454_v10 = vld [vmem:[#allocation6 + $0xf8] sm:$0xf0]  ;;  %v5341_v14 = vor.u32 %v7639_v1, %v5340_v63 }
  0x96   : > { %1208 = vmatpush.bf16.msrb.mxu1 %v5673_v7  ;;  %v5708_v6 = vld [vmem:[#allocation6 + $0x2e8] sm:$0xf]  ;;  %v7731_v7 = vld [vmem:[#allocation6 + $0x2f4] sm:$0xf0]  ;;  %v7697_v11 = vld [vmem:[#allocation6 + $0x1ec] sm:$0xf]  ;;  %v5469_v17 = vor.u32 %v7671_v3, %v5468_v2 }
  0x97   : > { %1221 = vmatpush.bf16.msrb.mxu2 %v5421_v8  ;;  %1234 = vmatpush.bf16.msrb.mxu3 %v5549_v13  ;;  %v7665_v8 = vld [vmem:[#allocation6 + $0xec] sm:$0xf]  ;;  %v5582_v12 = vld [vmem:[#allocation6 + $0x1f8] sm:$0xf0]  ;;  %v5593_v13 = vor.u32 %v7700_v61, %v5590_v62  ;;  %v5709_v18 = vor.u32 %v7731_v7, %v5708_v6  ;;  %v7727_v23 = vld [vmem:[#allocation6 + $0x2d4] sm:$0xf0] }
  0x98   : > { %v7729_v15 = vld [vmem:[#allocation6 + $0x2ec] sm:$0xf]  ;;  %v5710_v16 = vld [vmem:[#allocation6 + $0x2f8] sm:$0xf0]  ;;  %v7723_v35 = vld [vmem:[#allocation6 + $0x2b4] sm:$0xf0] }
  0x99   : > { %1196 = vmatpush.bf16.msrb.mxu0 %v5529_v20  ;;  %v5457_v20 = vor.u32 %v7665_v8, %v5454_v10  ;;  %v7661_v24 = vld [vmem:[#allocation6 + $0xcc] sm:$0xf]  ;;  %v5713_v25 = vor.u32 %v7729_v15, %v5710_v16  ;;  %v5566_v28 = vld [vmem:[#allocation6 + $0x1d8] sm:$0xf0]  ;;  %v7719_v47 = vld [vmem:[#allocation6 + $0x294] sm:$0xf0] }
  0x9a   : > { %1209 = vmatpush.bf16.msrb.mxu1 %v5657_v21  ;;  %v5585_v21 = vor.u32 %v7697_v11, %v5582_v12  ;;  %v7693_v27 = vld [vmem:[#allocation6 + $0x1cc] sm:$0xf]  ;;  %v5694_v30 = vld [vmem:[#allocation6 + $0x2d8] sm:$0xf0]  ;;  %v5644_v58 = vld [vmem:[#allocation6 + $0x268] sm:$0xf] }
  0x9b   : > { %1222 = vmatpush.bf16.msrb.mxu2 %v5405_v22  ;;  %1235 = vmatpush.bf16.msrb.mxu3 %v5533_v26  ;;  %v5692_v22 = vld [vmem:[#allocation6 + $0x2c8] sm:$0xf]  ;;  %v5438_v26 = vld [vmem:[#allocation6 + $0xd8] sm:$0xf0]  ;;  %v7725_v29 = vld [vmem:[#allocation6 + $0x2cc] sm:$0xf] }
  0x9c   : > { %v5693_v31 = vor.u32 %v7727_v23, %v5692_v22  ;;  %v7657_v36 = vld [vmem:[#allocation6 + $0xac] sm:$0xf]  ;;  %v5697_v37 = vor.u32 %v7725_v29, %v5694_v30  ;;  %v5550_v40 = vld [vmem:[#allocation6 + $0x1b8] sm:$0xf0]  ;;  %v5628_v8 = vld [vmem:[#allocation6 + $0x248] sm:$0xf] }
  0x9d   : > { %1197 = vmatpush.bf16.msrb.mxu0 %v5513_v32  ;;  %v5441_v32 = vor.u32 %v7661_v24, %v5438_v26  ;;  %v7689_v39 = vld [vmem:[#allocation6 + $0x1ac] sm:$0xf]  ;;  %v5678_v42 = vld [vmem:[#allocation6 + $0x2b8] sm:$0xf0]  ;;  %v7707_v22 = vld [vmem:[#allocation6 + $0x234] sm:$0xf0] }
  0x9e   : > { %1210 = vmatpush.bf16.msrb.mxu1 %v5641_v33  ;;  %v5569_v33 = vor.u32 %v7693_v27, %v5566_v28  ;;  %v7721_v41 = vld [vmem:[#allocation6 + $0x2ac] sm:$0xf]  ;;  %v5534_v52 = vld [vmem:[#allocation6 + $0x198] sm:$0xf0]  ;;  %s9230_s20 = smov (!%p538_p1, %s8800_s20), 1 }
  0x9f   : > { %1223 = vmatpush.bf16.msrb.mxu2 %v5389_v34  ;;  %1236 = vmatpush.bf16.msrb.mxu3 %v5517_v38  ;;  %v5676_v34 = vld [vmem:[#allocation6 + $0x2a8] sm:$0xf]  ;;  %v5422_v38 = vld [vmem:[#allocation6 + $0xb8] sm:$0xf0]  ;;  %v7653_v48 = vld [vmem:[#allocation6 + $0x8c] sm:$0xf]  ;;  %v5681_v49 = vor.u32 %v7721_v41, %v5678_v42 }
  0xa0   : > { %v5677_v43 = vor.u32 %v7723_v35, %v5676_v34  ;;  %v7685_v51 = vld [vmem:[#allocation6 + $0x18c] sm:$0xf]  ;;  %v5662_v54 = vld [vmem:[#allocation6 + $0x298] sm:$0xf0]  ;;  %v5828_v42 = vld [vmem:[#allocation9 + $0xe0] sm:$0xf] }
  0xa1   : > { %1198 = vmatpush.bf16.msrb.mxu0 %v5497_v44  ;;  %v5425_v44 = vor.u32 %v7657_v36, %v5422_v38  ;;  %v7717_v53 = vld [vmem:[#allocation6 + $0x28c] sm:$0xf]  ;;  %v5537_v57 = vor.u32 %v7685_v51, %v5534_v52  ;;  %v5390_v62 = vld [vmem:[#allocation6 + $0x78] sm:$0xf0]  ;;  %v6212_v51 = vld [vmem:[#allocation9 + $0x3e0] sm:$0xf] }
  0xa2   : > { %1211 = vmatpush.bf16.msrb.mxu1 %v5625_v45  ;;  %v5553_v45 = vor.u32 %v7689_v39, %v5550_v40  ;;  %v5665_v61 = vor.u32 %v7717_v53, %v5662_v54  ;;  %v7681_v63 = vld [vmem:[#allocation6 + $0x16c] sm:$0xf]  ;;  %v5646_v2 = vld [vmem:[#allocation6 + $0x278] sm:$0xf0]  ;;  %v7858_v52 = vld [vmem:[#allocation9 + $0x3ec] sm:$0xf0] }
  0xa3   : > { %1224 = vmatpush.bf16.msrb.mxu2 %v5373_v46  ;;  %1237 = vmatpush.bf16.msrb.mxu3 %v5501_v50  ;;  %v5660_v46 = vld [vmem:[#allocation6 + $0x288] sm:$0xf]  ;;  %v5406_v50 = vld [vmem:[#allocation6 + $0x98] sm:$0xf0]  ;;  %v7713_v1 = vld [vmem:[#allocation6 + $0x26c] sm:$0xf] }
  0xa4   : > { %v5661_v55 = vor.u32 %v7719_v47, %v5660_v46  ;;  %v7645_v10 = vld [vmem:[#allocation6 + $0x4c] sm:$0xf]  ;;  %v5649_v11 = vor.u32 %v7713_v1, %v5646_v2  ;;  %v5374_v12 = vld [vmem:[#allocation6 + $0x58] sm:$0xf0]  ;;  %v7794_v46 = vld [vmem:[#allocation9 + $0x1ec] sm:$0xf0] }
  0xa5   : > { %1199 = vmatpush.bf16.msrb.mxu0 %v5481_v56  ;;  %v5409_v56 = vor.u32 %v7653_v48, %v5406_v50  ;;  %v7709_v15 = vld [vmem:[#allocation6 + $0x24c] sm:$0xf]  ;;  %v5630_v16 = vld [vmem:[#allocation6 + $0x258] sm:$0xf0]  ;;  %v6084_v47 = vld [vmem:[#allocation9 + $0x2e0] sm:$0xf] }
  0xa6   : > { %1212 = vmatpush.bf16.msrb.mxu1 %v5609_v59  ;;  %v7715_v59 = vld [vmem:[#allocation6 + $0x274] sm:$0xf0]  ;;  %v7641_v23 = vld [vmem:[#allocation6 + $0x2c] sm:$0xf]  ;;  %v5633_v24 = vor.u32 %v7709_v15, %v5630_v16  ;;  %v5486_v27 = vld [vmem:[#allocation6 + $0x138] sm:$0xf0] }
  0xa7   : > { %1225 = vmatpush.bf16.msrb.mxu2 %v5357_v60  ;;  %1238 = vmatpush.bf16.msrb.mxu3 %v5485_v0  ;;  %v7649_v60 = vld [vmem:[#allocation6 + $0x6c] sm:$0xf]  ;;  %v5518_v0 = vld [vmem:[#allocation6 + $0x178] sm:$0xf0]  ;;  %v5645_v3 = vor.u32 %v7715_v59, %v5644_v58  ;;  %v7826_v48 = vld [vmem:[#allocation9 + $0x2ec] sm:$0xf0] }
  0xa8   : > { %v5393_v6 = vor.u32 %v7649_v60, %v5390_v62  ;;  %v5521_v7 = vor.u32 %v7681_v63, %v5518_v0  ;;  %v7673_v26 = vld [vmem:[#allocation6 + $0x12c] sm:$0xf]  ;;  %v5614_v29 = vld [vmem:[#allocation6 + $0x238] sm:$0xf0]  ;;  %v7758_v58 = vld [vmem:[#allocation9 + $0xcc] sm:$0xf0]  ;;  %v6213_v60 = vor.u32 %v7858_v52, %v6212_v51 }
  0xa9   : > { %1200 = vmatpush.bf16.msrb.mxu0 %v5465_v9  ;;  %v7711_v9 = vld [vmem:[#allocation6 + $0x254] sm:$0xf0]  ;;  %v7705_v28 = vld [vmem:[#allocation6 + $0x22c] sm:$0xf]  ;;  %v5489_v34 = vor.u32 %v7673_v26, %v5486_v27  ;;  %v5342_v36 = vld [vmem:[#allocation6 + $0x18] sm:$0xf0] }
  0xaa   : > { %1213 = vmatpush.bf16.msrb.mxu1 %v5593_v13  ;;  %v7677_v13 = vld [vmem:[#allocation6 + $0x14c] sm:$0xf]  ;;  %v5617_v38 = vor.u32 %v7705_v28, %v5614_v29  ;;  %v5470_v39 = vld [vmem:[#allocation6 + $0x118] sm:$0xf0]  ;;  %v5940_v59 = vld [vmem:[#allocation9 + $0x1c0] sm:$0xf] }
  0xab   : > { %1226 = vmatpush.bf16.msrb.mxu2 %v5341_v14  ;;  %1239 = vmatpush.bf16.msrb.mxu3 %v5469_v17  ;;  %v5502_v14 = vld [vmem:[#allocation6 + $0x158] sm:$0xf0]  ;;  %v5629_v17 = vor.u32 %v7711_v9, %v5628_v8  ;;  %v7637_v35 = vld [vmem:[#allocation6 + $0xc] sm:$0xf]  ;;  %v6068_v62 = vld [vmem:[#allocation9 + $0x2c0] sm:$0xf] }
  0xac   : > { %1201 = vmatmul.bf16.vlgmr.msrb.gmra.mxu0 %v8966_v5  ;;  %v7701_v40 = vld [vmem:[#allocation6 + $0x20c] sm:$0xf]  ;;  %v5598_v41 = vld [vmem:[#allocation6 + $0x218] sm:$0xf0]  ;;  %v7822_v63 = vld [vmem:[#allocation9 + $0x2cc] sm:$0xf0] }
  0xad   : > { %1245 = vmatpush.bf16.msra.mxu0 %v5709_v18  ;;  %1214 = vmatmul.bf16.vlgmr.msrb.gmra.mxu1 %v8971_v19  ;;  %v5377_v18 = vor.u32 %v7645_v10, %v5374_v12  ;;  %v5601_v53 = vor.u32 %v7701_v40, %v5598_v41  ;;  %v6196_v0 = vld [vmem:[#allocation9 + $0x3c0] sm:$0xf]  ;;  %v7854_v1 = vld [vmem:[#allocation9 + $0x3cc] sm:$0xf0]  ;;  %s5329_s21 = sshll.u32 %s9230_s20, 2 }
  0xae   : > { %1258 = vmatpush.bf16.msra.mxu1 %v5457_v20  ;;  %1227 = vmatmul.bf16.vlgmr.msrb.gmra.mxu2 %v8964_v4  ;;  %v5505_v20 = vor.u32 %v7677_v13, %v5502_v14  ;;  %v7754_v8 = vld [vmem:[#allocation9 + $0xac] sm:$0xf0]  ;;  %v5924_v9 = vld [vmem:[#allocation9 + $0x1a0] sm:$0xf]  ;;  %v6197_v10 = vor.u32 %v7854_v1, %v6196_v0  ;;  %s541_s17 = scalar_lea.vmem %s9210_s10, %s5329_s21 }
  0xaf   : > { %1271 = vmatpush.bf16.msra.mxu2 %v5585_v21  ;;  %1284 = vmatpush.bf16.msra.mxu3 %v5713_v25  ;;  %v5612_v21 = vld [vmem:[#allocation6 + $0x228] sm:$0xf]  ;;  %v5358_v25 = vld [vmem:[#allocation6 + $0x38] sm:$0xf0]  ;;  %v6052_v12 = vld [vmem:[#allocation9 + $0x2a0] sm:$0xf] }
  0xb0   : > { %1240 = vmatmul.bf16.vlgmr.msrb.gmra.mxu3 %v8966_v5  ;;  %v5613_v30 = vor.u32 %v7707_v22, %v5612_v21  ;;  %v7818_v13 = vld [vmem:[#allocation9 + $0x2ac] sm:$0xf0]  ;;  %v6180_v14 = vld [vmem:[#allocation9 + $0x3a0] sm:$0xf] }
  0xb1   : > { %1246 = vmatpush.bf16.msra.mxu0 %v5693_v31  ;;  %v5596_v31 = vld [vmem:[#allocation6 + $0x208] sm:$0xf]  ;;  %v7850_v15 = vld [vmem:[#allocation9 + $0x3ac] sm:$0xf0]  ;;  %v5908_v22 = vld [vmem:[#allocation9 + $0x180] sm:$0xf] }
  0xb2   : > { %1259 = vmatpush.bf16.msra.mxu1 %v5441_v32  ;;  %v7703_v32 = vld [vmem:[#allocation6 + $0x214] sm:$0xf0]  ;;  %v7750_v21 = vld [vmem:[#allocation9 + $0x8c] sm:$0xf0]  ;;  %v6164_v26 = vld [vmem:[#allocation9 + $0x380] sm:$0xf] }
  0xb3   : > { %1272 = vmatpush.bf16.msra.mxu2 %v5569_v33  ;;  %1285 = vmatpush.bf16.msra.mxu3 %v5697_v37  ;;  %v5361_v33 = vor.u32 %v7641_v23, %v5358_v25  ;;  %v7669_v37 = vld [vmem:[#allocation6 + $0x10c] sm:$0xf]  ;;  %v7782_v23 = vld [vmem:[#allocation9 + $0x18c] sm:$0xf0]  ;;  %v5748_v41 = vld [vmem:[#allocation9 + $0x40] sm:$0xf] }
  0xb4   : > { %v5473_v50 = vor.u32 %v7669_v37, %v5470_v39  ;;  %v7814_v25 = vld [vmem:[#allocation9 + $0x28c] sm:$0xf0]  ;;  %v5909_v28 = vor.u32 %v7782_v23, %v5908_v22  ;;  %v5844_v1 = vld [vmem:[#allocation9 + $0x100] sm:$0xf] }
  0xb5   : > { %1247 = vmatpush.bf16.msra.mxu0 %v5677_v43  ;;  %v7762_v43 = vld [vmem:[#allocation9 + $0xec] sm:$0xf0] }
  0xb6   : > { %1260 = vmatpush.bf16.msra.mxu1 %v5425_v44  ;;  %v5956_v44 = vld [vmem:[#allocation9 + $0x1e0] sm:$0xf]  ;;  %v5829_v54 = vor.u32 %v7762_v43, %v5828_v42  ;;  %v7842_v37 = vld [vmem:[#allocation9 + $0x36c] sm:$0xf0] }
  0xb7   : > { %1273 = vmatpush.bf16.msra.mxu2 %v5553_v45  ;;  %1286 = vmatpush.bf16.msra.mxu3 %v5681_v49  ;;  %v5597_v45 = vor.u32 %v7703_v32, %v5596_v31  ;;  %v5345_v49 = vor.u32 %v7637_v35, %v5342_v36  ;;  %v7746_v31 = vld [vmem:[#allocation9 + $0x6c] sm:$0xf0]  ;;  %v5892_v32 = vld [vmem:[#allocation9 + $0x160] sm:$0xf] }
  0xb8   : > { %v6020_v35 = vld [vmem:[#allocation9 + $0x260] sm:$0xf]  ;;  %v7810_v36 = vld [vmem:[#allocation9 + $0x26c] sm:$0xf0] }
  0xb9   : > { %1248 = vmatpush.bf16.msra.mxu0 %v5661_v55  ;;  %v5957_v55 = vor.u32 %v7794_v46, %v5956_v44  ;;  %v6021_v40 = vor.u32 %v7810_v36, %v6020_v35  ;;  %v7742_v42 = vld [vmem:[#allocation9 + $0x4c] sm:$0xf0]  ;;  %v5876_v43 = vld [vmem:[#allocation9 + $0x140] sm:$0xf] }
  0xba   : > { %1261 = vmatpush.bf16.msra.mxu1 %v5409_v56  ;;  %v6085_v56 = vor.u32 %v7826_v48, %v6084_v47  ;;  %v6004_v46 = vld [vmem:[#allocation9 + $0x240] sm:$0xf]  ;;  %v7806_v47 = vld [vmem:[#allocation9 + $0x24c] sm:$0xf0] }
  0xbb   : > { %1274 = vmatpush.bf16.msra.mxu2 %v5537_v57  ;;  %1287 = vmatpush.bf16.msra.mxu3 %v5665_v61  ;;  %v5812_v57 = vld [vmem:[#allocation9 + $0xc0] sm:$0xf]  ;;  %v7790_v61 = vld [vmem:[#allocation9 + $0x1cc] sm:$0xf0]  ;;  %v6005_v52 = vor.u32 %v7806_v47, %v6004_v46 }
  0xbc   : > { %v5813_v2 = vor.u32 %v7758_v58, %v5812_v57  ;;  %v6132_v48 = vld [vmem:[#allocation9 + $0x340] sm:$0xf]  ;;  %v7770_v57 = vld [vmem:[#allocation9 + $0x12c] sm:$0xf0] }
  0xbd   : > { %1249 = vmatpush.bf16.msra.mxu0 %v5645_v3  ;;  %v5941_v3 = vor.u32 %v7790_v61, %v5940_v59  ;;  %v5988_v58 = vld [vmem:[#allocation9 + $0x220] sm:$0xf]  ;;  %v7802_v59 = vld [vmem:[#allocation9 + $0x22c] sm:$0xf0] }
  0xbe   : > { %1262 = vmatpush.bf16.msra.mxu1 %v5393_v6  ;;  %v6069_v6 = vor.u32 %v7822_v63, %v6068_v62  ;;  %v7834_v61 = vld [vmem:[#allocation9 + $0x32c] sm:$0xf0]  ;;  %v5716_v62 = vld [vmem:[#allocation9] sm:$0xf] }
  0xbf   : > { %1275 = vmatpush.bf16.msra.mxu2 %v5521_v7  ;;  %1288 = vmatpush.bf16.msra.mxu3 %v5649_v11  ;;  %v5796_v7 = vld [vmem:[#allocation9 + $0xa0] sm:$0xf]  ;;  %v7786_v11 = vld [vmem:[#allocation9 + $0x1ac] sm:$0xf0] }
  0xc0   : > { %v5797_v16 = vor.u32 %v7754_v8, %v5796_v7  ;;  %v7734_v0 = vld [vmem:[#allocation9 + $0xc] sm:$0xf0]  ;;  %v5972_v7 = vld [vmem:[#allocation9 + $0x200] sm:$0xf] }
  0xc1   : > { %1250 = vmatpush.bf16.msra.mxu0 %v5629_v17  ;;  %v5925_v17 = vor.u32 %v7786_v11, %v5924_v9  ;;  %v7798_v8 = vld [vmem:[#allocation9 + $0x20c] sm:$0xf0]  ;;  %v1302_v9 = vld [vmem:[%s8937_s3 + $0x8] sm:$0xff] }
  0xc2   : > { %1263 = vmatpush.bf16.msra.mxu1 %v5377_v18  ;;  %v6053_v18 = vor.u32 %v7818_v13, %v6052_v12  ;;  %v6100_v11 = vld [vmem:[#allocation9 + $0x300] sm:$0xf]  ;;  %v7830_v12 = vld [vmem:[#allocation9 + $0x30c] sm:$0xf0]  ;;  %v1643_v22 = vunpack.c.l.b16 %v1302_v9  ;;  %v5973_v23 = vor.u32 %v7798_v8, %v5972_v7 }
  0xc3   : > { %1276 = vmatpush.bf16.msra.mxu2 %v5505_v20  ;;  %1289 = vmatpush.bf16.msra.mxu3 %v5633_v24  ;;  %v5780_v20 = vld [vmem:[#allocation9 + $0x80] sm:$0xf]  ;;  %v1301_v13 = vld [vmem:[%s8937_s3] sm:$0xff] }
  0xc4   : > { %v6036_v24 = vld [vmem:[#allocation9 + $0x280] sm:$0xf]  ;;  %v5781_v27 = vor.u32 %v7750_v21, %v5780_v20  ;;  %v7954_v21 = vld [vmem:[#allocation9 + $0x6ec] sm:$0xf0] }
  0xc5   : > { %1251 = vmatpush.bf16.msra.mxu0 %v5613_v30  ;;  %v6037_v29 = vor.u32 %v7814_v25, %v6036_v24  ;;  %v5764_v30 = vld [vmem:[#allocation9 + $0x60] sm:$0xf]  ;;  %v7986_v25 = vld [vmem:[#allocation9 + $0x7ec] sm:$0xf0] }
  0xc6   : > { %1264 = vmatpush.bf16.msra.mxu1 %v5361_v33  ;;  %v6596_v20 = vld [vmem:[#allocation9 + $0x6e0] sm:$0xf]  ;;  %v7918_v36 = vld [vmem:[#allocation9 + $0x5cc] sm:$0xf0] }
  0xc7   : > { %1277 = vmatpush.bf16.msra.mxu2 %v5489_v34  ;;  %1290 = vmatpush.bf16.msra.mxu3 %v5617_v38  ;;  %v7778_v34 = vld [vmem:[#allocation9 + $0x16c] sm:$0xf0]  ;;  %v5765_v38 = vor.u32 %v7746_v31, %v5764_v30  ;;  %v6724_v24 = vld [vmem:[#allocation9 + $0x7e0] sm:$0xf]  ;;  %v6597_v31 = vor.u32 %v7954_v21, %v6596_v20 }
  0xc8   : > { %v5893_v39 = vor.u32 %v7778_v34, %v5892_v32  ;;  %v6324_v32 = vld [vmem:[#allocation9 + $0x4c0] sm:$0xf]  ;;  %v6725_v35 = vor.u32 %v7986_v25, %v6724_v24  ;;  %v7902_v25 = vld [vmem:[#allocation9 + $0x54c] sm:$0xf0] }
  0xc9   : > { %1252 = vmatpush.bf16.msra.mxu0 %v5597_v45  ;;  %v7774_v45 = vld [vmem:[#allocation9 + $0x14c] sm:$0xf0]  ;;  %v6452_v34 = vld [vmem:[#allocation9 + $0x5c0] sm:$0xf] }
  0xca   : > { %1265 = vmatpush.bf16.msra.mxu1 %v5345_v49  ;;  %v7838_v49 = vld [vmem:[#allocation9 + $0x34c] sm:$0xf0]  ;;  %v5877_v51 = vor.u32 %v7774_v45, %v5876_v43  ;;  %v6453_v45 = vor.u32 %v7918_v36, %v6452_v34  ;;  %v6308_v47 = vld [vmem:[#allocation9 + $0x4a0] sm:$0xf] }
  0xcb   : > { %1278 = vmatpush.bf16.msra.mxu2 %v5473_v50  ;;  %1291 = vmatpush.bf16.msra.mxu3 %v5601_v53  ;;  %v5749_v50 = vor.u32 %v7742_v42, %v5748_v41  ;;  %v5732_v53 = vld [vmem:[#allocation9 + $0x20] sm:$0xf]  ;;  %v7898_v36 = vld [vmem:[#allocation9 + $0x52c] sm:$0xf0] }
  0xcc   : > { %1253 = vmatmul.bf16.vlgmr.msra.gmra.mxu0 %v8971_v19  ;;  %v6372_v34 = vld [vmem:[#allocation9 + $0x520] sm:$0xf] }
  0xcd   : > { %3271 = vmatpush.bf16.msrb.mxu0 %v5829_v54  ;;  %1266 = vmatmul.bf16.vlgmr.msra.gmra.mxu1 %v8964_v4  ;;  %v7846_v4 = vld [vmem:[#allocation9 + $0x38c] sm:$0xf0] }
  0xce   : > { %3284 = vmatpush.bf16.msrb.mxu1 %v5957_v55  ;;  %1279 = vmatmul.bf16.vlgmr.msra.gmra.mxu2 %v8966_v5  ;;  %v6181_v5 = vor.u32 %v7850_v15, %v6180_v14  ;;  %v6165_v33 = vor.u32 %v7846_v4, %v6164_v26  ;;  %v7738_v54 = vld [vmem:[#allocation9 + $0x2c] sm:$0xf0]  ;;  %v5860_v55 = vld [vmem:[#allocation9 + $0x120] sm:$0xf]  ;;  %v1641_v26 = vunpack.c.l.b16 %v1301_v13  ;;  %v1644_v4 = vunpack.c.h.b16 %v1302_v9 }
  0xcf   : > { %3297 = vmatpush.bf16.msrb.mxu2 %v6085_v56  ;;  %3310 = vmatpush.bf16.msrb.mxu3 %v6213_v60  ;;  %v6133_v56 = vor.u32 %v7838_v49, %v6132_v48  ;;  %v6116_v60 = vld [vmem:[#allocation9 + $0x320] sm:$0xf]  ;;  %v5733_v63 = vor.u32 %v7738_v54, %v5732_v53  ;;  %v7890_v15 = vld [vmem:[#allocation9 + $0x4ec] sm:$0xf0] }
  0xd0   : > { %1292 = vmatmul.bf16.vlgmr.msra.gmra.mxu3 %v8971_v19  ;;  %v6148_v19 = vld [vmem:[#allocation9 + $0x360] sm:$0xf]  ;;  %v8987_v41 = vpack.c.b16 %v1641_v26, %v1641_v26  ;;  %v8989_v42 = vpack.c.b16 %v1644_v4, %v1644_v4  ;;  %v7882_v48 = vld [vmem:[#allocation9 + $0x4ac] sm:$0xf0] }
  0xd1   : > { %3272 = vmatpush.bf16.msrb.mxu0 %v5813_v2  ;;  %v6149_v44 = vor.u32 %v7842_v37, %v6148_v19  ;;  %v7766_v2 = vld [vmem:[#allocation9 + $0x10c] sm:$0xf0]  ;;  %v6340_v14 = vld [vmem:[#allocation9 + $0x4e0] sm:$0xf] }
  0xd2   : > { %3285 = vmatpush.bf16.msrb.mxu1 %v5941_v3  ;;  %v5861_v3 = vor.u32 %v7770_v57, %v5860_v55  ;;  %v6580_v19 = vld [vmem:[#allocation9 + $0x6c0] sm:$0xf]  ;;  %v7950_v37 = vld [vmem:[#allocation9 + $0x6cc] sm:$0xf0] }
  0xd3   : > { %3298 = vmatpush.bf16.msrb.mxu2 %v6069_v6  ;;  %3311 = vmatpush.bf16.msrb.mxu3 %v6197_v10  ;;  %v5989_v6 = vor.u32 %v7802_v59, %v5988_v58  ;;  %v6117_v10 = vor.u32 %v7834_v61, %v6116_v60  ;;  %v6581_v46 = vor.u32 %v7950_v37, %v6580_v19  ;;  %v6436_v49 = vld [vmem:[#allocation9 + $0x5a0] sm:$0xf]  ;;  %v7946_v53 = vld [vmem:[#allocation9 + $0x6ac] sm:$0xf0] }
  0xd4   : > { %v6692_v54 = vld [vmem:[#allocation9 + $0x7a0] sm:$0xf]  ;;  %v7978_v55 = vld [vmem:[#allocation9 + $0x7ac] sm:$0xf0] }
  0xd5   : > { %3273 = vmatpush.bf16.msrb.mxu0 %v5797_v16  ;;  %v6468_v16 = vld [vmem:[#allocation9 + $0x5e0] sm:$0xf]  ;;  %v7878_v60 = vld [vmem:[#allocation9 + $0x48c] sm:$0xf0] }
  0xd6   : > { %3286 = vmatpush.bf16.msrb.mxu1 %v5925_v17  ;;  %v5717_v17 = vor.u32 %v7734_v0, %v5716_v62  ;;  %v6292_v59 = vld [vmem:[#allocation9 + $0x480] sm:$0xf]  ;;  %v6693_v62 = vor.u32 %v7978_v55, %v6692_v54  ;;  %v7934_v4 = vld [vmem:[#allocation9 + $0x64c] sm:$0xf0] }
  0xd7   : > { %3299 = vmatpush.bf16.msrb.mxu2 %v6053_v18  ;;  %3312 = vmatpush.bf16.msrb.mxu3 %v6181_v5  ;;  %v7922_v18 = vld [vmem:[#allocation9 + $0x5ec] sm:$0xf0]  ;;  %v5845_v5 = vor.u32 %v7766_v2, %v5844_v1  ;;  %v6420_v61 = vld [vmem:[#allocation9 + $0x580] sm:$0xf] }
  0xd8   : > { %v6469_v30 = vor.u32 %v7922_v18, %v6468_v16  ;;  %v6548_v0 = vld [vmem:[#allocation9 + $0x680] sm:$0xf]  ;;  %v7942_v1 = vld [vmem:[#allocation9 + $0x68c] sm:$0xf0] }
  0xd9   : > { %3274 = vmatpush.bf16.msrb.mxu0 %v5781_v27  ;;  %v6101_v27 = vor.u32 %v7830_v12, %v6100_v11  ;;  %v6676_v2 = vld [vmem:[#allocation9 + $0x780] sm:$0xf]  ;;  %v6549_v8 = vor.u32 %v7942_v1, %v6548_v0  ;;  %v7930_v37 = vld [vmem:[#allocation9 + $0x62c] sm:$0xf0]  ;;  %v5830_v0 = vld [vmem:[#allocation9 + $0xf0] sm:$0xf0] }
  0xda   : > { %3287 = vmatpush.bf16.msrb.mxu1 %v5909_v28  ;;  %v6341_v28 = vor.u32 %v7890_v15, %v6340_v14  ;;  %v6276_v9 = vld [vmem:[#allocation9 + $0x460] sm:$0xf]  ;;  %v7938_v15 = vld [vmem:[#allocation9 + $0x66c] sm:$0xf0] }
  0xdb   : > { %3300 = vmatpush.bf16.msrb.mxu2 %v6037_v29  ;;  %3313 = vmatpush.bf16.msrb.mxu3 %v6165_v33  ;;  %v1642_v29 = vunpack.c.h.b16 %v1301_v13  ;;  %v7886_v33 = vld [vmem:[#allocation9 + $0x4cc] sm:$0xf0]  ;;  %v6404_v11 = vld [vmem:[#allocation9 + $0x560] sm:$0xf] }
  0xdc   : > { %v6325_v43 = vor.u32 %v7886_v33, %v6324_v32  ;;  %v7906_v13 = vld [vmem:[#allocation9 + $0x56c] sm:$0xf0]  ;;  %v6532_v14 = vld [vmem:[#allocation9 + $0x660] sm:$0xf] }
  0xdd   : > { %3275 = vmatpush.bf16.msrb.mxu0 %v5765_v38  ;;  %v8985_v38 = vpack.c.b16 %v1643_v22, %v1643_v22  ;;  %v6660_v16 = vld [vmem:[#allocation9 + $0x760] sm:$0xf]  ;;  %v6405_v20 = vor.u32 %v7906_v13, %v6404_v11  ;;  %v6533_v21 = vor.u32 %v7938_v15, %v6532_v14  ;;  %v7866_v33 = vld [vmem:[#allocation9 + $0x42c] sm:$0xf0] }
  0xde   : > { %3288 = vmatpush.bf16.msrb.mxu1 %v5893_v39  ;;  %v6708_v39 = vld [vmem:[#allocation9 + $0x7c0] sm:$0xf] }
  0xdf   : > { %3301 = vmatpush.bf16.msrb.mxu2 %v6021_v40  ;;  %3314 = vmatpush.bf16.msrb.mxu3 %v6149_v44  ;;  %v7982_v40 = vld [vmem:[#allocation9 + $0x7cc] sm:$0xf0]  ;;  %v8991_v44 = vpack.c.b16 %v1642_v29, %v1642_v29  ;;  %v6260_v22 = vld [vmem:[#allocation9 + $0x440] sm:$0xf] }
  0xe0   : > { %v6516_v26 = vld [vmem:[#allocation9 + $0x640] sm:$0xf] }
  0xe1   : > { %3276 = vmatpush.bf16.msrb.mxu0 %v5749_v50  ;;  %v6709_v50 = vor.u32 %v7982_v40, %v6708_v39  ;;  %v6244_v32 = vld [vmem:[#allocation9 + $0x420] sm:$0xf]  ;;  %v7962_v40 = vld [vmem:[#allocation9 + $0x72c] sm:$0xf0] }
  0xe2   : > { %3289 = vmatpush.bf16.msrb.mxu1 %v5877_v51  ;;  %v7914_v51 = vld [vmem:[#allocation9 + $0x5ac] sm:$0xf0]  ;;  %v6500_v19 = vld [vmem:[#allocation9 + $0x620] sm:$0xf] }
  0xe3   : > { %3302 = vmatpush.bf16.msrb.mxu2 %v6005_v52  ;;  %3315 = vmatpush.bf16.msrb.mxu3 %v6133_v56  ;;  %v6564_v52 = vld [vmem:[#allocation9 + $0x6a0] sm:$0xf]  ;;  %v6309_v56 = vor.u32 %v7882_v48, %v6308_v47  ;;  %v6437_v57 = vor.u32 %v7914_v51, %v6436_v49  ;;  %v7894_v48 = vld [vmem:[#allocation9 + $0x50c] sm:$0xf0]  ;;  %v6373_v49 = vor.u32 %v7898_v36, %v6372_v34  ;;  %v5798_v36 = vld [vmem:[#allocation9 + $0xb0] sm:$0xf0] }
  0xe4   : > { %v6565_v58 = vor.u32 %v7946_v53, %v6564_v52  ;;  %v6628_v39 = vld [vmem:[#allocation9 + $0x720] sm:$0xf]  ;;  %v7926_v52 = vld [vmem:[#allocation9 + $0x60c] sm:$0xf0] }
  0xe5   : > { %3277 = vmatpush.bf16.msrb.mxu0 %v5733_v63  ;;  %v7910_v63 = vld [vmem:[#allocation9 + $0x58c] sm:$0xf0]  ;;  %v6356_v47 = vld [vmem:[#allocation9 + $0x500] sm:$0xf]  ;;  %v6629_v54 = vor.u32 %v7962_v40, %v6628_v39 }
  0xe6   : > { %3290 = vmatpush.bf16.msrb.mxu1 %v5861_v3  ;;  %v7974_v3 = vld [vmem:[#allocation9 + $0x78c] sm:$0xf0]  ;;  %v6421_v7 = vor.u32 %v7910_v63, %v6420_v61  ;;  %v6484_v51 = vld [vmem:[#allocation9 + $0x600] sm:$0xf]  ;;  %v7760_v63 = vld [vmem:[#allocation9 + $0xe4] sm:$0xf] }
  0xe7   : > { %3303 = vmatpush.bf16.msrb.mxu2 %v5989_v6  ;;  %3316 = vmatpush.bf16.msrb.mxu3 %v6117_v10  ;;  %v6293_v6 = vor.u32 %v7878_v60, %v6292_v59  ;;  %v7874_v10 = vld [vmem:[#allocation9 + $0x46c] sm:$0xf0]  ;;  %v6677_v12 = vor.u32 %v7974_v3, %v6676_v2  ;;  %v6612_v55 = vld [vmem:[#allocation9 + $0x700] sm:$0xf]  ;;  %v6357_v2 = vor.u32 %v7894_v48, %v6356_v47  ;;  %v9011_v48 = vld [vmem:[#allocation7] sm:$0xf] }
  0xe8   : > { %v6277_v18 = vor.u32 %v7874_v10, %v6276_v9  ;;  %v1304_v53 = vld [vmem:[%s8937_s3 + $0x18] sm:$0xff]  ;;  %v6980_v60 = vld [vmem:[#allocation9 + $0x9e0] sm:$0xf]  ;;  %v6485_v3 = vor.u32 %v7926_v52, %v6484_v51  ;;  %v5833_v14 = vor.u32 %v7760_v63, %v5830_v0  ;;  %v5782_v52 = vld [vmem:[#allocation9 + $0x90] sm:$0xf0] }
  0xe9   : > { %3278 = vmatpush.bf16.msrb.mxu0 %v5717_v17  ;;  %v7970_v17 = vld [vmem:[#allocation9 + $0x76c] sm:$0xf0]  ;;  %v1647_v1 = vunpack.c.l.b16 %v1304_v53  ;;  %v1648_v9 = vunpack.c.h.b16 %v1304_v53  ;;  %v6836_v15 = vld [vmem:[#allocation9 + $0x8c0] sm:$0xf]  ;;  %v7748_v51 = vld [vmem:[#allocation9 + $0x84] sm:$0xf] }
  0xea   : > { %3291 = vmatpush.bf16.msrb.mxu1 %v5845_v5  ;;  %v7870_v5 = vld [vmem:[#allocation9 + $0x44c] sm:$0xf0]  ;;  %v6661_v24 = vor.u32 %v7970_v17, %v6660_v16  ;;  %v6964_v17 = vld [vmem:[#allocation9 + $0x9c0] sm:$0xf]  ;;  %v7780_v53 = vld [vmem:[#allocation9 + $0x184] sm:$0xf] }
  0xeb   : > { %3304 = vmatpush.bf16.msrb.mxu2 %v5973_v23  ;;  %3317 = vmatpush.bf16.msrb.mxu3 %v6101_v27  ;;  %v6388_v23 = vld [vmem:[#allocation9 + $0x540] sm:$0xf]  ;;  %v6261_v29 = vor.u32 %v7870_v5, %v6260_v22  ;;  %v8018_v59 = vld [vmem:[#allocation9 + $0x8ec] sm:$0xf0]  ;;  %v5814_v22 = vld [vmem:[#allocation9 + $0xd0] sm:$0xf0]  ;;  %v8999_v5 = vpack.c.b16 %v1647_v1, %v1647_v1 }
  0xec   : > { %3279 = vmatmul.bf16.vlgmr.msrb.gmra.mxu0 %v8987_v41  ;;  %v6644_v27 = vld [vmem:[#allocation9 + $0x740] sm:$0xf]  ;;  %v8014_v16 = vld [vmem:[#allocation9 + $0x8cc] sm:$0xf0]  ;;  %v7744_v0 = vld [vmem:[#allocation9 + $0x64] sm:$0xf] }
  0xed   : > { %3323 = vmatpush.bf16.msra.mxu0 %v6341_v28  ;;  %3292 = vmatmul.bf16.vlgmr.msrb.gmra.mxu1 %v8991_v44  ;;  %v7966_v28 = vld [vmem:[#allocation9 + $0x74c] sm:$0xf0]  ;;  %v6804_v40 = vld [vmem:[#allocation9 + $0x880] sm:$0xf]  ;;  %v5766_v1 = vld [vmem:[#allocation9 + $0x70] sm:$0xf0] }
  0xee   : > { %3336 = vmatpush.bf16.msra.mxu1 %v6469_v30  ;;  %3305 = vmatmul.bf16.vlgmr.msrb.gmra.mxu2 %v8985_v38  ;;  %v6389_v30 = vor.u32 %v7902_v25, %v6388_v23  ;;  %v7788_v23 = vld [vmem:[#allocation9 + $0x1c4] sm:$0xf]  ;;  %v8042_v34 = vld [vmem:[#allocation9 + $0x9ac] sm:$0xf0]  ;;  %v6932_v47 = vld [vmem:[#allocation9 + $0x980] sm:$0xf] }
  0xef   : > { %3349 = vmatpush.bf16.msra.mxu2 %v6597_v31  ;;  %3362 = vmatpush.bf16.msra.mxu3 %v6725_v35  ;;  %v6517_v31 = vor.u32 %v7934_v4, %v6516_v26  ;;  %v6645_v35 = vor.u32 %v7966_v28, %v6644_v27  ;;  %v9003_v26 = vpack.c.b16 %v1648_v9, %v1648_v9  ;;  %v8034_v63 = vld [vmem:[#allocation9 + $0x96c] sm:$0xf0] }
  0xf0   : > { %3318 = vmatmul.bf16.vlgmr.msrb.gmra.mxu3 %v8989_v42  ;;  %v6837_v4 = vor.u32 %v8014_v16, %v6836_v15  ;;  %v8030_v16 = vld [vmem:[#allocation9 + $0x94c] sm:$0xf0] }
  0xf1   : > { %3324 = vmatpush.bf16.msra.mxu0 %v6325_v43  ;;  %v6228_v43 = vld [vmem:[#allocation9 + $0x400] sm:$0xf] }
  0xf2   : > { %3337 = vmatpush.bf16.msra.mxu1 %v6453_v45  ;;  %v6245_v45 = vor.u32 %v7866_v33, %v6244_v32  ;;  %v6948_v32 = vld [vmem:[#allocation9 + $0x9a0] sm:$0xf] }
  0xf3   : > { %3350 = vmatpush.bf16.msra.mxu2 %v6581_v46  ;;  %3363 = vmatpush.bf16.msra.mxu3 %v6709_v50  ;;  %v7862_v46 = vld [vmem:[#allocation9 + $0x40c] sm:$0xf0]  ;;  %v6501_v50 = vor.u32 %v7930_v37, %v6500_v19  ;;  %v7784_v19 = vld [vmem:[#allocation9 + $0x1a4] sm:$0xf]  ;;  %v5926_v37 = vld [vmem:[#allocation9 + $0x1b0] sm:$0xf0] }
  0xf4   : > { %v6229_v61 = vor.u32 %v7862_v46, %v6228_v43  ;;  %v6949_v43 = vor.u32 %v8042_v34, %v6948_v32  ;;  %v8006_v46 = vld [vmem:[#allocation9 + $0x88c] sm:$0xf0]  ;;  %v5734_v34 = vld [vmem:[#allocation9 + $0x30] sm:$0xf0] }
  0xf5   : > { %3325 = vmatpush.bf16.msra.mxu0 %v6309_v56  ;;  %v7958_v56 = vld [vmem:[#allocation9 + $0x70c] sm:$0xf0] }
  0xf6   : > { %3338 = vmatpush.bf16.msra.mxu1 %v6437_v57  ;;  %v1303_v57 = vld [vmem:[%s8937_s3 + $0x10] sm:$0xff]  ;;  %v6613_v10 = vor.u32 %v7958_v56, %v6612_v55  ;;  %v6805_v55 = vor.u32 %v8006_v46, %v6804_v40  ;;  %v642_v56 = vperm.slane %v9011_v48, 0  ;;  %v8026_v32 = vld [vmem:[#allocation9 + $0x92c] sm:$0xf0] }
  0xf7   : > { %3351 = vmatpush.bf16.msra.mxu2 %v6565_v58  ;;  %3364 = vmatpush.bf16.msra.mxu3 %v6693_v62  ;;  %v6852_v58 = vld [vmem:[#allocation9 + $0x8e0] sm:$0xf]  ;;  %v8050_v62 = vld [vmem:[#allocation9 + $0x9ec] sm:$0xf0] }
  0xf8   : > { %v6853_v11 = vor.u32 %v8018_v59, %v6852_v58  ;;  %v6981_v13 = vor.u32 %v8050_v62, %v6980_v60  ;;  %v5785_v58 = vor.u32 %v7748_v51, %v5782_v52  ;;  %v6788_v59 = vld [vmem:[#allocation9 + $0x860] sm:$0xf]  ;;  %v8002_v60 = vld [vmem:[#allocation9 + $0x86c] sm:$0xf0]  ;;  %v7732_v51 = vld [vmem:[#allocation9 + $0x4] sm:$0xf] }
  0xf9   : > { %3326 = vmatpush.bf16.msra.mxu0 %v6293_v6  ;;  %v7792_v6 = vld [vmem:[#allocation9 + $0x1e4] sm:$0xf]  ;;  %v6740_v40 = vld [vmem:[#allocation9 + $0x800] sm:$0xf]  ;;  %v1305_v52 = vld [vmem:[%s8937_s3 + $0x20] sm:$0xff] }
  0xfa   : > { %3339 = vmatpush.bf16.msra.mxu1 %v6421_v7  ;;  %v5958_v7 = vld [vmem:[#allocation9 + $0x1f0] sm:$0xf0] }
  0xfb   : > { %3352 = vmatpush.bf16.msra.mxu2 %v6549_v8  ;;  %3365 = vmatpush.bf16.msra.mxu3 %v6677_v12  ;;  %v1645_v8 = vunpack.c.l.b16 %v1303_v57  ;;  %v1646_v12 = vunpack.c.h.b16 %v1303_v57 }
  0xfd   : > { %3327 = vmatpush.bf16.msra.mxu0 %v6277_v18  ;;  %v5961_v18 = vor.u32 %v7792_v6, %v5958_v7  ;;  %v9001_v25 = vpack.c.b16 %v1645_v8, %v1645_v8  ;;  %v9005_v27 = vpack.c.b16 %v1646_v12, %v1646_v12  ;;  %v6789_v7 = vor.u32 %v8002_v60, %v6788_v59  ;;  %v6772_v12 = vld [vmem:[#allocation9 + $0x840] sm:$0xf]  ;;  %v7824_v59 = vld [vmem:[#allocation9 + $0x2e4] sm:$0xf]  ;;  %v6086_v60 = vld [vmem:[#allocation9 + $0x2f0] sm:$0xf0] }
  0xfe   : > { %3340 = vmatpush.bf16.msra.mxu1 %v6405_v20  ;;  %v8046_v20 = vld [vmem:[#allocation9 + $0x9cc] sm:$0xf0] }
  0xff   : > { %3353 = vmatpush.bf16.msra.mxu2 %v6533_v21  ;;  %3366 = vmatpush.bf16.msra.mxu3 %v6661_v24  ;;  %v7756_v21 = vld [vmem:[#allocation9 + $0xc4] sm:$0xf]  ;;  %v5942_v24 = vld [vmem:[#allocation9 + $0x1d0] sm:$0xf0]  ;;  %v6965_v28 = vor.u32 %v8046_v20, %v6964_v17 }
 0x100   : > { %v5945_v33 = vor.u32 %v7788_v23, %v5942_v24  ;;  %v7740_v17 = vld [vmem:[#allocation9 + $0x44] sm:$0xf] }
 0x101   : > { %3328 = vmatpush.bf16.msra.mxu0 %v6261_v29  ;;  %v5817_v29 = vor.u32 %v7756_v21, %v5814_v22  ;;  %v7772_v21 = vld [vmem:[#allocation9 + $0x144] sm:$0xf]  ;;  %v5878_v22 = vld [vmem:[#allocation9 + $0x150] sm:$0xf0] }
 0x102   : > { %3341 = vmatpush.bf16.msra.mxu1 %v6389_v30  ;;  %v6820_v30 = vld [vmem:[#allocation9 + $0x8a0] sm:$0xf] }
 0x103   : > { %3354 = vmatpush.bf16.msra.mxu2 %v6517_v31  ;;  %3367 = vmatpush.bf16.msra.mxu3 %v6645_v35  ;;  %v8010_v31 = vld [vmem:[#allocation9 + $0x8ac] sm:$0xf0]  ;;  %v7752_v35 = vld [vmem:[#allocation9 + $0xa4] sm:$0xf] }
 0x104   : > { %v6821_v39 = vor.u32 %v8010_v31, %v6820_v30  ;;  %v6884_v30 = vld [vmem:[#allocation9 + $0x920] sm:$0xf]  ;;  %v5881_v31 = vor.u32 %v7772_v21, %v5878_v22  ;;  %v6198_v21 = vld [vmem:[#allocation9 + $0x3d0] sm:$0xf0]  ;;  %v7884_v22 = vld [vmem:[#allocation9 + $0x4c4] sm:$0xf] }
 0x105   : > { %3329 = vmatpush.bf16.msra.mxu0 %v6245_v45  ;;  %v5801_v45 = vor.u32 %v7752_v35, %v5798_v36  ;;  %v7768_v36 = vld [vmem:[#allocation9 + $0x124] sm:$0xf] }
 0x106   : > { %3342 = vmatpush.bf16.msra.mxu1 %v6373_v49  ;;  %v5929_v49 = vor.u32 %v7784_v19, %v5926_v37  ;;  %v5862_v19 = vld [vmem:[#allocation9 + $0x130] sm:$0xf0] }
 0x107   : > { %3355 = vmatpush.bf16.msra.mxu2 %v6501_v50  ;;  %3368 = vmatpush.bf16.msra.mxu3 %v6629_v54  ;;  %v8038_v50 = vld [vmem:[#allocation9 + $0x98c] sm:$0xf0]  ;;  %v5910_v54 = vld [vmem:[#allocation9 + $0x190] sm:$0xf0] }
 0x108   : > { %v6933_v57 = vor.u32 %v8038_v50, %v6932_v47  ;;  %v5913_v62 = vor.u32 %v7780_v53, %v5910_v54  ;;  %v6885_v47 = vor.u32 %v8026_v32, %v6884_v30  ;;  %v8022_v50 = vld [vmem:[#allocation9 + $0x90c] sm:$0xf0]  ;;  %v5865_v54 = vor.u32 %v7768_v36, %v5862_v19  ;;  %v6054_v36 = vld [vmem:[#allocation9 + $0x2b0] sm:$0xf0]  ;;  %v7848_v19 = vld [vmem:[#allocation9 + $0x3a4] sm:$0xf] }
 0x109   : > { %3330 = vmatpush.bf16.msra.mxu0 %v6229_v61  ;;  %v6916_v61 = vld [vmem:[#allocation9 + $0x960] sm:$0xf]  ;;  %v1150_v6 = vpop.f32.mrf.mxu0 }
 0x10a   : > { %3343 = vmatpush.bf16.msra.mxu1 %v6357_v2  ;;  %v7776_v2 = vld [vmem:[#allocation9 + $0x164] sm:$0xf]  ;;  %v1151_v8 = vadd.f32 %v1150_v6, %v642_v56  ;;  %v1163_v9 = vpop.f32.mrf.mxu1 }
 0x10b   : > { %3356 = vmatpush.bf16.msra.mxu2 %v6485_v3  ;;  %3369 = vmatpush.bf16.msra.mxu3 %v6613_v10  ;;  %v5894_v3 = vld [vmem:[#allocation9 + $0x170] sm:$0xf0]  ;;  %v6917_v10 = vor.u32 %v8034_v63, %v6916_v61  ;;  %v7764_v56 = vld [vmem:[#allocation9 + $0x104] sm:$0xf] }
 0x10c   : > { %3331 = vmatmul.bf16.vlgmr.msra.gmra.mxu0 %v9001_v25  ;;  %v5897_v15 = vor.u32 %v7776_v2, %v5894_v3  ;;  %v1164_v20 = vadd.f32 %v1163_v9, %v1151_v8  ;;  %v7856_v61 = vld [vmem:[#allocation9 + $0x3e4] sm:$0xf]  ;;  %v6214_v63 = vld [vmem:[#allocation9 + $0x3f0] sm:$0xf0]  ;;  %v1649_v2 = vunpack.c.l.b16 %v1305_v52  ;;  %v1650_v9 = vunpack.c.h.b16 %v1305_v52 }
 0x10d   : > { %3375 = vmatpush.bf16.msrb.mxu0 %v6853_v11  ;;  %3344 = vmatmul.bf16.vlgmr.msra.gmra.mxu1 %v9005_v27  ;;  %v5769_v11 = vor.u32 %v7744_v0, %v5766_v1  ;;  %v7888_v0 = vld [vmem:[#allocation9 + $0x4e4] sm:$0xf]  ;;  %v6342_v1 = vld [vmem:[#allocation9 + $0x4f0] sm:$0xf0] }
 0x10e   : > { %3388 = vmatpush.bf16.msrb.mxu1 %v6981_v13  ;;  %3357 = vmatmul.bf16.vlgmr.msra.gmra.mxu2 %v8999_v5  ;;  %v7998_v13 = vld [vmem:[#allocation9 + $0x84c] sm:$0xf0]  ;;  %v6470_v8 = vld [vmem:[#allocation9 + $0x5f0] sm:$0xf0]  ;;  %v7812_v52 = vld [vmem:[#allocation9 + $0x284] sm:$0xf] }
 0x10f   : > { %3401 = vmatpush.bf16.msrb.mxu2 %v5833_v14  ;;  %3414 = vmatpush.bf16.msrb.mxu3 %v5961_v18  ;;  %v6900_v14 = vld [vmem:[#allocation9 + $0x940] sm:$0xf]  ;;  %v5750_v18 = vld [vmem:[#allocation9 + $0x50] sm:$0xf0]  ;;  %v6773_v23 = vor.u32 %v7998_v13, %v6772_v12  ;;  %v6217_v13 = vor.u32 %v7856_v61, %v6214_v63 }
 0x110   : > { %3370 = vmatmul.bf16.vlgmr.msra.gmra.mxu3 %v9003_v26  ;;  %v6901_v24 = vor.u32 %v8030_v16, %v6900_v14  ;;  %v6345_v14 = vor.u32 %v7888_v0, %v6342_v1  ;;  %v6070_v16 = vld [vmem:[#allocation9 + $0x2d0] sm:$0xf0]  ;;  %v7808_v1 = vld [vmem:[#allocation9 + $0x264] sm:$0xf] }
 0x111   : > { %3376 = vmatpush.bf16.msrb.mxu0 %v6837_v4  ;;  %v5753_v4 = vor.u32 %v7740_v17, %v5750_v18  ;;  %v9014_v35 = vpop.f32.mrf.mxu3  ;;  %v1152_v37 = vpop.f32.mrf.mxu0  ;;  %v7852_v17 = vld [vmem:[#allocation9 + $0x3c4] sm:$0xf]  ;;  %v6422_v61 = vld [vmem:[#allocation9 + $0x590] sm:$0xf0] }
 0x112   : > { %3389 = vmatpush.bf16.msrb.mxu1 %v6965_v28  ;;  %v6756_v28 = vld [vmem:[#allocation9 + $0x820] sm:$0xf]  ;;  %v1165_v46 = vpop.f32.mrf.mxu1  ;;  %v6201_v32 = vor.u32 %v7852_v17, %v6198_v21 }
 0x113   : > { %3402 = vmatpush.bf16.msrb.mxu2 %v5817_v29  ;;  %3415 = vmatpush.bf16.msrb.mxu3 %v5945_v33  ;;  %v7994_v29 = vld [vmem:[#allocation9 + $0x82c] sm:$0xf0]  ;;  %v7736_v33 = vld [vmem:[#allocation9 + $0x24] sm:$0xf]  ;;  %v1176_v53 = vpop.f32.mrf.mxu2  ;;  %v6438_v46 = vld [vmem:[#allocation9 + $0x5b0] sm:$0xf0] }
 0x115   : > { %3377 = vmatpush.bf16.msrb.mxu0 %v6821_v39  ;;  %v6757_v39 = vor.u32 %v7994_v29, %v6756_v28  ;;  %v6454_v28 = vld [vmem:[#allocation9 + $0x5d0] sm:$0xf0] }
 0x116   : > { %3390 = vmatpush.bf16.msrb.mxu1 %v6949_v43  ;;  %v7990_v43 = vld [vmem:[#allocation9 + $0x80c] sm:$0xf0] }
 0x117   : > { %3403 = vmatpush.bf16.msrb.mxu2 %v5801_v45  ;;  %3416 = vmatpush.bf16.msrb.mxu3 %v5929_v49  ;;  %v6868_v45 = vld [vmem:[#allocation9 + $0x900] sm:$0xf]  ;;  %v5737_v49 = vor.u32 %v7736_v33, %v5734_v34  ;;  %v7816_v34 = vld [vmem:[#allocation9 + $0x2a4] sm:$0xf] }
 0x118   : > { %v6869_v3 = vor.u32 %v8022_v50, %v6868_v45  ;;  %v7912_v45 = vld [vmem:[#allocation9 + $0x5a4] sm:$0xf] }
 0x119   : > { %3378 = vmatpush.bf16.msrb.mxu0 %v6805_v55  ;;  %v5718_v55 = vld [vmem:[#allocation9 + $0x10] sm:$0xf0]  ;;  %v1191_v12 = vpop.f32.mrf.mxu3 }
 0x11a   : > { %3391 = vmatpush.bf16.msrb.mxu1 %v6933_v57  ;;  %v5846_v57 = vld [vmem:[#allocation9 + $0x110] sm:$0xf0]  ;;  %v5721_v6 = vor.u32 %v7732_v51, %v5718_v55  ;;  %v6441_v55 = vor.u32 %v7912_v45, %v6438_v46  ;;  %v7872_v12 = vld [vmem:[#allocation9 + $0x464] sm:$0xf] }
 0x11b   : > { %3404 = vmatpush.bf16.msrb.mxu2 %v5785_v58  ;;  %3417 = vmatpush.bf16.msrb.mxu3 %v5913_v62  ;;  %v9017_v58 = vadd.f32 %v1176_v53, %v1164_v20  ;;  %v6741_v62 = vor.u32 %v7990_v43, %v6740_v40  ;;  %v9019_v20 = vpack.c.b16 %v1649_v2, %v1649_v2  ;;  %v1178_v29 = vpop.f32.mrf.mxu2  ;;  %v7880_v40 = vld [vmem:[#allocation9 + $0x4a4] sm:$0xf]  ;;  %v6310_v43 = vld [vmem:[#allocation9 + $0x4b0] sm:$0xf0] }
 0x11c   : > { %v6313_v51 = vor.u32 %v7880_v40, %v6310_v43  ;;  %v6038_v53 = vld [vmem:[#allocation9 + $0x290] sm:$0xf0] }
 0x11d   : > { %3379 = vmatpush.bf16.msrb.mxu0 %v6789_v7  ;;  %v7920_v7 = vld [vmem:[#allocation9 + $0x5e4] sm:$0xf]  ;;  %v6041_v63 = vor.u32 %v7812_v52, %v6038_v53  ;;  %v6118_v53 = vld [vmem:[#allocation9 + $0x330] sm:$0xf0] }
 0x11e   : > { %3392 = vmatpush.bf16.msrb.mxu1 %v6917_v10  ;;  %v5849_v10 = vor.u32 %v7764_v56, %v5846_v57  ;;  %v6473_v18 = vor.u32 %v7920_v7, %v6470_v8  ;;  %v6166_v56 = vld [vmem:[#allocation9 + $0x390] sm:$0xf0]  ;;  %v7876_v57 = vld [vmem:[#allocation9 + $0x484] sm:$0xf] }
 0x11f   : > { %3405 = vmatpush.bf16.msrb.mxu2 %v5769_v11  ;;  %3418 = vmatpush.bf16.msrb.mxu3 %v5897_v15  ;;  %v6089_v11 = vor.u32 %v7824_v59, %v6086_v60  ;;  %v7820_v15 = vld [vmem:[#allocation9 + $0x2c4] sm:$0xf]  ;;  %v6294_v59 = vld [vmem:[#allocation9 + $0x490] sm:$0xf0] }
 0x120   : > { %v6073_v30 = vor.u32 %v7820_v15, %v6070_v16  ;;  %v7908_v60 = vld [vmem:[#allocation9 + $0x584] sm:$0xf]  ;;  %v6150_v8 = vld [vmem:[#allocation9 + $0x370] sm:$0xf0]  ;;  %v644_v16 = vperm.slane %v9011_v48, 2 }
 0x121   : > { %3380 = vmatpush.bf16.msrb.mxu0 %v6773_v23  ;;  %v6326_v23 = vld [vmem:[#allocation9 + $0x4d0] sm:$0xf0]  ;;  %v7840_v7 = vld [vmem:[#allocation9 + $0x364] sm:$0xf] }
 0x122   : > { %3393 = vmatpush.bf16.msrb.mxu1 %v6901_v24  ;;  %v9021_v24 = vpack.c.b16 %v1650_v9, %v1650_v9  ;;  %v6329_v33 = vor.u32 %v7884_v22, %v6326_v23  ;;  %v1297_v9 = vmax.f32 %v9017_v58, 0.0  ;;  %v6406_v15 = vld [vmem:[#allocation9 + $0x570] sm:$0xf0]  ;;  %v6153_v21 = vor.u32 %v7840_v7, %v6150_v8  ;;  %v7804_v23 = vld [vmem:[#allocation9 + $0x244] sm:$0xf] }
 0x123   : > { %3406 = vmatpush.bf16.msrb.mxu2 %v5753_v4  ;;  %3419 = vmatpush.bf16.msrb.mxu3 %v5881_v31  ;;  %v7916_v4 = vld [vmem:[#allocation9 + $0x5c4] sm:$0xf]  ;;  %v643_v31 = vperm.slane %v9011_v48, 1  ;;  %v6358_v7 = vld [vmem:[#allocation9 + $0x510] sm:$0xf0] }
 0x124   : > { %v6457_v37 = vor.u32 %v7916_v4, %v6454_v28  ;;  %v6006_v4 = vld [vmem:[#allocation9 + $0x250] sm:$0xf0]  ;;  %v7836_v28 = vld [vmem:[#allocation9 + $0x344] sm:$0xf] }
 0x125   : > { %3381 = vmatpush.bf16.msrb.mxu0 %v6757_v39  ;;  %v6182_v39 = vld [vmem:[#allocation9 + $0x3b0] sm:$0xf0]  ;;  %v6009_v40 = vor.u32 %v7804_v23, %v6006_v4 }
 0x126   : > { %3394 = vmatpush.bf16.msrb.mxu1 %v6885_v47  ;;  %v6057_v47 = vor.u32 %v7816_v34, %v6054_v36  ;;  %v6185_v50 = vor.u32 %v7848_v19, %v6182_v39  ;;  %v7900_v34 = vld [vmem:[#allocation9 + $0x544] sm:$0xf]  ;;  %v6390_v36 = vld [vmem:[#allocation9 + $0x550] sm:$0xf0] }
 0x127   : > { %3407 = vmatpush.bf16.msrb.mxu2 %v5737_v49  ;;  %3420 = vmatpush.bf16.msrb.mxu3 %v5865_v54  ;;  %v1190_v49 = vadd.f32 %v9014_v35, %v643_v31  ;;  %v7844_v54 = vld [vmem:[#allocation9 + $0x384] sm:$0xf]  ;;  %v6393_v52 = vor.u32 %v7900_v34, %v6390_v36  ;;  %v6710_v34 = vld [vmem:[#allocation9 + $0x7d0] sm:$0xf0] }
 0x128   : > { %v6169_v2 = vor.u32 %v7844_v54, %v6166_v56  ;;  %v7868_v31 = vld [vmem:[#allocation9 + $0x444] sm:$0xf] }
 0x129   : > { %3382 = vmatpush.bf16.msrb.mxu0 %v6741_v62  ;;  %v1202_v62 = vpop.f32.mrf.mxu0  ;;  %v7864_v54 = vld [vmem:[#allocation9 + $0x424] sm:$0xf] }
 0x12a   : > { %3395 = vmatpush.bf16.msrb.mxu1 %v6869_v3  ;;  %v1203_v35 = vadd.f32 %v1202_v62, %v1190_v49  ;;  %v1215_v0 = vpop.f32.mrf.mxu1  ;;  %v6297_v3 = vor.u32 %v7876_v57, %v6294_v59  ;;  %v5990_v49 = vld [vmem:[#allocation9 + $0x230] sm:$0xf0]  ;;  %v7896_v56 = vld [vmem:[#allocation9 + $0x524] sm:$0xf] }
 0x12b   : > { %3408 = vmatpush.bf16.msrb.mxu2 %v5721_v6  ;;  %3421 = vmatpush.bf16.msrb.mxu3 %v5849_v10  ;;  %v6022_v6 = vld [vmem:[#allocation9 + $0x270] sm:$0xf0]  ;;  %v6425_v10 = vor.u32 %v7908_v60, %v6422_v61  ;;  %v7796_v60 = vld [vmem:[#allocation9 + $0x204] sm:$0xf] }
 0x12c   : > { %3383 = vmatmul.bf16.vlgmr.msrb.gmra.mxu0 %v9019_v20  ;;  %v6374_v57 = vld [vmem:[#allocation9 + $0x530] sm:$0xf0]  ;;  %v8012_v36 = vld [vmem:[#allocation9 + $0x8c4] sm:$0xf] }
 0x12d   : > { %3427 = vmatpush.bf16.msra.mxu0 %v6089_v11  ;;  %3396 = vmatmul.bf16.vlgmr.msrb.gmra.mxu1 %v9021_v24  ;;  %v1216_v11 = vadd.f32 %v1215_v0, %v1203_v35  ;;  %v5974_v61 = vld [vmem:[#allocation9 + $0x210] sm:$0xf0]  ;;  %v7828_v35 = vld [vmem:[#allocation9 + $0x304] sm:$0xf] }
 0x12e   : > { %3440 = vmatpush.bf16.msra.mxu1 %v6217_v13  ;;  %3409 = vmatmul.bf16.vlgmr.msrb.gmra.mxu2 %v8987_v41  ;;  %v6278_v13 = vld [vmem:[#allocation9 + $0x470] sm:$0xf0] }
 0x12f   : > { %3453 = vmatpush.bf16.msra.mxu2 %v6345_v14  ;;  %3466 = vmatpush.bf16.msra.mxu3 %v6473_v18  ;;  %v7904_v14 = vld [vmem:[#allocation9 + $0x564] sm:$0xf]  ;;  %v1298_v17 = vmax.f32 %v1216_v11, 0.0  ;;  %v6025_v18 = vor.u32 %v7808_v1, %v6022_v6  ;;  %v6281_v22 = vor.u32 %v7872_v12, %v6278_v13  ;;  %v6102_v0 = vld [vmem:[#allocation9 + $0x310] sm:$0xf0]  ;;  %v5977_v13 = vor.u32 %v7796_v60, %v5974_v61 }
 0x130   : > { %3422 = vmatmul.bf16.vlgmr.msrb.gmra.mxu3 %v8991_v44  ;;  %v6409_v29 = vor.u32 %v7904_v14, %v6406_v15  ;;  %v7860_v1 = vld [vmem:[#allocation9 + $0x404] sm:$0xf]  ;;  %v6726_v14 = vld [vmem:[#allocation9 + $0x7f0] sm:$0xf0] }
 0x131   : > { %3428 = vmatpush.bf16.msra.mxu0 %v6073_v30  ;;  %v9031_v58 = vpack.c.bf16 %v1298_v17, %v1297_v9  ;;  %v6134_v30 = vld [vmem:[#allocation9 + $0x350] sm:$0xf0]  ;;  %v1204_v39 = vpop.f32.mrf.mxu0  ;;  %v7892_v6 = vld [vmem:[#allocation9 + $0x504] sm:$0xf]  ;;  %v6105_v17 = vor.u32 %v7828_v35, %v6102_v0  ;;  %v645_v35 = vperm.slane %v9011_v48, 3 }
 0x132   : > { %3441 = vmatpush.bf16.msra.mxu1 %v6201_v32  ;;  %v6262_v32 = vld [vmem:[#allocation9 + $0x450] sm:$0xf0]  ;;  %v1217_v43 = vpop.f32.mrf.mxu1  ;;  %v6137_v45 = vor.u32 %v7836_v28, %v6134_v30  ;;  %v7952_v9 = vld [vmem:[#allocation9 + $0x6e4] sm:$0xf]  ;;  %v6361_v23 = vor.u32 %v7892_v6, %v6358_v7 }
 0x133   : > { %3454 = vmatpush.bf16.msra.mxu2 %v6329_v33  ;;  %3467 = vmatpush.bf16.msra.mxu3 %v6457_v37  ;;  %v1228_v33 = vpop.f32.mrf.mxu2  ;;  %v1241_v37 = vpop.f32.mrf.mxu3  ;;  %v6265_v46 = vor.u32 %v7868_v31, %v6262_v32  ;;  %v7984_v11 = vld [vmem:[#allocation9 + $0x7e4] sm:$0xf]  ;;  %v6582_v31 = vld [vmem:[#allocation9 + $0x6d0] sm:$0xf0] }
 0x134   : > { %v1229_v19 = vadd.f32 %v1228_v33, %v644_v16  ;;  %v8016_v15 = vld [vmem:[#allocation9 + $0x8e4] sm:$0xf]  ;;  %v6854_v16 = vld [vmem:[#allocation9 + $0x8f0] sm:$0xf0]  ;;  %v6729_v28 = vor.u32 %v7984_v11, %v6726_v14 }
 0x135   : > { %3429 = vmatpush.bf16.msra.mxu0 %v6057_v47  ;;  %v7800_v47 = vld [vmem:[#allocation9 + $0x224] sm:$0xf]  ;;  %v6966_v39 = vld [vmem:[#allocation9 + $0x9d0] sm:$0xf0] }
 0x136   : > { %3442 = vmatpush.bf16.msra.mxu1 %v6185_v50  ;;  %v7832_v50 = vld [vmem:[#allocation9 + $0x324] sm:$0xf]  ;;  %v5993_v59 = vor.u32 %v7800_v47, %v5990_v49  ;;  %v6566_v47 = vld [vmem:[#allocation9 + $0x6b0] sm:$0xf0] }
 0x137   : > { %3455 = vmatpush.bf16.msra.mxu2 %v6313_v51  ;;  %3468 = vmatpush.bf16.msra.mxu3 %v6441_v55  ;;  %v9033_v51 = vadd.f32 %v1241_v37, %v1229_v19  ;;  %v6246_v55 = vld [vmem:[#allocation9 + $0x430] sm:$0xf0]  ;;  %v6121_v62 = vor.u32 %v7832_v50, %v6118_v53  ;;  %v7948_v30 = vld [vmem:[#allocation9 + $0x6c4] sm:$0xf] }
 0x138   : > { %v7980_v32 = vld [vmem:[#allocation9 + $0x7c4] sm:$0xf]  ;;  %v6838_v19 = vld [vmem:[#allocation9 + $0x8d0] sm:$0xf0] }
 0x139   : > { %3430 = vmatpush.bf16.msra.mxu0 %v6041_v63  ;;  %v6249_v63 = vor.u32 %v7864_v54, %v6246_v55  ;;  %v8044_v37 = vld [vmem:[#allocation9 + $0x9c4] sm:$0xf]  ;;  %v6713_v43 = vor.u32 %v7980_v32, %v6710_v34  ;;  %v6822_v54 = vld [vmem:[#allocation9 + $0x8b0] sm:$0xf0] }
 0x13a   : > { %3443 = vmatpush.bf16.msra.mxu1 %v6169_v2  ;;  %v6377_v2 = vor.u32 %v7896_v56, %v6374_v57  ;;  %v7976_v49 = vld [vmem:[#allocation9 + $0x7a4] sm:$0xf]  ;;  %v6969_v50 = vor.u32 %v8044_v37, %v6966_v39  ;;  %v6950_v56 = vld [vmem:[#allocation9 + $0x9b0] sm:$0xf0] }
 0x13b   : > { %3456 = vmatpush.bf16.msra.mxu2 %v6297_v3  ;;  %3469 = vmatpush.bf16.msra.mxu3 %v6425_v10  ;;  %v6230_v3 = vld [vmem:[#allocation9 + $0x410] sm:$0xf0]  ;;  %v1230_v8 = vpop.f32.mrf.mxu2  ;;  %v1243_v12 = vpop.f32.mrf.mxu3  ;;  %v8008_v53 = vld [vmem:[#allocation9 + $0x8a4] sm:$0xf] }
 0x13c   : > { %v6598_v10 = vld [vmem:[#allocation9 + $0x6f0] sm:$0xf0]  ;;  %v8040_v55 = vld [vmem:[#allocation9 + $0x9a4] sm:$0xf]  ;;  %v6825_v61 = vor.u32 %v8008_v53, %v6822_v54 }
 0x13d   : > { %3431 = vmatpush.bf16.msra.mxu0 %v6025_v18  ;;  %v6233_v18 = vor.u32 %v7860_v1, %v6230_v3  ;;  %v6601_v4 = vor.u32 %v7952_v9, %v6598_v10  ;;  %v6953_v0 = vor.u32 %v8040_v55, %v6950_v56  ;;  %v6678_v1 = vld [vmem:[#allocation9 + $0x790] sm:$0xf0]  ;;  %v8036_v6 = vld [vmem:[#allocation9 + $0x984] sm:$0xf] }
 0x13e   : > { %3444 = vmatpush.bf16.msra.mxu1 %v6153_v21  ;;  %v8048_v21 = vld [vmem:[#allocation9 + $0x9e4] sm:$0xf]  ;;  %v6806_v3 = vld [vmem:[#allocation9 + $0x890] sm:$0xf0] }
 0x13f   : > { %3457 = vmatpush.bf16.msra.mxu2 %v6281_v22  ;;  %3470 = vmatpush.bf16.msra.mxu3 %v6409_v29  ;;  %v6982_v22 = vld [vmem:[#allocation9 + $0x9f0] sm:$0xf0]  ;;  %v6857_v29 = vor.u32 %v8016_v15, %v6854_v16  ;;  %v7968_v15 = vld [vmem:[#allocation9 + $0x764] sm:$0xf] }
 0x140   : > { %v6985_v33 = vor.u32 %v8048_v21, %v6982_v22  ;;  %v6934_v7 = vld [vmem:[#allocation9 + $0x990] sm:$0xf0]  ;;  %v8032_v21 = vld [vmem:[#allocation9 + $0x964] sm:$0xf] }
 0x141   : > { %3432 = vmatpush.bf16.msra.mxu0 %v6009_v40  ;;  %v6585_v40 = vor.u32 %v7948_v30, %v6582_v31  ;;  %v6534_v14 = vld [vmem:[#allocation9 + $0x670] sm:$0xf0]  ;;  %v6937_v48 = vor.u32 %v8036_v6, %v6934_v7  ;;  %v7932_v32 = vld [vmem:[#allocation9 + $0x644] sm:$0xf] }
 0x142   : > { %3445 = vmatpush.bf16.msra.mxu1 %v6137_v45  ;;  %v6841_v45 = vor.u32 %v8012_v36, %v6838_v19  ;;  %v6662_v16 = vld [vmem:[#allocation9 + $0x770] sm:$0xf0]  ;;  %v7964_v34 = vld [vmem:[#allocation9 + $0x744] sm:$0xf] }
 0x143   : > { %3458 = vmatpush.bf16.msra.mxu2 %v6265_v46  ;;  %3471 = vmatpush.bf16.msra.mxu3 %v6393_v52  ;;  %v7944_v46 = vld [vmem:[#allocation9 + $0x6a4] sm:$0xf]  ;;  %v6694_v52 = vld [vmem:[#allocation9 + $0x7b0] sm:$0xf0] }
 0x144   : > { %v6569_v57 = vor.u32 %v7944_v46, %v6566_v47  ;;  %v6697_v60 = vor.u32 %v7976_v49, %v6694_v52  ;;  %v6918_v22 = vld [vmem:[#allocation9 + $0x970] sm:$0xf0]  ;;  %v7960_v56 = vld [vmem:[#allocation9 + $0x724] sm:$0xf] }
 0x145   : > { %3433 = vmatpush.bf16.msra.mxu0 %v5993_v59  ;;  %v7940_v59 = vld [vmem:[#allocation9 + $0x684] sm:$0xf]  ;;  %v6921_v36 = vor.u32 %v8032_v21, %v6918_v22  ;;  %v6646_v39 = vld [vmem:[#allocation9 + $0x750] sm:$0xf0]  ;;  %v5964_v21 = vld [vmem:[#allocation9 + $0x1e8] sm:$0xf] }
 0x146   : > { %3446 = vmatpush.bf16.msra.mxu1 %v6121_v62  ;;  %v6550_v62 = vld [vmem:[#allocation9 + $0x690] sm:$0xf0]  ;;  %v6649_v53 = vor.u32 %v7964_v34, %v6646_v39  ;;  %v7759_v39 = vld [vmem:[#allocation9 + $0xd4] sm:$0xf0] }
 0x147   : > { %3459 = vmatpush.bf16.msra.mxu2 %v6249_v63  ;;  %3472 = vmatpush.bf16.msra.mxu3 %v6377_v2  ;;  %v7972_v63 = vld [vmem:[#allocation9 + $0x784] sm:$0xf]  ;;  %v6553_v8 = vor.u32 %v7940_v59, %v6550_v62  ;;  %v6902_v46 = vld [vmem:[#allocation9 + $0x950] sm:$0xf0] }
 0x148   : > { %v8004_v2 = vld [vmem:[#allocation9 + $0x884] sm:$0xf]  ;;  %v6681_v10 = vor.u32 %v7972_v63, %v6678_v1  ;;  %v6502_v55 = vld [vmem:[#allocation9 + $0x630] sm:$0xf0] }
 0x149   : > { %3434 = vmatpush.bf16.msra.mxu0 %v5977_v13  ;;  %v6809_v11 = vor.u32 %v8004_v2, %v6806_v3  ;;  %v7936_v13 = vld [vmem:[#allocation9 + $0x664] sm:$0xf]  ;;  %v6758_v62 = vld [vmem:[#allocation9 + $0x830] sm:$0xf0] }
 0x14a   : > { %3447 = vmatpush.bf16.msra.mxu1 %v6105_v17  ;;  %v1267_v9 = vpop.f32.mrf.mxu1  ;;  %v8000_v17 = vld [vmem:[#allocation9 + $0x864] sm:$0xf]  ;;  %v6486_v6 = vld [vmem:[#allocation9 + $0x610] sm:$0xf0] }
 0x14b   : > { %3460 = vmatpush.bf16.msra.mxu2 %v6233_v18  ;;  %3473 = vmatpush.bf16.msra.mxu3 %v6361_v23  ;;  %v1268_v12 = vadd.f32 %v1267_v9, %v645_v35  ;;  %v6790_v18 = vld [vmem:[#allocation9 + $0x870] sm:$0xf0]  ;;  %v1254_v23 = vpop.f32.mrf.mxu0  ;;  %v8024_v63 = vld [vmem:[#allocation9 + $0x924] sm:$0xf] }
 0x14c   : > { %3435 = vmatmul.bf16.vlgmr.msra.gmra.mxu0 %v8985_v38  ;;  %v6793_v30 = vor.u32 %v8000_v17, %v6790_v18  ;;  %v6886_v35 = vld [vmem:[#allocation9 + $0x930] sm:$0xf0]  ;;  %v7924_v3 = vld [vmem:[#allocation9 + $0x604] sm:$0xf]  ;;  %v5836_v17 = vld [vmem:[#allocation9 + $0xe8] sm:$0xf] }
 0x14d   : > { %3479 = vmatpush.bf16.msrb.mxu0 %v6601_v4  ;;  %3448 = vmatmul.bf16.vlgmr.msra.gmra.mxu1 %v8989_v42  ;;  %v6537_v4 = vor.u32 %v7936_v13, %v6534_v14  ;;  %v7956_v9 = vld [vmem:[#allocation9 + $0x704] sm:$0xf]  ;;  %v6889_v13 = vor.u32 %v8024_v63, %v6886_v35  ;;  %v6742_v14 = vld [vmem:[#allocation9 + $0x810] sm:$0xf0]  ;;  %v7763_v18 = vld [vmem:[#allocation9 + $0xf4] sm:$0xf0]  ;;  %v6489_v22 = vor.u32 %v7924_v3, %v6486_v6 }
 0x14e   : > { %3492 = vmatpush.bf16.msrb.mxu1 %v6729_v28  ;;  %3461 = vmatmul.bf16.vlgmr.msra.gmra.mxu2 %v9001_v25  ;;  %v1255_v28 = vadd.f32 %v1254_v23, %v9033_v51  ;;  %v7795_v23 = vld [vmem:[#allocation9 + $0x1f4] sm:$0xf0]  ;;  %v5837_v34 = vor.u32 %v7763_v18, %v5836_v17  ;;  %v6188_v63 = vld [vmem:[#allocation9 + $0x3a8] sm:$0xf] }
 0x14f   : > { %3505 = vmatpush.bf16.msrb.mxu2 %v6857_v29  ;;  %3518 = vmatpush.bf16.msrb.mxu3 %v6985_v33  ;;  %v6665_v29 = vor.u32 %v7968_v15, %v6662_v16  ;;  %v6518_v33 = vld [vmem:[#allocation9 + $0x650] sm:$0xf0]  ;;  %v8020_v15 = vld [vmem:[#allocation9 + $0x904] sm:$0xf]  ;;  %v7851_v35 = vld [vmem:[#allocation9 + $0x3b4] sm:$0xf0] }
 0x150   : > { %3474 = vmatmul.bf16.vlgmr.msra.gmra.mxu3 %v9005_v27  ;;  %v1299_v47 = vmax.f32 %v1255_v28, 0.0  ;;  %v6521_v49 = vor.u32 %v7932_v32, %v6518_v33  ;;  %v7827_v28 = vld [vmem:[#allocation9 + $0x2f4] sm:$0xf0] }
 0x151   : > { %3480 = vmatpush.bf16.msrb.mxu0 %v6585_v40  ;;  %v1280_v31 = vpop.f32.mrf.mxu2  ;;  %v7996_v40 = vld [vmem:[#allocation9 + $0x844] sm:$0xf]  ;;  %v7859_v32 = vld [vmem:[#allocation9 + $0x3f4] sm:$0xf0] }
 0x152   : > { %3493 = vmatpush.bf16.msrb.mxu1 %v6713_v43  ;;  %v1281_v19 = vadd.f32 %v1280_v31, %v1268_v12  ;;  %v6774_v43 = vld [vmem:[#allocation9 + $0x850] sm:$0xf0]  ;;  %v1269_v52 = vpop.f32.mrf.mxu1  ;;  %v6220_v31 = vld [vmem:[#allocation9 + $0x3e8] sm:$0xf] }
 0x153   : > { %3506 = vmatpush.bf16.msrb.mxu2 %v6841_v45  ;;  %3519 = vmatpush.bf16.msrb.mxu3 %v6969_v50  ;;  %v1293_v37 = vpop.f32.mrf.mxu3  ;;  %v8028_v45 = vld [vmem:[#allocation9 + $0x944] sm:$0xf]  ;;  %v6777_v54 = vor.u32 %v7996_v40, %v6774_v43  ;;  %v5948_v40 = vld [vmem:[#allocation9 + $0x1c8] sm:$0xf]  ;;  %v6221_v43 = vor.u32 %v7859_v32, %v6220_v31  ;;  %v7811_v32 = vld [vmem:[#allocation9 + $0x274] sm:$0xf0] }
 0x154   : > { %v1294_v51 = vadd.f32 %v1293_v37, %v1281_v19  ;;  %v7928_v50 = vld [vmem:[#allocation9 + $0x624] sm:$0xf]  ;;  %v5820_v37 = vld [vmem:[#allocation9 + $0xc8] sm:$0xf] }
 0x155   : > { %3481 = vmatpush.bf16.msrb.mxu0 %v6569_v57  ;;  %v6630_v57 = vld [vmem:[#allocation9 + $0x730] sm:$0xf0]  ;;  %v6505_v2 = vor.u32 %v7928_v50, %v6502_v55  ;;  %v5821_v50 = vor.u32 %v7759_v39, %v5820_v37  ;;  %v5804_v52 = vld [vmem:[#allocation9 + $0xa8] sm:$0xf]  ;;  %v7755_v55 = vld [vmem:[#allocation9 + $0xb4] sm:$0xf0] }
 0x156   : > { %3494 = vmatpush.bf16.msrb.mxu1 %v6697_v60  ;;  %v1300_v59 = vmax.f32 %v1294_v51, 0.0  ;;  %v6905_v60 = vor.u32 %v8028_v45, %v6902_v46  ;;  %v6633_v7 = vor.u32 %v7960_v56, %v6630_v57  ;;  %v7791_v45 = vld [vmem:[#allocation9 + $0x1d4] sm:$0xf0]  ;;  %v6076_v46 = vld [vmem:[#allocation9 + $0x2c8] sm:$0xf] }
 0x157   : > { %3507 = vmatpush.bf16.msrb.mxu2 %v6825_v61  ;;  %3520 = vmatpush.bf16.msrb.mxu3 %v6953_v0  ;;  %v7992_v61 = vld [vmem:[#allocation9 + $0x824] sm:$0xf]  ;;  %v1256_v0 = vpop.f32.mrf.mxu0  ;;  %v6204_v51 = vld [vmem:[#allocation9 + $0x3c8] sm:$0xf]  ;;  %v7787_v57 = vld [vmem:[#allocation9 + $0x1b4] sm:$0xf0] }
 0x158   : > { %v9041_v1 = vpack.c.bf16 %v1300_v59, %v1299_v47  ;;  %v7823_v47 = vld [vmem:[#allocation9 + $0x2d4] sm:$0xf0]  ;;  %v5932_v56 = vld [vmem:[#allocation9 + $0x1a8] sm:$0xf]  ;;  %v5805_v0 = vor.u32 %v7755_v55, %v5804_v52 }
 0x159   : > { %3482 = vmatpush.bf16.msrb.mxu0 %v6553_v8  ;;  %v6761_v8 = vor.u32 %v7992_v61, %v6758_v62  ;;  %v1282_v12 = vpop.f32.mrf.mxu2  ;;  %v7819_v61 = vld [vmem:[#allocation9 + $0x2b4] sm:$0xf0]  ;;  %v9044_v62 = vld [vmem:[#allocation10] sm:$0xf]  ;;  %v5933_v3 = vor.u32 %v7787_v57, %v5932_v56  ;;  %v6028_v31 = vld [vmem:[#allocation9 + $0x268] sm:$0xf] }
 0x15a   : > { %3495 = vmatpush.bf16.msrb.mxu1 %v6681_v10  ;;  %v6614_v10 = vld [vmem:[#allocation9 + $0x710] sm:$0xf0]  ;;  %v6044_v12 = vld [vmem:[#allocation9 + $0x288] sm:$0xf]  ;;  %v6029_v39 = vor.u32 %v7811_v32, %v6028_v31  ;;  %v7839_v55 = vld [vmem:[#allocation9 + $0x354] sm:$0xf0] }
 0x15b   : > { %3508 = vmatpush.bf16.msrb.mxu2 %v6809_v11  ;;  %3521 = vmatpush.bf16.msrb.mxu3 %v6937_v48  ;;  %v7988_v11 = vld [vmem:[#allocation9 + $0x804] sm:$0xf]  ;;  %v6870_v48 = vld [vmem:[#allocation9 + $0x910] sm:$0xf0]  ;;  %v1295_v16 = vpop.f32.mrf.mxu3  ;;  %v6476_v31 = vld [vmem:[#allocation9 + $0x5e8] sm:$0xf] }
 0x15c   : > { %v6873_v33 = vor.u32 %v8020_v15, %v6870_v48  ;;  %v7847_v15 = vld [vmem:[#allocation9 + $0x394] sm:$0xf0] }
 0x15d   : > { %3483 = vmatpush.bf16.msrb.mxu0 %v6537_v4  ;;  %v6092_v4 = vld [vmem:[#allocation9 + $0x2e8] sm:$0xf] }
 0x15e   : > { %3496 = vmatpush.bf16.msrb.mxu1 %v6665_v29  ;;  %v6617_v29 = vor.u32 %v7956_v9, %v6614_v10  ;;  %v6093_v19 = vor.u32 %v7827_v28, %v6092_v4  ;;  %v1628_v9 = vperm.slane %v9044_v62, 0  ;;  %v6189_v10 = vor.u32 %v7851_v35, %v6188_v63  ;;  %v5740_v63 = vld [vmem:[#allocation9 + $0x28] sm:$0xf]  ;;  %v7739_v35 = vld [vmem:[#allocation9 + $0x34] sm:$0xf0] }
 0x15f   : > { %3509 = vmatpush.bf16.msrb.mxu2 %v6793_v30  ;;  %3522 = vmatpush.bf16.msrb.mxu3 %v6921_v36  ;;  %v6745_v30 = vor.u32 %v7988_v11, %v6742_v14  ;;  %v5965_v36 = vor.u32 %v7795_v23, %v5964_v21  ;;  %v7783_v11 = vld [vmem:[#allocation9 + $0x194] sm:$0xf0]  ;;  %v6172_v14 = vld [vmem:[#allocation9 + $0x388] sm:$0xf] }
 0x160   : > { %v5772_v21 = vld [vmem:[#allocation9 + $0x68] sm:$0xf] }
 0x161   : > { %3484 = vmatpush.bf16.msrb.mxu0 %v6521_v49  ;;  %v7855_v49 = vld [vmem:[#allocation9 + $0x3d4] sm:$0xf0]  ;;  %v5900_v23 = vld [vmem:[#allocation9 + $0x168] sm:$0xf] }
 0x162   : > { %3497 = vmatpush.bf16.msrb.mxu1 %v6649_v53  ;;  %v5949_v53 = vor.u32 %v7791_v45, %v5948_v40  ;;  %v6205_v59 = vor.u32 %v7855_v49, %v6204_v51  ;;  %v5756_v40 = vld [vmem:[#allocation9 + $0x48] sm:$0xf]  ;;  %v7775_v51 = vld [vmem:[#allocation9 + $0x154] sm:$0xf0] }
 0x163   : > { %3510 = vmatpush.bf16.msrb.mxu2 %v6777_v54  ;;  %3523 = vmatpush.bf16.msrb.mxu3 %v6905_v60  ;;  %v6077_v54 = vor.u32 %v7823_v47, %v6076_v46  ;;  %v6060_v60 = vld [vmem:[#allocation9 + $0x2a8] sm:$0xf] }
 0x164   : > { %v6061_v6 = vor.u32 %v7819_v61, %v6060_v60  ;;  %v5884_v45 = vld [vmem:[#allocation9 + $0x148] sm:$0xf] }
 0x165   : > { %3485 = vmatpush.bf16.msrb.mxu0 %v6505_v2  ;;  %v5788_v2 = vld [vmem:[#allocation9 + $0x88] sm:$0xf]  ;;  %v5885_v60 = vor.u32 %v7775_v51, %v5884_v45 }
 0x166   : > { %3498 = vmatpush.bf16.msrb.mxu1 %v6633_v7  ;;  %v7751_v7 = vld [vmem:[#allocation9 + $0x94] sm:$0xf0]  ;;  %v6012_v49 = vld [vmem:[#allocation9 + $0x248] sm:$0xf] }
 0x167   : > { %3511 = vmatpush.bf16.msrb.mxu2 %v6761_v8  ;;  %3524 = vmatpush.bf16.msrb.mxu3 %v6889_v13  ;;  %v5916_v8 = vld [vmem:[#allocation9 + $0x188] sm:$0xf]  ;;  %v7815_v13 = vld [vmem:[#allocation9 + $0x294] sm:$0xf0]  ;;  %v5789_v48 = vor.u32 %v7751_v7, %v5788_v2 }
 0x168   : > { %v5917_v17 = vor.u32 %v7783_v11, %v5916_v8  ;;  %v6045_v18 = vor.u32 %v7815_v13, %v6044_v12  ;;  %v5996_v7 = vld [vmem:[#allocation9 + $0x228] sm:$0xf]  ;;  %v7803_v8 = vld [vmem:[#allocation9 + $0x234] sm:$0xf0]  ;;  %v5741_v11 = vor.u32 %v7739_v35, %v5740_v63 }
 0x169   : > { %3486 = vmatpush.bf16.msrb.mxu0 %v6489_v22  ;;  %v3280_v16 = vpop.f32.mrf.mxu0  ;;  %v7747_v22 = vld [vmem:[#allocation9 + $0x74] sm:$0xf0]  ;;  %v5724_v12 = vld [vmem:[#allocation9 + $0x8] sm:$0xf] }
 0x16a   : > { %3499 = vmatpush.bf16.msrb.mxu1 %v6617_v29  ;;  %v3281_v4 = vadd.f32 %v3280_v16, %v1628_v9  ;;  %v3293_v28 = vpop.f32.mrf.mxu1  ;;  %v6173_v29 = vor.u32 %v7847_v15, %v6172_v14  ;;  %v6124_v9 = vld [vmem:[#allocation9 + $0x328] sm:$0xf]  ;;  %v7735_v13 = vld [vmem:[#allocation9 + $0x14] sm:$0xf0]  ;;  %v5997_v15 = vor.u32 %v7803_v8, %v5996_v7 }
 0x16b   : > { %3512 = vmatpush.bf16.msrb.mxu2 %v6745_v30  ;;  %3525 = vmatpush.bf16.msrb.mxu3 %v6873_v33  ;;  %v7779_v30 = vld [vmem:[#allocation9 + $0x174] sm:$0xf0]  ;;  %v6156_v33 = vld [vmem:[#allocation9 + $0x368] sm:$0xf]  ;;  %v5725_v32 = vor.u32 %v7735_v13, %v5724_v12 }
 0x16c   : > { %3487 = vmatmul.bf16.vlgmr.msrb.gmra.mxu0 %v8999_v5  ;;  %v5901_v37 = vor.u32 %v7779_v30, %v5900_v23  ;;  %v7767_v16 = vld [vmem:[#allocation9 + $0x114] sm:$0xf0]  ;;  %v6108_v23 = vld [vmem:[#allocation9 + $0x308] sm:$0xf] }
 0x16d   : > { %3531 = vmatpush.bf16.msra.mxu0 %v5837_v34  ;;  %3500 = vmatmul.bf16.vlgmr.msrb.gmra.mxu1 %v9003_v26  ;;  %v7843_v34 = vld [vmem:[#allocation9 + $0x374] sm:$0xf0]  ;;  %v6332_v51 = vld [vmem:[#allocation9 + $0x4c8] sm:$0xf] }
 0x16e   : > { %3544 = vmatpush.bf16.msra.mxu1 %v5965_v36  ;;  %3513 = vmatmul.bf16.vlgmr.msrb.gmra.mxu2 %v9019_v20  ;;  %v3294_v36 = vadd.f32 %v3293_v28, %v3281_v4  ;;  %v6157_v47 = vor.u32 %v7843_v34, %v6156_v33  ;;  %v7831_v4 = vld [vmem:[#allocation9 + $0x314] sm:$0xf0]  ;;  %v6604_v34 = vld [vmem:[#allocation9 + $0x6e8] sm:$0xf] }
 0x16f   : > { %3557 = vmatpush.bf16.msra.mxu2 %v6093_v19  ;;  %3570 = vmatpush.bf16.msra.mxu3 %v6221_v43  ;;  %v5773_v19 = vor.u32 %v7747_v22, %v5772_v21  ;;  %v7743_v43 = vld [vmem:[#allocation9 + $0x54] sm:$0xf0]  ;;  %v6316_v35 = vld [vmem:[#allocation9 + $0x4a8] sm:$0xf] }
 0x170   : > { %3526 = vmatmul.bf16.vlgmr.msrb.gmra.mxu3 %v9021_v24  ;;  %v5757_v56 = vor.u32 %v7743_v43, %v5756_v40  ;;  %v7799_v22 = vld [vmem:[#allocation9 + $0x214] sm:$0xf0]  ;;  %v6109_v43 = vor.u32 %v7831_v4, %v6108_v23  ;;  %v6572_v7 = vld [vmem:[#allocation9 + $0x6a8] sm:$0xf] }
 0x171   : > { %3532 = vmatpush.bf16.msra.mxu0 %v5821_v50  ;;  %v3306_v46 = vpop.f32.mrf.mxu2  ;;  %v7807_v50 = vld [vmem:[#allocation9 + $0x254] sm:$0xf0] }
 0x172   : > { %3545 = vmatpush.bf16.msra.mxu1 %v5949_v53  ;;  %v3307_v52 = vadd.f32 %v3306_v46, %v3294_v36  ;;  %v6013_v61 = vor.u32 %v7807_v50, %v6012_v49  ;;  %v3295_v2 = vpop.f32.mrf.mxu1  ;;  %v7891_v30 = vld [vmem:[#allocation9 + $0x4f4] sm:$0xf0]  ;;  %v6460_v50 = vld [vmem:[#allocation9 + $0x5c8] sm:$0xf] }
 0x173   : > { %3558 = vmatpush.bf16.msra.mxu2 %v6077_v54  ;;  %3571 = vmatpush.bf16.msra.mxu3 %v6205_v59  ;;  %v3319_v53 = vpop.f32.mrf.mxu3  ;;  %v6140_v54 = vld [vmem:[#allocation9 + $0x348] sm:$0xf]  ;;  %v3282_v59 = vpop.f32.mrf.mxu0  ;;  %v7923_v33 = vld [vmem:[#allocation9 + $0x5f4] sm:$0xf0] }
 0x174   : > { %v9050_v57 = vadd.f32 %v3319_v53, %v3307_v52  ;;  %v7955_v36 = vld [vmem:[#allocation9 + $0x6f4] sm:$0xf0]  ;;  %v6477_v46 = vor.u32 %v7923_v33, %v6476_v31  ;;  %v6444_v2 = vld [vmem:[#allocation9 + $0x5a8] sm:$0xf] }
 0x175   : > { %3533 = vmatpush.bf16.msra.mxu0 %v5805_v0  ;;  %v5868_v0 = vld [vmem:[#allocation9 + $0x128] sm:$0xf]  ;;  %v7987_v40 = vld [vmem:[#allocation9 + $0x7f4] sm:$0xf0] }
 0x176   : > { %3546 = vmatpush.bf16.msra.mxu1 %v5933_v3  ;;  %v6141_v3 = vor.u32 %v7839_v55, %v6140_v54  ;;  %v7887_v49 = vld [vmem:[#allocation9 + $0x4d4] sm:$0xf0]  ;;  %v6588_v54 = vld [vmem:[#allocation9 + $0x6c8] sm:$0xf] }
 0x177   : > { %3559 = vmatpush.bf16.msra.mxu2 %v6061_v6  ;;  %3572 = vmatpush.bf16.msra.mxu3 %v6189_v10  ;;  %v7771_v6 = vld [vmem:[#allocation9 + $0x134] sm:$0xf0]  ;;  %v6284_v31 = vld [vmem:[#allocation9 + $0x468] sm:$0xf] }
 0x178   : > { %v7835_v10 = vld [vmem:[#allocation9 + $0x334] sm:$0xf0]  ;;  %v5869_v14 = vor.u32 %v7771_v6, %v5868_v0  ;;  %v6412_v33 = vld [vmem:[#allocation9 + $0x568] sm:$0xf] }
 0x179   : > { %3534 = vmatpush.bf16.msra.mxu0 %v5789_v48  ;;  %v5852_v48 = vld [vmem:[#allocation9 + $0x108] sm:$0xf]  ;;  %v6125_v21 = vor.u32 %v7835_v10, %v6124_v9  ;;  %v7919_v53 = vld [vmem:[#allocation9 + $0x5d4] sm:$0xf0] }
 0x17a   : > { %3547 = vmatpush.bf16.msra.mxu1 %v5917_v17  ;;  %v5980_v17 = vld [vmem:[#allocation9 + $0x208] sm:$0xf]  ;;  %v7951_v55 = vld [vmem:[#allocation9 + $0x6d4] sm:$0xf0] }
 0x17b   : > { %3560 = vmatpush.bf16.msra.mxu2 %v6045_v18  ;;  %3573 = vmatpush.bf16.msra.mxu3 %v6173_v29  ;;  %v3308_v18 = vpop.f32.mrf.mxu2  ;;  %v3321_v28 = vpop.f32.mrf.mxu3  ;;  %v6348_v29 = vld [vmem:[#allocation9 + $0x4e8] sm:$0xf]  ;;  %v7983_v59 = vld [vmem:[#allocation9 + $0x7d4] sm:$0xf0]  ;;  %v6589_v63 = vor.u32 %v7951_v55, %v6588_v54 }
 0x17c   : > { %v6349_v45 = vor.u32 %v7891_v30, %v6348_v29  ;;  %v7883_v0 = vld [vmem:[#allocation9 + $0x4b4] sm:$0xf0]  ;;  %v6700_v9 = vld [vmem:[#allocation9 + $0x7a8] sm:$0xf] }
 0x17d   : > { %3535 = vmatpush.bf16.msra.mxu0 %v5773_v19  ;;  %v5853_v19 = vor.u32 %v7767_v16, %v5852_v48  ;;  %v7915_v6 = vld [vmem:[#allocation9 + $0x5b4] sm:$0xf0]  ;;  %v6428_v48 = vld [vmem:[#allocation9 + $0x588] sm:$0xf] }
 0x17e   : > { %3548 = vmatpush.bf16.msra.mxu1 %v5901_v37  ;;  %v5981_v37 = vor.u32 %v7799_v22, %v5980_v17  ;;  %v7947_v8 = vld [vmem:[#allocation9 + $0x6b4] sm:$0xf0]  ;;  %v6445_v12 = vor.u32 %v7915_v6, %v6444_v2  ;;  %v6556_v18 = vld [vmem:[#allocation9 + $0x688] sm:$0xf] }
 0x17f   : > { %3561 = vmatpush.bf16.msra.mxu2 %v6029_v39  ;;  %3574 = vmatpush.bf16.msra.mxu3 %v6157_v47  ;;  %v6732_v39 = vld [vmem:[#allocation9 + $0x7e8] sm:$0xf]  ;;  %v6605_v47 = vor.u32 %v7955_v36, %v6604_v34  ;;  %v7979_v10 = vld [vmem:[#allocation9 + $0x7b4] sm:$0xf0]  ;;  %v6573_v13 = vor.u32 %v7947_v8, %v6572_v7 }
 0x180   : > { %v6733_v52 = vor.u32 %v7987_v40, %v6732_v39  ;;  %v6701_v16 = vor.u32 %v7979_v10, %v6700_v9  ;;  %v7911_v17 = vld [vmem:[#allocation9 + $0x594] sm:$0xf0]  ;;  %v6684_v22 = vld [vmem:[#allocation9 + $0x788] sm:$0xf] }
 0x181   : > { %3536 = vmatpush.bf16.msra.mxu0 %v5757_v56  ;;  %v6716_v56 = vld [vmem:[#allocation9 + $0x7c8] sm:$0xf]  ;;  %v7975_v23 = vld [vmem:[#allocation9 + $0x794] sm:$0xf0]  ;;  %v6429_v29 = vor.u32 %v7911_v17, %v6428_v48 }
 0x182   : > { %3549 = vmatpush.bf16.msra.mxu1 %v5885_v60  ;;  %v6333_v60 = vor.u32 %v7887_v49, %v6332_v51  ;;  %v6540_v39 = vld [vmem:[#allocation9 + $0x668] sm:$0xf]  ;;  %v7939_v40 = vld [vmem:[#allocation9 + $0x674] sm:$0xf0] }
 0x183   : > { %3562 = vmatpush.bf16.msra.mxu2 %v6013_v61  ;;  %3575 = vmatpush.bf16.msra.mxu3 %v6141_v3  ;;  %v6461_v61 = vor.u32 %v7919_v53, %v6460_v50  ;;  %v6717_v3 = vor.u32 %v7983_v59, %v6716_v56  ;;  %v6541_v49 = vor.u32 %v7939_v40, %v6540_v39  ;;  %v6268_v50 = vld [vmem:[#allocation9 + $0x448] sm:$0xf]  ;;  %v7903_v55 = vld [vmem:[#allocation9 + $0x554] sm:$0xf0] }
 0x184   : > { %v6396_v53 = vld [vmem:[#allocation9 + $0x548] sm:$0xf]  ;;  %v7935_v59 = vld [vmem:[#allocation9 + $0x654] sm:$0xf0] }
 0x185   : > { %3537 = vmatpush.bf16.msra.mxu0 %v5741_v11  ;;  %v6317_v11 = vor.u32 %v7883_v0, %v6316_v35  ;;  %v6524_v56 = vld [vmem:[#allocation9 + $0x648] sm:$0xf]  ;;  %v7967_v35 = vld [vmem:[#allocation9 + $0x754] sm:$0xf0]  ;;  %v6397_v6 = vor.u32 %v7903_v55, %v6396_v53 }
 0x186   : > { %3550 = vmatpush.bf16.msra.mxu1 %v5869_v14  ;;  %v6300_v14 = vld [vmem:[#allocation9 + $0x488] sm:$0xf]  ;;  %v6525_v7 = vor.u32 %v7935_v59, %v6524_v56  ;;  %v7867_v9 = vld [vmem:[#allocation9 + $0x434] sm:$0xf0] }
 0x187   : > { %3563 = vmatpush.bf16.msra.mxu2 %v5997_v15  ;;  %3576 = vmatpush.bf16.msra.mxu3 %v6125_v21  ;;  %v7879_v15 = vld [vmem:[#allocation9 + $0x494] sm:$0xf0]  ;;  %v6252_v8 = vld [vmem:[#allocation9 + $0x428] sm:$0xf] }
 0x188   : > { %v7943_v21 = vld [vmem:[#allocation9 + $0x694] sm:$0xf0]  ;;  %v6301_v4 = vor.u32 %v7879_v15, %v6300_v14  ;;  %v6380_v10 = vld [vmem:[#allocation9 + $0x528] sm:$0xf]  ;;  %v6253_v17 = vor.u32 %v7867_v9, %v6252_v8 }
 0x189   : > { %3538 = vmatpush.bf16.msra.mxu0 %v5725_v32  ;;  %v3332_v28 = vpop.f32.mrf.mxu0  ;;  %v6557_v30 = vor.u32 %v7943_v21, %v6556_v18  ;;  %v7875_v32 = vld [vmem:[#allocation9 + $0x474] sm:$0xf0]  ;;  %v6508_v14 = vld [vmem:[#allocation9 + $0x628] sm:$0xf] }
 0x18a   : > { %3551 = vmatpush.bf16.msra.mxu1 %v5853_v19  ;;  %v3333_v34 = vadd.f32 %v3332_v28, %v9050_v57  ;;  %v3345_v36 = vpop.f32.mrf.mxu1  ;;  %v6685_v19 = vor.u32 %v7975_v23, %v6684_v22  ;;  %v7931_v15 = vld [vmem:[#allocation9 + $0x634] sm:$0xf0]  ;;  %v6636_v48 = vld [vmem:[#allocation9 + $0x728] sm:$0xf] }
 0x18b   : > { %3564 = vmatpush.bf16.msra.mxu2 %v5981_v37  ;;  %3577 = vmatpush.bf16.msra.mxu3 %v6109_v43  ;;  %v7907_v37 = vld [vmem:[#allocation9 + $0x574] sm:$0xf0]  ;;  %v6668_v43 = vld [vmem:[#allocation9 + $0x768] sm:$0xf]  ;;  %v6509_v23 = vor.u32 %v7931_v15, %v6508_v14  ;;  %v7753_v14 = vld [vmem:[#allocation9 + $0xac] sm:$0xf] }
 0x18c   : > { %3539 = vmatmul.bf16.vlgmr.msra.gmra.mxu0 %v8987_v41  ;;  %v6413_v51 = vor.u32 %v7907_v37, %v6412_v33  ;;  %v6236_v18 = vld [vmem:[#allocation9 + $0x408] sm:$0xf]  ;;  %v7863_v21 = vld [vmem:[#allocation9 + $0x414] sm:$0xf0]  ;;  %v5806_v15 = vld [vmem:[#allocation9 + $0xb8] sm:$0xf0] }
 0x18d   : > { %3583 = vmatpush.bf16.msrb.mxu0 %v6349_v45  ;;  %3552 = vmatmul.bf16.vlgmr.msra.gmra.mxu1 %v8991_v44  ;;  %v7971_v45 = vld [vmem:[#allocation9 + $0x774] sm:$0xf0]  ;;  %v6620_v33 = vld [vmem:[#allocation9 + $0x708] sm:$0xf]  ;;  %v6237_v40 = vor.u32 %v7863_v21, %v6236_v18  ;;  %v5809_v21 = vor.u32 %v7753_v14, %v5806_v15 }
 0x18e   : > { %3596 = vmatpush.bf16.msrb.mxu1 %v6477_v46  ;;  %3565 = vmatmul.bf16.vlgmr.msra.gmra.mxu2 %v8985_v38  ;;  %v3346_v46 = vadd.f32 %v3345_v36, %v3333_v34  ;;  %v6669_v57 = vor.u32 %v7971_v45, %v6668_v43  ;;  %v7895_v28 = vld [vmem:[#allocation9 + $0x514] sm:$0xf0]  ;;  %v6988_v39 = vld [vmem:[#allocation9 + $0x9e8] sm:$0xf]  ;;  %v7761_v45 = vld [vmem:[#allocation9 + $0xec] sm:$0xf] }
 0x18f   : > { %3609 = vmatpush.bf16.msrb.mxu2 %v6605_v47  ;;  %3622 = vmatpush.bf16.msrb.mxu3 %v6733_v52  ;;  %v6285_v47 = vor.u32 %v7875_v32, %v6284_v31  ;;  %v7871_v52 = vld [vmem:[#allocation9 + $0x454] sm:$0xf0]  ;;  %v6844_v55 = vld [vmem:[#allocation9 + $0x8c8] sm:$0xf] }
 0x190   : > { %3578 = vmatmul.bf16.vlgmr.msra.gmra.mxu3 %v8989_v42  ;;  %v6269_v0 = vor.u32 %v7871_v52, %v6268_v50  ;;  %v7927_v32 = vld [vmem:[#allocation9 + $0x614] sm:$0xf0]  ;;  %v5966_v50 = vld [vmem:[#allocation9 + $0x1f8] sm:$0xf0]  ;;  %v6972_v59 = vld [vmem:[#allocation9 + $0x9c8] sm:$0xf] }
 0x191   : > { %3584 = vmatpush.bf16.msrb.mxu0 %v6333_v60  ;;  %v3358_v54 = vpop.f32.mrf.mxu2  ;;  %v7959_v34 = vld [vmem:[#allocation9 + $0x714] sm:$0xf0]  ;;  %v6828_v9 = vld [vmem:[#allocation9 + $0x8a8] sm:$0xf] }
 0x192   : > { %3597 = vmatpush.bf16.msrb.mxu1 %v6461_v61  ;;  %v3359_v60 = vadd.f32 %v3358_v54, %v3346_v46  ;;  %v8019_v37 = vld [vmem:[#allocation9 + $0x8f4] sm:$0xf0]  ;;  %v5838_v46 = vld [vmem:[#allocation9 + $0xf8] sm:$0xf0]  ;;  %v6621_v52 = vor.u32 %v7959_v34, %v6620_v33  ;;  %v7781_v33 = vld [vmem:[#allocation9 + $0x18c] sm:$0xf] }
 0x193   : > { %3610 = vmatpush.bf16.msrb.mxu2 %v6589_v63  ;;  %3623 = vmatpush.bf16.msrb.mxu3 %v6717_v3  ;;  %v3371_v61 = vpop.f32.mrf.mxu3  ;;  %v6652_v63 = vld [vmem:[#allocation9 + $0x748] sm:$0xf]  ;;  %v3334_v3 = vpop.f32.mrf.mxu0  ;;  %v8051_v43 = vld [vmem:[#allocation9 + $0x9f4] sm:$0xf0]  ;;  %v5918_v34 = vld [vmem:[#allocation9 + $0x198] sm:$0xf0] }
 0x194   : > { %v9057_v2 = vadd.f32 %v3371_v61, %v3359_v60  ;;  %v6989_v54 = vor.u32 %v8051_v43, %v6988_v39  ;;  %v8015_v56 = vld [vmem:[#allocation9 + $0x8d4] sm:$0xf0]  ;;  %v5950_v3 = vld [vmem:[#allocation9 + $0x1d8] sm:$0xf0]  ;;  %v6796_v43 = vld [vmem:[#allocation9 + $0x868] sm:$0xf] }
 0x195   : > { %3585 = vmatpush.bf16.msrb.mxu0 %v6317_v11  ;;  %v3347_v11 = vpop.f32.mrf.mxu1  ;;  %v8047_v61 = vld [vmem:[#allocation9 + $0x9d4] sm:$0xf0]  ;;  %v6764_v15 = vld [vmem:[#allocation9 + $0x828] sm:$0xf] }
 0x196   : > { %3598 = vmatpush.bf16.msrb.mxu1 %v6445_v12  ;;  %v6653_v12 = vor.u32 %v7967_v35, %v6652_v63  ;;  %v7757_v63 = vld [vmem:[#allocation9 + $0xcc] sm:$0xf]  ;;  %v5822_v35 = vld [vmem:[#allocation9 + $0xd8] sm:$0xf0]  ;;  %v6956_v11 = vld [vmem:[#allocation9 + $0x9a8] sm:$0xf] }
 0x197   : > { %3611 = vmatpush.bf16.msrb.mxu2 %v6573_v13  ;;  %3624 = vmatpush.bf16.msrb.mxu3 %v6701_v16  ;;  %v7899_v13 = vld [vmem:[#allocation9 + $0x534] sm:$0xf0]  ;;  %v5825_v8 = vor.u32 %v7757_v63, %v5822_v35 }
 0x198   : > { %v7963_v16 = vld [vmem:[#allocation9 + $0x734] sm:$0xf0]  ;;  %v6381_v22 = vor.u32 %v7899_v13, %v6380_v10 }
 0x199   : > { %3586 = vmatpush.bf16.msrb.mxu0 %v6301_v4  ;;  %v6364_v4 = vld [vmem:[#allocation9 + $0x508] sm:$0xf]  ;;  %v6637_v31 = vor.u32 %v7963_v16, %v6636_v48  ;;  %v8011_v10 = vld [vmem:[#allocation9 + $0x8b4] sm:$0xf0]  ;;  %v7785_v48 = vld [vmem:[#allocation9 + $0x1ac] sm:$0xf] }
 0x19a   : > { %3599 = vmatpush.bf16.msrb.mxu1 %v6429_v29  ;;  %v6492_v29 = vld [vmem:[#allocation9 + $0x608] sm:$0xf]  ;;  %v8043_v13 = vld [vmem:[#allocation9 + $0x9b4] sm:$0xf0]  ;;  %v5934_v16 = vld [vmem:[#allocation9 + $0x1b8] sm:$0xf0] }
 0x19b   : > { %3612 = vmatpush.bf16.msrb.mxu2 %v6557_v30  ;;  %3625 = vmatpush.bf16.msrb.mxu3 %v6685_v19  ;;  %v3360_v30 = vpop.f32.mrf.mxu2  ;;  %v3373_v36 = vpop.f32.mrf.mxu3  ;;  %v6860_v19 = vld [vmem:[#allocation9 + $0x8e8] sm:$0xf]  ;;  %v6957_v18 = vor.u32 %v8043_v13, %v6956_v11  ;;  %v8031_v35 = vld [vmem:[#allocation9 + $0x954] sm:$0xf0] }
 0x19c   : > { %v6861_v53 = vor.u32 %v8019_v37, %v6860_v19  ;;  %v7749_v30 = vld [vmem:[#allocation9 + $0x8c] sm:$0xf] }
 0x19d   : > { %3587 = vmatpush.bf16.msrb.mxu0 %v6285_v47  ;;  %v6365_v47 = vor.u32 %v7895_v28, %v6364_v4  ;;  %v6940_v4 = vld [vmem:[#allocation9 + $0x988] sm:$0xf]  ;;  %v5937_v28 = vor.u32 %v7785_v48, %v5934_v16  ;;  %v7995_v48 = vld [vmem:[#allocation9 + $0x834] sm:$0xf0] }
 0x19e   : > { %3600 = vmatpush.bf16.msrb.mxu1 %v6413_v51  ;;  %v6493_v51 = vor.u32 %v7927_v32, %v6492_v29  ;;  %v8039_v29 = vld [vmem:[#allocation9 + $0x994] sm:$0xf0]  ;;  %v6892_v16 = vld [vmem:[#allocation9 + $0x928] sm:$0xf] }
 0x19f   : > { %3613 = vmatpush.bf16.msrb.mxu2 %v6541_v49  ;;  %3626 = vmatpush.bf16.msrb.mxu3 %v6669_v57  ;;  %v7793_v49 = vld [vmem:[#allocation9 + $0x1ec] sm:$0xf]  ;;  %v5841_v57 = vor.u32 %v7761_v45, %v5838_v46  ;;  %v6941_v39 = vor.u32 %v8039_v29, %v6940_v4  ;;  %v8003_v45 = vld [vmem:[#allocation9 + $0x874] sm:$0xf0]  ;;  %v6924_v46 = vld [vmem:[#allocation9 + $0x968] sm:$0xf]  ;;  %v6765_v29 = vor.u32 %v7995_v48, %v6764_v15 }
 0x1a0   : > { %v5969_v60 = vor.u32 %v7793_v49, %v5966_v50  ;;  %v8035_v49 = vld [vmem:[#allocation9 + $0x974] sm:$0xf0]  ;;  %v7745_v50 = vld [vmem:[#allocation9 + $0x6c] sm:$0xf]  ;;  %v6062_v48 = vld [vmem:[#allocation9 + $0x2b8] sm:$0xf0] }
 0x1a1   : > { %3588 = vmatpush.bf16.msrb.mxu0 %v6269_v0  ;;  %v7789_v0 = vld [vmem:[#allocation9 + $0x1cc] sm:$0xf] }
 0x1a2   : > { %3601 = vmatpush.bf16.msrb.mxu1 %v6397_v6  ;;  %v6845_v6 = vor.u32 %v8015_v56, %v6844_v55  ;;  %v6925_v55 = vor.u32 %v8035_v49, %v6924_v46  ;;  %v7769_v4 = vld [vmem:[#allocation9 + $0x12c] sm:$0xf] }
 0x1a3   : > { %3614 = vmatpush.bf16.msrb.mxu2 %v6525_v7  ;;  %3627 = vmatpush.bf16.msrb.mxu3 %v6653_v12  ;;  %v6973_v7 = vor.u32 %v8047_v61, %v6972_v59  ;;  %v5953_v12 = vor.u32 %v7789_v0, %v5950_v3  ;;  %v6780_v59 = vld [vmem:[#allocation9 + $0x848] sm:$0xf]  ;;  %v7741_v0 = vld [vmem:[#allocation9 + $0x4c] sm:$0xf]  ;;  %v5758_v3 = vld [vmem:[#allocation9 + $0x58] sm:$0xf0] }
 0x1a4   : > { %v6908_v61 = vld [vmem:[#allocation9 + $0x948] sm:$0xf]  ;;  %v5761_v14 = vor.u32 %v7741_v0, %v5758_v3  ;;  %v7825_v46 = vld [vmem:[#allocation9 + $0x2ec] sm:$0xf]  ;;  %v6078_v3 = vld [vmem:[#allocation9 + $0x2d8] sm:$0xf0] }
 0x1a5   : > { %3589 = vmatpush.bf16.msrb.mxu0 %v6253_v17  ;;  %v6829_v17 = vor.u32 %v8011_v10, %v6828_v9  ;;  %v6909_v13 = vor.u32 %v8031_v35, %v6908_v61  ;;  %v7857_v49 = vld [vmem:[#allocation9 + $0x3ec] sm:$0xf] }
 0x1a6   : > { %3602 = vmatpush.bf16.msrb.mxu1 %v6381_v22  ;;  %v6812_v22 = vld [vmem:[#allocation9 + $0x888] sm:$0xf]  ;;  %v7821_v0 = vld [vmem:[#allocation9 + $0x2cc] sm:$0xf] }
 0x1a7   : > { %3615 = vmatpush.bf16.msrb.mxu2 %v6509_v23  ;;  %3628 = vmatpush.bf16.msrb.mxu3 %v6637_v31  ;;  %v8007_v23 = vld [vmem:[#allocation9 + $0x894] sm:$0xf0]  ;;  %v5790_v31 = vld [vmem:[#allocation9 + $0x98] sm:$0xf0]  ;;  %v7817_v15 = vld [vmem:[#allocation9 + $0x2ac] sm:$0xf] }
 0x1a8   : > { %v6813_v19 = vor.u32 %v8007_v23, %v6812_v22  ;;  %v7737_v22 = vld [vmem:[#allocation9 + $0x2c] sm:$0xf]  ;;  %v5742_v23 = vld [vmem:[#allocation9 + $0x38] sm:$0xf0] }
 0x1a9   : > { %3590 = vmatpush.bf16.msrb.mxu0 %v6237_v40  ;;  %v3384_v32 = vpop.f32.mrf.mxu0  ;;  %v5793_v40 = vor.u32 %v7749_v30, %v5790_v31  ;;  %v6748_v30 = vld [vmem:[#allocation9 + $0x808] sm:$0xf]  ;;  %v7991_v31 = vld [vmem:[#allocation9 + $0x814] sm:$0xf0] }
 0x1aa   : > { %3603 = vmatpush.bf16.msrb.mxu1 %v6365_v47  ;;  %v3385_v36 = vadd.f32 %v3384_v32, %v9057_v2  ;;  %v3397_v37 = vpop.f32.mrf.mxu1  ;;  %v5921_v47 = vor.u32 %v7781_v33, %v5918_v34  ;;  %v1629_v2 = vperm.slane %v9044_v62, 1  ;;  %v5745_v33 = vor.u32 %v7737_v22, %v5742_v23  ;;  %v6876_v34 = vld [vmem:[#allocation9 + $0x908] sm:$0xf]  ;;  %v7881_v22 = vld [vmem:[#allocation9 + $0x4ac] sm:$0xf] }
 0x1ab   : > { %3616 = vmatpush.bf16.msrb.mxu2 %v6493_v51  ;;  %3629 = vmatpush.bf16.msrb.mxu3 %v6621_v52  ;;  %v5774_v52 = vld [vmem:[#allocation9 + $0x78] sm:$0xf0] }
 0x1ac   : > { %3591 = vmatmul.bf16.vlgmr.msrb.gmra.mxu0 %v9001_v25  ;;  %v9064_v51 = vadd.f32 %v3397_v37, %v3385_v36  ;;  %v5777_v56 = vor.u32 %v7745_v50, %v5774_v52  ;;  %v8023_v36 = vld [vmem:[#allocation9 + $0x914] sm:$0xf0]  ;;  %v6749_v52 = vor.u32 %v7991_v31, %v6748_v30  ;;  %v6318_v23 = vld [vmem:[#allocation9 + $0x4b8] sm:$0xf0] }
 0x1ad   : > { %3635 = vmatpush.bf16.msra.mxu0 %v6861_v53  ;;  %3604 = vmatmul.bf16.vlgmr.msrb.gmra.mxu1 %v9005_v27  ;;  %v7777_v53 = vld [vmem:[#allocation9 + $0x16c] sm:$0xf]  ;;  %v6321_v31 = vor.u32 %v7881_v22, %v6318_v23  ;;  %v6126_v23 = vld [vmem:[#allocation9 + $0x338] sm:$0xf0] }
 0x1ae   : > { %3648 = vmatpush.bf16.msra.mxu1 %v6989_v54  ;;  %3617 = vmatmul.bf16.vlgmr.msrb.gmra.mxu2 %v8999_v5  ;;  %v5902_v54 = vld [vmem:[#allocation9 + $0x178] sm:$0xf0] }
 0x1af   : > { %3661 = vmatpush.bf16.msra.mxu2 %v5841_v57  ;;  %3674 = vmatpush.bf16.msra.mxu3 %v5969_v60  ;;  %v6797_v57 = vor.u32 %v8003_v45, %v6796_v43  ;;  %v7999_v60 = vld [vmem:[#allocation9 + $0x854] sm:$0xf0]  ;;  %v5905_v63 = vor.u32 %v7777_v53, %v5902_v54  ;;  %v5854_v43 = vld [vmem:[#allocation9 + $0x118] sm:$0xf0]  ;;  %v7889_v54 = vld [vmem:[#allocation9 + $0x4ec] sm:$0xf] }
 0x1b0   : > { %3630 = vmatmul.bf16.vlgmr.msrb.gmra.mxu3 %v9003_v26  ;;  %v6781_v11 = vor.u32 %v7999_v60, %v6780_v59  ;;  %v6222_v53 = vld [vmem:[#allocation9 + $0x3f8] sm:$0xf0] }
 0x1b1   : > { %3636 = vmatpush.bf16.msra.mxu0 %v6845_v6  ;;  %v3410_v6 = vpop.f32.mrf.mxu2  ;;  %v3386_v62 = vpop.f32.mrf.mxu0  ;;  %v6478_v59 = vld [vmem:[#allocation9 + $0x5f8] sm:$0xf0] }
 0x1b2   : > { %3649 = vmatpush.bf16.msra.mxu1 %v6973_v7  ;;  %v7773_v7 = vld [vmem:[#allocation9 + $0x14c] sm:$0xf]  ;;  %v3411_v9 = vadd.f32 %v3410_v6, %v1629_v2  ;;  %v6350_v2 = vld [vmem:[#allocation9 + $0x4f8] sm:$0xf0] }
 0x1b3   : > { %3662 = vmatpush.bf16.msra.mxu2 %v5825_v8  ;;  %3675 = vmatpush.bf16.msra.mxu3 %v5953_v12  ;;  %v5886_v8 = vld [vmem:[#allocation9 + $0x158] sm:$0xf0]  ;;  %v3423_v10 = vpop.f32.mrf.mxu3  ;;  %v3399_v12 = vpop.f32.mrf.mxu1  ;;  %v6353_v35 = vor.u32 %v7889_v54, %v6350_v2  ;;  %v7853_v6 = vld [vmem:[#allocation9 + $0x3cc] sm:$0xf] }
 0x1b4   : > { %v7917_v62 = vld [vmem:[#allocation9 + $0x5cc] sm:$0xf]  ;;  %v6081_v12 = vor.u32 %v7821_v0, %v6078_v3  ;;  %v6158_v54 = vld [vmem:[#allocation9 + $0x378] sm:$0xf0] }
 0x1b5   : > { %3637 = vmatpush.bf16.msra.mxu0 %v6829_v17  ;;  %v9067_v17 = vadd.f32 %v3423_v10, %v3411_v9  ;;  %v7885_v9 = vld [vmem:[#allocation9 + $0x4cc] sm:$0xf]  ;;  %v6334_v10 = vld [vmem:[#allocation9 + $0x4d8] sm:$0xf0] }
 0x1b6   : > { %3650 = vmatpush.bf16.msra.mxu1 %v6957_v18  ;;  %v5889_v18 = vor.u32 %v7773_v7, %v5886_v8  ;;  %v6206_v8 = vld [vmem:[#allocation9 + $0x3d8] sm:$0xf0]  ;;  %v7873_v2 = vld [vmem:[#allocation9 + $0x46c] sm:$0xf] }
 0x1b7   : > { %3663 = vmatpush.bf16.msra.mxu2 %v5809_v21  ;;  %3676 = vmatpush.bf16.msra.mxu3 %v5937_v28  ;;  %v8027_v21 = vld [vmem:[#allocation9 + $0x934] sm:$0xf0]  ;;  %v5870_v28 = vld [vmem:[#allocation9 + $0x138] sm:$0xf0]  ;;  %v7837_v0 = vld [vmem:[#allocation9 + $0x34c] sm:$0xf] }
 0x1b8   : > { %v6893_v32 = vor.u32 %v8027_v21, %v6892_v16  ;;  %v5873_v37 = vor.u32 %v7769_v4, %v5870_v28  ;;  %v7849_v16 = vld [vmem:[#allocation9 + $0x3ac] sm:$0xf]  ;;  %v6190_v21 = vld [vmem:[#allocation9 + $0x3b8] sm:$0xf0] }
 0x1b9   : > { %3638 = vmatpush.bf16.msra.mxu0 %v6813_v19  ;;  %v7733_v19 = vld [vmem:[#allocation9 + $0xc] sm:$0xf]  ;;  %v3412_v45 = vpop.f32.mrf.mxu2  ;;  %v6446_v28 = vld [vmem:[#allocation9 + $0x5b8] sm:$0xf0]  ;;  %v6193_v30 = vor.u32 %v7849_v16, %v6190_v21 }
 0x1ba   : > { %3651 = vmatpush.bf16.msra.mxu1 %v6941_v39  ;;  %v5726_v39 = vld [vmem:[#allocation9 + $0x18] sm:$0xf0]  ;;  %v7913_v4 = vld [vmem:[#allocation9 + $0x5ac] sm:$0xf] }
 0x1bb   : > { %3664 = vmatpush.bf16.msra.mxu2 %v5793_v40  ;;  %3677 = vmatpush.bf16.msra.mxu3 %v5921_v47  ;;  %v7765_v40 = vld [vmem:[#allocation9 + $0x10c] sm:$0xf]  ;;  %v6094_v47 = vld [vmem:[#allocation9 + $0x2f8] sm:$0xf0]  ;;  %v3425_v50 = vpop.f32.mrf.mxu3 }
 0x1bc   : > { %v5857_v60 = vor.u32 %v7765_v40, %v5854_v43  ;;  %v6097_v61 = vor.u32 %v7825_v46, %v6094_v47  ;;  %v7909_v40 = vld [vmem:[#allocation9 + $0x58c] sm:$0xf]  ;;  %v6430_v43 = vld [vmem:[#allocation9 + $0x598] sm:$0xf0] }
 0x1bd   : > { %3639 = vmatpush.bf16.msra.mxu0 %v6797_v57  ;;  %v6877_v57 = vor.u32 %v8023_v36, %v6876_v34  ;;  %v7845_v34 = vld [vmem:[#allocation9 + $0x38c] sm:$0xf]  ;;  %v6449_v36 = vor.u32 %v7913_v4, %v6446_v28  ;;  %v5998_v16 = vld [vmem:[#allocation9 + $0x238] sm:$0xf0] }
 0x1be   : > { %3652 = vmatpush.bf16.msra.mxu1 %v6925_v55  ;;  %v5729_v55 = vor.u32 %v7733_v19, %v5726_v39  ;;  %v6174_v19 = vld [vmem:[#allocation9 + $0x398] sm:$0xf0]  ;;  %v7809_v47 = vld [vmem:[#allocation9 + $0x26c] sm:$0xf] }
 0x1bf   : > { %3665 = vmatpush.bf16.msra.mxu2 %v5777_v56  ;;  %3678 = vmatpush.bf16.msra.mxu3 %v5905_v63  ;;  %v7921_v56 = vld [vmem:[#allocation9 + $0x5ec] sm:$0xf]  ;;  %v6225_v63 = vor.u32 %v7857_v49, %v6222_v53  ;;  %v6302_v39 = vld [vmem:[#allocation9 + $0x498] sm:$0xf0]  ;;  %v6433_v53 = vor.u32 %v7909_v40, %v6430_v43 }
 0x1c0   : > { %v6481_v7 = vor.u32 %v7921_v56, %v6478_v59  ;;  %v6030_v49 = vld [vmem:[#allocation9 + $0x278] sm:$0xf0]  ;;  %v7841_v50 = vld [vmem:[#allocation9 + $0x36c] sm:$0xf] }
 0x1c1   : > { %3640 = vmatpush.bf16.msra.mxu0 %v6781_v11  ;;  %v6462_v11 = vld [vmem:[#allocation9 + $0x5d8] sm:$0xf0]  ;;  %v6033_v59 = vor.u32 %v7809_v47, %v6030_v49  ;;  %v7865_v4 = vld [vmem:[#allocation9 + $0x42c] sm:$0xf] }
 0x1c2   : > { %3653 = vmatpush.bf16.msra.mxu1 %v6909_v13  ;;  %v6209_v13 = vor.u32 %v7853_v6, %v6206_v8  ;;  %v6414_v56 = vld [vmem:[#allocation9 + $0x578] sm:$0xf0]  ;;  %v7869_v8 = vld [vmem:[#allocation9 + $0x44c] sm:$0xf] }
 0x1c3   : > { %3666 = vmatpush.bf16.msra.mxu2 %v5761_v14  ;;  %3679 = vmatpush.bf16.msra.mxu3 %v5889_v18  ;;  %v6337_v14 = vor.u32 %v7885_v9, %v6334_v10  ;;  %v6465_v18 = vor.u32 %v7917_v62, %v6462_v11  ;;  %v6270_v9 = vld [vmem:[#allocation9 + $0x458] sm:$0xf0]  ;;  %v7901_v62 = vld [vmem:[#allocation9 + $0x54c] sm:$0xf] }
 0x1c4   : > { %v6398_v11 = vld [vmem:[#allocation9 + $0x558] sm:$0xf0]  ;;  %v7953_v49 = vld [vmem:[#allocation9 + $0x6ec] sm:$0xf] }
 0x1c5   : > { %3641 = vmatpush.bf16.msra.mxu0 %v6765_v29  ;;  %v6065_v29 = vor.u32 %v7817_v15, %v6062_v48  ;;  %v6273_v15 = vor.u32 %v7869_v8, %v6270_v9  ;;  %v7801_v48 = vld [vmem:[#allocation9 + $0x22c] sm:$0xf]  ;;  %v6401_v22 = vor.u32 %v7901_v62, %v6398_v11  ;;  %v6254_v28 = vld [vmem:[#allocation9 + $0x438] sm:$0xf0] }
 0x1c6   : > { %3654 = vmatpush.bf16.msra.mxu1 %v6893_v32  ;;  %v7813_v32 = vld [vmem:[#allocation9 + $0x28c] sm:$0xf]  ;;  %v6590_v9 = vld [vmem:[#allocation9 + $0x6d8] sm:$0xf0] }
 0x1c7   : > { %3667 = vmatpush.bf16.msra.mxu2 %v5745_v33  ;;  %3680 = vmatpush.bf16.msra.mxu3 %v5873_v37  ;;  %v6046_v33 = vld [vmem:[#allocation9 + $0x298] sm:$0xf0]  ;;  %v7877_v37 = vld [vmem:[#allocation9 + $0x48c] sm:$0xf] }
 0x1c8   : > { %v6305_v46 = vor.u32 %v7877_v37, %v6302_v39  ;;  %v6110_v37 = vld [vmem:[#allocation9 + $0x318] sm:$0xf0]  ;;  %v7861_v39 = vld [vmem:[#allocation9 + $0x40c] sm:$0xf] }
 0x1c9   : > { %3642 = vmatpush.bf16.msra.mxu0 %v6749_v52  ;;  %v9073_v45 = vpop.f32.mrf.mxu0  ;;  %v7949_v8 = vld [vmem:[#allocation9 + $0x6cc] sm:$0xf] }
 0x1ca   : > { %3655 = vmatpush.bf16.msra.mxu1 %v6877_v57  ;;  %v9075_v52 = vpop.f32.mrf.mxu1  ;;  %v6286_v57 = vld [vmem:[#allocation9 + $0x478] sm:$0xf0]  ;;  %v7981_v62 = vld [vmem:[#allocation9 + $0x7cc] sm:$0xf] }
 0x1cb   : > { %3668 = vmatpush.bf16.msra.mxu2 %v5729_v55  ;;  %3681 = vmatpush.bf16.msra.mxu3 %v5857_v60  ;;  %v7905_v55 = vld [vmem:[#allocation9 + $0x56c] sm:$0xf]  ;;  %v6161_v60 = vor.u32 %v7841_v50, %v6158_v54  ;;  %v6606_v50 = vld [vmem:[#allocation9 + $0x6f8] sm:$0xf0] }
 0x1cc   : > { %3643 = vmatmul.bf16.vlgmr.msra.gmra.mxu0 %v9019_v20  ;;  %v6417_v6 = vor.u32 %v7905_v55, %v6414_v56  ;;  %v6862_v55 = vld [vmem:[#allocation9 + $0x8f8] sm:$0xf0]  ;;  %v3437_v56 = vadd.f32 %v9073_v45, %v9067_v17  ;;  %v8045_v45 = vld [vmem:[#allocation9 + $0x9cc] sm:$0xf] }
 0x1cd   : > { %3687 = vmatpush.bf16.msrb.mxu0 %v6097_v61  ;;  %3656 = vmatmul.bf16.vlgmr.msra.gmra.mxu1 %v9021_v24  ;;  %v6289_v61 = vor.u32 %v7873_v2, %v6286_v57  ;;  %v6734_v2 = vld [vmem:[#allocation9 + $0x7f8] sm:$0xf0]  ;;  %v8017_v57 = vld [vmem:[#allocation9 + $0x8ec] sm:$0xf] }
 0x1ce   : > { %3700 = vmatpush.bf16.msrb.mxu1 %v6225_v63  ;;  %3669 = vmatmul.bf16.vlgmr.msra.gmra.mxu2 %v8987_v41  ;;  %v6049_v41 = vor.u32 %v7813_v32, %v6046_v33  ;;  %v7805_v63 = vld [vmem:[#allocation9 + $0x24c] sm:$0xf]  ;;  %v5982_v33 = vld [vmem:[#allocation9 + $0x218] sm:$0xf0]  ;;  %v3450_v17 = vadd.f32 %v9075_v52, %v3437_v56 }
 0x1cf   : > { %3713 = vmatpush.bf16.msrb.mxu2 %v6353_v35  ;;  %3726 = vmatpush.bf16.msrb.mxu3 %v6481_v7  ;;  %v6014_v35 = vld [vmem:[#allocation9 + $0x258] sm:$0xf0]  ;;  %v7797_v32 = vld [vmem:[#allocation9 + $0x20c] sm:$0xf] }
 0x1d0   : > { %3682 = vmatmul.bf16.vlgmr.msra.gmra.mxu3 %v8991_v44  ;;  %v6177_v44 = vor.u32 %v7845_v34, %v6174_v19  ;;  %v6142_v7 = vld [vmem:[#allocation9 + $0x358] sm:$0xf0]  ;;  %v7829_v19 = vld [vmem:[#allocation9 + $0x30c] sm:$0xf]  ;;  %v5985_v54 = vor.u32 %v7797_v32, %v5982_v33 }
 0x1d1   : > { %3688 = vmatpush.bf16.msrb.mxu0 %v6081_v12  ;;  %v9077_v3 = vpop.f32.mrf.mxu2  ;;  %v6017_v12 = vor.u32 %v7805_v63, %v6014_v35  ;;  %v6990_v63 = vld [vmem:[#allocation9 + $0x9f8] sm:$0xf0]  ;;  %v8009_v52 = vld [vmem:[#allocation9 + $0x8ac] sm:$0xf] }
 0x1d2   : > { %3701 = vmatpush.bf16.msrb.mxu1 %v6209_v13  ;;  %v3438_v13 = vpop.f32.mrf.mxu0  ;;  %v3451_v21 = vpop.f32.mrf.mxu1  ;;  %v6958_v32 = vld [vmem:[#allocation9 + $0x9b8] sm:$0xf0]  ;;  %v8001_v56 = vld [vmem:[#allocation9 + $0x86c] sm:$0xf] }
 0x1d3   : > { %3714 = vmatpush.bf16.msrb.mxu2 %v6337_v14  ;;  %3727 = vmatpush.bf16.msrb.mxu3 %v6465_v18  ;;  %v9079_v10 = vpop.f32.mrf.mxu3  ;;  %v6145_v14 = vor.u32 %v7837_v0, %v6142_v7  ;;  %v7833_v18 = vld [vmem:[#allocation9 + $0x32c] sm:$0xf]  ;;  %v6609_v0 = vor.u32 %v7953_v49, %v6606_v50  ;;  %v6865_v7 = vor.u32 %v8017_v57, %v6862_v55  ;;  %v6670_v55 = vld [vmem:[#allocation9 + $0x778] sm:$0xf0] }
 0x1d4   : > { %v6129_v34 = vor.u32 %v7833_v18, %v6126_v23  ;;  %v8013_v13 = vld [vmem:[#allocation9 + $0x8cc] sm:$0xf] }
 0x1d5   : > { %3689 = vmatpush.bf16.msrb.mxu0 %v6065_v29  ;;  %v7897_v29 = vld [vmem:[#allocation9 + $0x52c] sm:$0xf] }
 0x1d6   : > { %3702 = vmatpush.bf16.msrb.mxu1 %v6193_v30  ;;  %v6382_v30 = vld [vmem:[#allocation9 + $0x538] sm:$0xf0]  ;;  %v7945_v21 = vld [vmem:[#allocation9 + $0x6ac] sm:$0xf] }
 0x1d7   : > { %3715 = vmatpush.bf16.msrb.mxu2 %v6321_v31  ;;  %3728 = vmatpush.bf16.msrb.mxu3 %v6449_v36  ;;  %v6001_v31 = vor.u32 %v7801_v48, %v5998_v16  ;;  %v6257_v36 = vor.u32 %v7865_v4, %v6254_v28  ;;  %v6385_v43 = vor.u32 %v7897_v29, %v6382_v30  ;;  %v7977_v23 = vld [vmem:[#allocation9 + $0x7ac] sm:$0xf]  ;;  %v6702_v28 = vld [vmem:[#allocation9 + $0x7b8] sm:$0xf0] }
 0x1d8   : > { %v6593_v48 = vor.u32 %v7949_v8, %v6590_v9  ;;  %v6830_v29 = vld [vmem:[#allocation9 + $0x8b8] sm:$0xf0]  ;;  %v3463_v30 = vadd.f32 %v9077_v3, %v3450_v17  ;;  %v7965_v8 = vld [vmem:[#allocation9 + $0x74c] sm:$0xf] }
 0x1d9   : > { %3690 = vmatpush.bf16.msrb.mxu0 %v6049_v41  ;;  %v3464_v40 = vpop.f32.mrf.mxu2  ;;  %v6238_v41 = vld [vmem:[#allocation9 + $0x418] sm:$0xf0] }
 0x1da   : > { %3703 = vmatpush.bf16.msrb.mxu1 %v6177_v44  ;;  %v7893_v44 = vld [vmem:[#allocation9 + $0x50c] sm:$0xf]  ;;  %v6686_v3 = vld [vmem:[#allocation9 + $0x798] sm:$0xf0] }
 0x1db   : > { %3716 = vmatpush.bf16.msrb.mxu2 %v6305_v46  ;;  %3729 = vmatpush.bf16.msrb.mxu3 %v6433_v53  ;;  %v6366_v46 = vld [vmem:[#allocation9 + $0x518] sm:$0xf0]  ;;  %v3477_v47 = vpop.f32.mrf.mxu3  ;;  %v7985_v53 = vld [vmem:[#allocation9 + $0x7ec] sm:$0xf] }
 0x1dc   : > { %v6369_v35 = vor.u32 %v7893_v44, %v6366_v46  ;;  %v8005_v40 = vld [vmem:[#allocation9 + $0x88c] sm:$0xf]  ;;  %v6942_v44 = vld [vmem:[#allocation9 + $0x998] sm:$0xf0] }
 0x1dd   : > { %3691 = vmatpush.bf16.msrb.mxu0 %v6033_v59  ;;  %v6113_v59 = vor.u32 %v7829_v19, %v6110_v37  ;;  %v6558_v19 = vld [vmem:[#allocation9 + $0x698] sm:$0xf0]  ;;  %v7973_v37 = vld [vmem:[#allocation9 + $0x78c] sm:$0xf] }
 0x1de   : > { %3704 = vmatpush.bf16.msrb.mxu1 %v6161_v60  ;;  %v6241_v60 = vor.u32 %v7861_v39, %v6238_v41  ;;  %v6689_v49 = vor.u32 %v7973_v37, %v6686_v3  ;;  %v7925_v37 = vld [vmem:[#allocation9 + $0x60c] sm:$0xf] }
 0x1df   : > { %3717 = vmatpush.bf16.msrb.mxu2 %v6289_v61  ;;  %3730 = vmatpush.bf16.msrb.mxu3 %v6417_v6  ;;  %v8049_v61 = vld [vmem:[#allocation9 + $0x9ec] sm:$0xf]  ;;  %v6737_v6 = vor.u32 %v7985_v53, %v6734_v2 }
 0x1e0   : > { %v6993_v11 = vor.u32 %v8049_v61, %v6990_v63  ;;  %v7937_v53 = vld [vmem:[#allocation9 + $0x66c] sm:$0xf] }
 0x1e1   : > { %3692 = vmatpush.bf16.msrb.mxu0 %v6017_v12  ;;  %v6718_v12 = vld [vmem:[#allocation9 + $0x7d8] sm:$0xf0]  ;;  %v7969_v2 = vld [vmem:[#allocation9 + $0x76c] sm:$0xf] }
 0x1e2   : > { %3705 = vmatpush.bf16.msrb.mxu1 %v6145_v14  ;;  %v6846_v14 = vld [vmem:[#allocation9 + $0x8d8] sm:$0xf0]  ;;  %v6721_v16 = vor.u32 %v7981_v62, %v6718_v12  ;;  %v7997_v12 = vld [vmem:[#allocation9 + $0x84c] sm:$0xf] }
 0x1e3   : > { %3718 = vmatpush.bf16.msrb.mxu2 %v6273_v15  ;;  %3731 = vmatpush.bf16.msrb.mxu3 %v6401_v22  ;;  %v6974_v15 = vld [vmem:[#allocation9 + $0x9d8] sm:$0xf0]  ;;  %v6849_v18 = vor.u32 %v8013_v13, %v6846_v14  ;;  %v7957_v3 = vld [vmem:[#allocation9 + $0x70c] sm:$0xf] }
 0x1e4   : > { %v6574_v22 = vld [vmem:[#allocation9 + $0x6b8] sm:$0xf0]  ;;  %v6977_v4 = vor.u32 %v8045_v45, %v6974_v15  ;;  %v8029_v45 = vld [vmem:[#allocation9 + $0x94c] sm:$0xf] }
 0x1e5   : > { %3693 = vmatpush.bf16.msrb.mxu0 %v6001_v31  ;;  %v8041_v31 = vld [vmem:[#allocation9 + $0x9ac] sm:$0xf]  ;;  %v6577_v33 = vor.u32 %v7945_v21, %v6574_v22  ;;  %v6782_v13 = vld [vmem:[#allocation9 + $0x858] sm:$0xf0] }
 0x1e6   : > { %3706 = vmatpush.bf16.msrb.mxu1 %v6129_v34  ;;  %v6705_v34 = vor.u32 %v7977_v23, %v6702_v28  ;;  %v6961_v39 = vor.u32 %v8041_v31, %v6958_v32  ;;  %v6910_v15 = vld [vmem:[#allocation9 + $0x958] sm:$0xf0]  ;;  %v6785_v23 = vor.u32 %v7997_v12, %v6782_v13  ;;  %v7993_v31 = vld [vmem:[#allocation9 + $0x82c] sm:$0xf]  ;;  %v7220_v12 = vld [vmem:[#allocation12 + $0x1c0] sm:$0xf] }
 0x1e7   : > { %3719 = vmatpush.bf16.msrb.mxu2 %v6257_v36  ;;  %3732 = vmatpush.bf16.msrb.mxu3 %v6385_v43  ;;  %v6833_v36 = vor.u32 %v8009_v52, %v6830_v29  ;;  %v6814_v43 = vld [vmem:[#allocation9 + $0x898] sm:$0xf0]  ;;  %v7961_v52 = vld [vmem:[#allocation9 + $0x72c] sm:$0xf]  ;;  %v6913_v29 = vor.u32 %v8029_v45, %v6910_v15  ;;  %v8110_v13 = vld [vmem:[#allocation12 + $0x1cc] sm:$0xf0] }
 0x1e8   : > { %v6817_v50 = vor.u32 %v8005_v40, %v6814_v43  ;;  %v6510_v28 = vld [vmem:[#allocation9 + $0x638] sm:$0xf0]  ;;  %v7076_v45 = vld [vmem:[#allocation12 + $0xa0] sm:$0xf]  ;;  %v8074_v15 = vld [vmem:[#allocation12 + $0xac] sm:$0xf0] }
 0x1e9   : > { %3694 = vmatpush.bf16.msrb.mxu0 %v5985_v54  ;;  %v3488_v41 = vpop.f32.mrf.mxu0  ;;  %v6542_v54 = vld [vmem:[#allocation9 + $0x678] sm:$0xf0] }
 0x1ea   : > { %3707 = vmatpush.bf16.msrb.mxu1 %v6113_v59  ;;  %v6798_v59 = vld [vmem:[#allocation9 + $0x878] sm:$0xf0]  ;;  %v6545_v61 = vor.u32 %v7937_v53, %v6542_v54 }
 0x1eb   : > { %3720 = vmatpush.bf16.msrb.mxu2 %v6241_v60  ;;  %3733 = vmatpush.bf16.msrb.mxu3 %v6369_v35  ;;  %v6926_v60 = vld [vmem:[#allocation9 + $0x978] sm:$0xf0]  ;;  %v6673_v35 = vor.u32 %v7969_v2, %v6670_v55  ;;  %v8021_v2 = vld [vmem:[#allocation9 + $0x90c] sm:$0xf] }
 0x1ec   : > { %3695 = vmatmul.bf16.vlgmr.msrb.gmra.mxu0 %v8985_v38  ;;  %v3476_v38 = vadd.f32 %v9079_v10, %v3463_v30  ;;  %v8033_v10 = vld [vmem:[#allocation9 + $0x96c] sm:$0xf]  ;;  %v6638_v30 = vld [vmem:[#allocation9 + $0x738] sm:$0xf0] }
 0x1ed   : > { %3739 = vmatpush.bf16.msra.mxu0 %v6609_v0  ;;  %3708 = vmatmul.bf16.vlgmr.msrb.gmra.mxu1 %v8989_v42  ;;  %v3501_v42 = vpop.f32.mrf.mxu1  ;;  %v6801_v0 = vor.u32 %v8001_v56, %v6798_v59  ;;  %v6929_v9 = vor.u32 %v8033_v10, %v6926_v60  ;;  %v6766_v32 = vld [vmem:[#allocation9 + $0x838] sm:$0xf0]  ;;  %v6641_v43 = vor.u32 %v7961_v52, %v6638_v30  ;;  %v7236_v60 = vld [vmem:[#allocation12 + $0x1e0] sm:$0xf]  ;;  %v8102_v52 = vld [vmem:[#allocation12 + $0x18c] sm:$0xf0] }
 0x1ee   : > { %3752 = vmatpush.bf16.msra.mxu1 %v6737_v6  ;;  %3721 = vmatmul.bf16.vlgmr.msrb.gmra.mxu2 %v9001_v25  ;;  %v7941_v25 = vld [vmem:[#allocation9 + $0x68c] sm:$0xf]  ;;  %v3489_v47 = vadd.f32 %v3488_v41, %v3476_v38  ;;  %v6622_v38 = vld [vmem:[#allocation9 + $0x718] sm:$0xf0]  ;;  %v7108_v41 = vld [vmem:[#allocation12 + $0xe0] sm:$0xf] }
 0x1ef   : > { %3765 = vmatpush.bf16.msra.mxu2 %v6865_v7  ;;  %3778 = vmatpush.bf16.msra.mxu3 %v6993_v11  ;;  %v6561_v46 = vor.u32 %v7941_v25, %v6558_v19  ;;  %v7933_v6 = vld [vmem:[#allocation9 + $0x64c] sm:$0xf]  ;;  %v6526_v7 = vld [vmem:[#allocation9 + $0x658] sm:$0xf0]  ;;  %v6625_v59 = vor.u32 %v7957_v3, %v6622_v38 }
 0x1f0   : > { %3734 = vmatmul.bf16.vlgmr.msrb.gmra.mxu3 %v9005_v27  ;;  %v8037_v27 = vld [vmem:[#allocation9 + $0x98c] sm:$0xf]  ;;  %v3502_v63 = vadd.f32 %v3501_v42, %v3489_v47  ;;  %v6654_v11 = vld [vmem:[#allocation9 + $0x758] sm:$0xf0]  ;;  %v3799_v47 = vunpack.c.l.bf16 %v9031_v58 }
 0x1f1   : > { %3740 = vmatpush.bf16.msra.mxu0 %v6593_v48  ;;  %v6945_v57 = vor.u32 %v8037_v27, %v6942_v44  ;;  %v3514_v62 = vpop.f32.mrf.mxu2  ;;  %v3490_v48 = vpop.f32.mrf.mxu0  ;;  %v6657_v22 = vor.u32 %v7965_v8, %v6654_v11  ;;  %v6894_v25 = vld [vmem:[#allocation9 + $0x938] sm:$0xf0]  ;;  %v8082_v27 = vld [vmem:[#allocation12 + $0xec] sm:$0xf0]  ;;  %v6769_v44 = vor.u32 %v7993_v31, %v6766_v32  ;;  %v7989_v42 = vld [vmem:[#allocation9 + $0x80c] sm:$0xf] }
 0x1f2   : > { %3753 = vmatpush.bf16.msra.mxu1 %v6721_v16  ;;  %v3515_v14 = vadd.f32 %v3514_v62, %v3502_v63  ;;  %v6529_v16 = vor.u32 %v7933_v6, %v6526_v7  ;;  %v6750_v54 = vld [vmem:[#allocation9 + $0x818] sm:$0xf0]  ;;  %v7109_v10 = vor.u32 %v8082_v27, %v7108_v41  ;;  %v7092_v62 = vld [vmem:[#allocation12 + $0xc0] sm:$0xf]  ;;  %v8078_v11 = vld [vmem:[#allocation12 + $0xcc] sm:$0xf0] }
 0x1f3   : > { %3766 = vmatpush.bf16.msra.mxu2 %v6849_v18  ;;  %3779 = vmatpush.bf16.msra.mxu3 %v6977_v4  ;;  %v3527_v17 = vpop.f32.mrf.mxu3  ;;  %v7929_v4 = vld [vmem:[#allocation9 + $0x62c] sm:$0xf]  ;;  %v7204_v48 = vld [vmem:[#allocation12 + $0x1a0] sm:$0xf]  ;;  %v8066_v31 = vld [vmem:[#allocation12 + $0x6c] sm:$0xf0] }
 0x1f4   : > { %v3528_v21 = vadd.f32 %v3527_v17, %v3515_v14  ;;  %v6513_v19 = vor.u32 %v7929_v4, %v6510_v28  ;;  %v7093_v14 = vor.u32 %v8078_v11, %v7092_v62  ;;  %v7221_v17 = vor.u32 %v8110_v13, %v7220_v12  ;;  %v9103_v4 = vld [vmem:[#allocation10] sm:$0xf]  ;;  %v7188_v28 = vld [vmem:[#allocation12 + $0x180] sm:$0xf]  ;;  %v8076_v12 = vld [vmem:[#allocation12 + $0xc4] sm:$0xf] }
 0x1f5   : > { %3741 = vmatpush.bf16.msra.mxu0 %v6577_v33  ;;  %v3503_v18 = vpop.f32.mrf.mxu1  ;;  %v3791_v33 = vmax.f32 %v9064_v51, 0.0  ;;  %v7189_v30 = vor.u32 %v8102_v52, %v7188_v28  ;;  %v7094_v13 = vld [vmem:[#allocation12 + $0xd0] sm:$0xf0]  ;;  %v8068_v28 = vld [vmem:[#allocation12 + $0x84] sm:$0xf] }
 0x1f6   : > { %3754 = vmatpush.bf16.msra.mxu1 %v6705_v34  ;;  %v3792_v34 = vmax.f32 %v3528_v21, 0.0  ;;  %v7077_v18 = vor.u32 %v8074_v15, %v7076_v45  ;;  %v7097_v15 = vor.u32 %v8076_v12, %v7094_v13  ;;  %v7062_v52 = vld [vmem:[#allocation12 + $0x90] sm:$0xf0]  ;;  %v7100_v12 = vld [vmem:[#allocation12 + $0xc8] sm:$0xf] }
 0x1f7   : > { %3767 = vmatpush.bf16.msra.mxu2 %v6833_v36  ;;  %3780 = vmatpush.bf16.msra.mxu3 %v6961_v39  ;;  %v8025_v36 = vld [vmem:[#allocation9 + $0x92c] sm:$0xf]  ;;  %v6494_v39 = vld [vmem:[#allocation9 + $0x618] sm:$0xf0] }
 0x1f8   : > { %v3797_v40 = vpack.c.bf16 %v3792_v34, %v3791_v33  ;;  %v6497_v56 = vor.u32 %v7925_v37, %v6494_v39  ;;  %v7172_v33 = vld [vmem:[#allocation12 + $0x160] sm:$0xf]  ;;  %v8098_v34 = vld [vmem:[#allocation12 + $0x16c] sm:$0xf0] }
 0x1f9   : > { %3742 = vmatpush.bf16.msra.mxu0 %v6561_v46  ;;  %v6897_v46 = vor.u32 %v8025_v36, %v6894_v25  ;;  %v3516_v51 = vpop.f32.mrf.mxu2  ;;  %v7028_v37 = vld [vmem:[#allocation12 + $0x40] sm:$0xf]  ;;  %v8062_v39 = vld [vmem:[#allocation12 + $0x4c] sm:$0xf0] }
 0x1fa   : > { %3755 = vmatpush.bf16.msra.mxu1 %v6689_v49  ;;  %v3800_v49 = vunpack.c.h.bf16 %v9031_v58  ;;  %v3804_v53 = vunpack.c.h.bf16 %v3797_v40  ;;  %v6753_v58 = vor.u32 %v7989_v42, %v6750_v54  ;;  %v7029_v27 = vor.u32 %v8062_v39, %v7028_v37  ;;  %v7012_v51 = vld [vmem:[#allocation12 + $0x20] sm:$0xf]  ;;  %v8060_v39 = vld [vmem:[#allocation12 + $0x44] sm:$0xf] }
 0x1fb   : > { %3768 = vmatpush.bf16.msra.mxu2 %v6817_v50  ;;  %3781 = vmatpush.bf16.msra.mxu3 %v6945_v57  ;;  %v3803_v50 = vunpack.c.l.bf16 %v3797_v40  ;;  %v6878_v57 = vld [vmem:[#allocation9 + $0x918] sm:$0xf0]  ;;  %v3529_v55 = vpop.f32.mrf.mxu3  ;;  %v7156_v40 = vld [vmem:[#allocation12 + $0x140] sm:$0xf] }
 0x1fc   : > { %v4806_v6 = vadd.f32 %v3804_v53, %v3800_v49  ;;  %v6881_v7 = vor.u32 %v8021_v2, %v6878_v57  ;;  %v6996_v57 = vld [vmem:[#allocation12] sm:$0xf]  ;;  %v8054_v55 = vld [vmem:[#allocation12 + $0xc] sm:$0xf0] }
 0x1fd   : > { %3743 = vmatpush.bf16.msra.mxu0 %v6545_v61  ;;  %v8114_v61 = vld [vmem:[#allocation12 + $0x1ec] sm:$0xf0]  ;;  %v9093_v63 = vmul.f32 %v3803_v50, %v3799_v47 }
 0x1fe   : > { %3756 = vmatpush.bf16.msra.mxu1 %v6673_v35  ;;  %v9095_v35 = vmul.f32 %v3804_v53, %v3800_v49  ;;  %v8090_v53 = vld [vmem:[#allocation12 + $0x12c] sm:$0xf0] }
 0x1ff   : > { %3769 = vmatpush.bf16.msra.mxu2 %v6801_v0  ;;  %3782 = vmatpush.bf16.msra.mxu3 %v6929_v9  ;;  %v4805_v0 = vadd.f32 %v3803_v50, %v3799_v47  ;;  %v7237_v9 = vor.u32 %v8114_v61, %v7236_v60  ;;  %v8058_v47 = vld [vmem:[#allocation12 + $0x2c] sm:$0xf0]  ;;  %v7140_v50 = vld [vmem:[#allocation12 + $0x120] sm:$0xf]  ;;  %v8080_v60 = vld [vmem:[#allocation12 + $0xe4] sm:$0xf]  ;;  %v9110_v45 = vpack.c.bf16 %v9093_v63, %v9093_v63 }
 0x200   : > { %v7013_v54 = vor.u32 %v8058_v47, %v7012_v51  ;;  %v7141_v2 = vor.u32 %v8090_v53, %v7140_v50  ;;  %v7110_v61 = vld [vmem:[#allocation12 + $0xf0] sm:$0xf0]  ;;  %v8056_v51 = vld [vmem:[#allocation12 + $0x24] sm:$0xf] }
 0x201   : > { %3744 = vmatpush.bf16.msra.mxu0 %v6529_v16  ;;  %v9097_v8 = vpack.c.bf16 %v4806_v6, %v4805_v0  ;;  %v8106_v16 = vld [vmem:[#allocation12 + $0x1ac] sm:$0xf0]  ;;  %v8112_v6 = vld [vmem:[#allocation12 + $0x1e4] sm:$0xf]  ;;  %v7113_v62 = vor.u32 %v8080_v60, %v7110_v61  ;;  %v7014_v47 = vld [vmem:[#allocation12 + $0x30] sm:$0xf0] }
 0x202   : > { %3757 = vmatpush.bf16.msra.mxu1 %v6657_v22  ;;  %v7205_v21 = vor.u32 %v8106_v16, %v7204_v48  ;;  %v7060_v22 = vld [vmem:[#allocation12 + $0x80] sm:$0xf]  ;;  %v9114_v48 = vpack.c.bf16 %v9095_v35, %v9095_v35  ;;  %v7065_v35 = vor.u32 %v8068_v28, %v7062_v52  ;;  %v8088_v50 = vld [vmem:[#allocation12 + $0x124] sm:$0xf]  ;;  %v7142_v53 = vld [vmem:[#allocation12 + $0x130] sm:$0xf0] }
 0x203   : > { %3770 = vmatpush.bf16.msra.mxu2 %v6785_v23  ;;  %3783 = vmatpush.bf16.msra.mxu3 %v6913_v29  ;;  %v8070_v23 = vld [vmem:[#allocation12 + $0x8c] sm:$0xf0]  ;;  %v7116_v60 = vld [vmem:[#allocation12 + $0xe8] sm:$0xf]  ;;  %v8083_v61 = vld [vmem:[#allocation12 + $0xf4] sm:$0xf0] }
 0x204   : > { %v7084_v52 = vld [vmem:[#allocation12 + $0xa8] sm:$0xf] }
 0x205   : > { %3745 = vmatpush.bf16.msra.mxu0 %v6513_v19  ;;  %v7173_v19 = vor.u32 %v8098_v34, %v7172_v33  ;;  %v7174_v33 = vld [vmem:[#allocation12 + $0x170] sm:$0xf0] }
 0x206   : > { %3758 = vmatpush.bf16.msra.mxu1 %v6641_v43  ;;  %v8094_v43 = vld [vmem:[#allocation12 + $0x14c] sm:$0xf0] }
 0x207   : > { %3771 = vmatpush.bf16.msra.mxu2 %v6769_v44  ;;  %3784 = vmatpush.bf16.msra.mxu3 %v6897_v46  ;;  %v7157_v42 = vor.u32 %v8094_v43, %v7156_v40  ;;  %v8092_v40 = vld [vmem:[#allocation12 + $0x144] sm:$0xf]  ;;  %v7158_v43 = vld [vmem:[#allocation12 + $0x150] sm:$0xf0] }
 0x209   : > { %3746 = vmatpush.bf16.msra.mxu0 %v6497_v56  ;;  %v3540_v29 = vpop.f32.mrf.mxu0  ;;  %v7124_v56 = vld [vmem:[#allocation12 + $0x100] sm:$0xf] }
 0x20a   : > { %3759 = vmatpush.bf16.msra.mxu1 %v6625_v59  ;;  %v3553_v32 = vpop.f32.mrf.mxu1 }
 0x20b   : > { %3772 = vmatpush.bf16.msra.mxu2 %v6753_v58  ;;  %3785 = vmatpush.bf16.msra.mxu3 %v6881_v7  ;;  %v7238_v58 = vld [vmem:[#allocation12 + $0x1f0] sm:$0xf0]  ;;  %v6997_v7 = vor.u32 %v8054_v55, %v6996_v57  ;;  %v7145_v57 = vor.u32 %v8088_v50, %v7142_v53  ;;  %v8052_v55 = vld [vmem:[#allocation12 + $0x4] sm:$0xf]  ;;  %v7180_v50 = vld [vmem:[#allocation12 + $0x168] sm:$0xf] }
 0x20c   : > { %3747 = vmatmul.bf16.vlgmr.msra.gmra.mxu0 %v8999_v5  ;;  %v1630_v5 = vperm.slane %v9103_v4, 2  ;;  %v7241_v11 = vor.u32 %v8112_v6, %v7238_v58  ;;  %v7244_v6 = vld [vmem:[#allocation12 + $0x1e8] sm:$0xf]  ;;  %v8115_v58 = vld [vmem:[#allocation12 + $0x1f4] sm:$0xf0] }
 0x20d   : > { %4593 = vmatpush.bf16.msrb.mxu0 %v7109_v10  ;;  %3760 = vmatmul.bf16.vlgmr.msra.gmra.mxu1 %v9003_v26  ;;  %v7061_v26 = vor.u32 %v8070_v23, %v7060_v22  ;;  %v8086_v10 = vld [vmem:[#allocation12 + $0x10c] sm:$0xf0]  ;;  %v8104_v22 = vld [vmem:[#allocation12 + $0x1a4] sm:$0xf]  ;;  %v7206_v23 = vld [vmem:[#allocation12 + $0x1b0] sm:$0xf0]  ;;  %v7245_v13 = vor.u32 %v8115_v58, %v7244_v6 }
 0x20e   : > { %4606 = vmatpush.bf16.msrb.mxu1 %v7237_v9  ;;  %3773 = vmatmul.bf16.vlgmr.msra.gmra.mxu2 %v9019_v20  ;;  %v7044_v20 = vld [vmem:[#allocation12 + $0x60] sm:$0xf]  ;;  %v7125_v9 = vor.u32 %v8086_v10, %v7124_v56  ;;  %v6998_v56 = vld [vmem:[#allocation12 + $0x10] sm:$0xf0]  ;;  %v8099_v53 = vld [vmem:[#allocation12 + $0x174] sm:$0xf0] }
 0x20f   : > { %3786 = vmatmul.bf16.vlgmr.msra.gmra.mxu3 %v9021_v24  ;;  %v3541_v24 = vadd.f32 %v3540_v29, %v1630_v5  ;;  %v7045_v25 = vor.u32 %v8066_v31, %v7044_v20  ;;  %v7209_v5 = vor.u32 %v8104_v22, %v7206_v23  ;;  %v7190_v29 = vld [vmem:[#allocation12 + $0x190] sm:$0xf0]  ;;  %v8064_v20 = vld [vmem:[#allocation12 + $0x64] sm:$0xf]  ;;  %v8178_v23 = vld [vmem:[#allocation12 + $0x3ec] sm:$0xf0]  ;;  %v7181_v6 = vor.u32 %v8099_v53, %v7180_v50 }
 0x210   : > { %v7046_v31 = vld [vmem:[#allocation12 + $0x70] sm:$0xf0]  ;;  %v7036_v58 = vld [vmem:[#allocation12 + $0x48] sm:$0xf]  ;;  %v7102_v53 = vld [vmem:[#allocation12 + $0xd8] sm:$0xf0] }
 0x211   : > { %4594 = vmatpush.bf16.msrb.mxu0 %v7093_v14  ;;  %v3554_v36 = vadd.f32 %v3553_v32, %v3541_v24  ;;  %v3566_v3 = vpop.f32.mrf.mxu2  ;;  %v3542_v46 = vpop.f32.mrf.mxu0  ;;  %v8108_v14 = vld [vmem:[#allocation12 + $0x1c4] sm:$0xf]  ;;  %v7126_v10 = vld [vmem:[#allocation12 + $0x110] sm:$0xf0] }
 0x212   : > { %4607 = vmatpush.bf16.msrb.mxu1 %v7221_v17  ;;  %v3555_v49 = vpop.f32.mrf.mxu1  ;;  %v7222_v17 = vld [vmem:[#allocation12 + $0x1d0] sm:$0xf0]  ;;  %v8096_v32 = vld [vmem:[#allocation12 + $0x164] sm:$0xf] }
 0x213   : > { %v3567_v38 = vadd.f32 %v3566_v3, %v3554_v36  ;;  %v3579_v41 = vpop.f32.mrf.mxu3  ;;  %v7225_v16 = vor.u32 %v8108_v14, %v7222_v17  ;;  %v7177_v37 = vor.u32 %v8096_v32, %v7174_v33  ;;  %v7030_v3 = vld [vmem:[#allocation12 + $0x50] sm:$0xf0]  ;;  %v8079_v14 = vld [vmem:[#allocation12 + $0xd4] sm:$0xf0]  ;;  %v7228_v17 = vld [vmem:[#allocation12 + $0x1c8] sm:$0xf] }
 0x214   : > { %v7033_v46 = vor.u32 %v8060_v39, %v7030_v3  ;;  %v8174_v32 = vld [vmem:[#allocation12 + $0x3cc] sm:$0xf0]  ;;  %v8103_v39 = vld [vmem:[#allocation12 + $0x194] sm:$0xf0]  ;;  %v7332_v3 = vld [vmem:[#allocation12 + $0x2a0] sm:$0xf] }
 0x215   : > { %4595 = vmatpush.bf16.msrb.mxu0 %v7077_v18  ;;  %v9106_v44 = vadd.f32 %v3579_v41, %v3567_v38  ;;  %v8072_v18 = vld [vmem:[#allocation12 + $0xa4] sm:$0xf] }
 0x216   : > { %4608 = vmatpush.bf16.msrb.mxu1 %v7205_v21  ;;  %v7078_v21 = vld [vmem:[#allocation12 + $0xb0] sm:$0xf0] }
 0x217   : > { %v7081_v63 = vor.u32 %v8072_v18, %v7078_v21  ;;  %v8146_v18 = vld [vmem:[#allocation12 + $0x2ec] sm:$0xf0]  ;;  %v7492_v21 = vld [vmem:[#allocation12 + $0x3e0] sm:$0xf] }
 0x219   : > { %4596 = vmatpush.bf16.msrb.mxu0 %v7061_v26  ;;  %v3568_v59 = vpop.f32.mrf.mxu2  ;;  %v8100_v26 = vld [vmem:[#allocation12 + $0x184] sm:$0xf] }
 0x21a   : > { %4609 = vmatpush.bf16.msrb.mxu1 %v7189_v30  ;;  %v7193_v30 = vor.u32 %v8100_v26, %v7190_v29  ;;  %v8084_v59 = vld [vmem:[#allocation12 + $0x104] sm:$0xf]  ;;  %v8075_v26 = vld [vmem:[#allocation12 + $0xb4] sm:$0xf0]  ;;  %v7212_v29 = vld [vmem:[#allocation12 + $0x1a8] sm:$0xf] }
 0x21b   : > { %v3581_v0 = vpop.f32.mrf.mxu3  ;;  %v7085_v33 = vor.u32 %v8075_v26, %v7084_v52  ;;  %v7284_v26 = vld [vmem:[#allocation12 + $0x240] sm:$0xf] }
 0x21d   : > { %4597 = vmatpush.bf16.msrb.mxu0 %v7045_v25  ;;  %v7049_v25 = vor.u32 %v8064_v20, %v7046_v31  ;;  %v8142_v20 = vld [vmem:[#allocation12 + $0x2cc] sm:$0xf0] }
 0x21e   : > { %4610 = vmatpush.bf16.msrb.mxu1 %v7173_v19 }
 0x221   : > { %4598 = vmatpush.bf16.msrb.mxu0 %v7029_v27 }
 0x222   : > { %4611 = vmatpush.bf16.msrb.mxu1 %v7157_v42  ;;  %v7161_v42 = vor.u32 %v8092_v40, %v7158_v43  ;;  %v8138_v40 = vld [vmem:[#allocation12 + $0x2ac] sm:$0xf0]  ;;  %v7460_v43 = vld [vmem:[#allocation12 + $0x3a0] sm:$0xf] }
 0x225   : > { %4599 = vmatpush.bf16.msrb.mxu0 %v7013_v54 }
 0x226   : > { %4612 = vmatpush.bf16.msrb.mxu1 %v7141_v2  ;;  %v7017_v2 = vor.u32 %v8056_v51, %v7014_v47 }
 0x229   : > { %4600 = vmatpush.bf16.msrb.mxu0 %v6997_v7  ;;  %v3592_v24 = vpop.f32.mrf.mxu0 }
 0x22a   : > { %4613 = vmatpush.bf16.msrb.mxu1 %v7125_v9  ;;  %v3593_v34 = vadd.f32 %v3592_v24, %v9106_v44  ;;  %v3605_v36 = vpop.f32.mrf.mxu1  ;;  %v7001_v9 = vor.u32 %v8052_v55, %v6998_v56  ;;  %v7476_v24 = vld [vmem:[#allocation12 + $0x3c0] sm:$0xf]  ;;  %v8134_v55 = vld [vmem:[#allocation12 + $0x28c] sm:$0xf0] }
 0x22b   : > { %v7444_v56 = vld [vmem:[#allocation12 + $0x380] sm:$0xf] }
 0x22c   : > { %4601 = vmatmul.bf16.vlgmr.msrb.gmra.mxu0 %v9110_v45  ;;  %v3606_v19 = vadd.f32 %v3605_v36, %v3593_v34  ;;  %v7068_v34 = vld [vmem:[#allocation12 + $0x88] sm:$0xf]  ;;  %v7477_v36 = vor.u32 %v8174_v32, %v7476_v24  ;;  %v8055_v32 = vld [vmem:[#allocation12 + $0x14] sm:$0xf0] }
 0x22d   : > { %4645 = vmatpush.bf16.msra.mxu0 %v7113_v62  ;;  %4614 = vmatmul.bf16.vlgmr.msrb.gmra.mxu1 %v9114_v48  ;;  %v7129_v62 = vor.u32 %v8084_v59, %v7126_v10  ;;  %v8166_v10 = vld [vmem:[#allocation12 + $0x38c] sm:$0xf0]  ;;  %v7004_v24 = vld [vmem:[#allocation12 + $0x8] sm:$0xf] }
 0x22e   : > { %4658 = vmatpush.bf16.msra.mxu1 %v7241_v11  ;;  %v7117_v11 = vor.u32 %v8083_v61, %v7116_v60 }
 0x231   : > { %4646 = vmatpush.bf16.msra.mxu0 %v7097_v15  ;;  %v3618_v38 = vpop.f32.mrf.mxu2  ;;  %v3594_v49 = vpop.f32.mrf.mxu0  ;;  %v8111_v15 = vld [vmem:[#allocation12 + $0x1d4] sm:$0xf0] }
 0x232   : > { %4659 = vmatpush.bf16.msra.mxu1 %v7225_v16  ;;  %v3619_v41 = vadd.f32 %v3618_v38, %v3606_v19  ;;  %v3607_v54 = vpop.f32.mrf.mxu1  ;;  %v7364_v16 = vld [vmem:[#allocation12 + $0x2e0] sm:$0xf]  ;;  %v7229_v28 = vor.u32 %v8111_v15, %v7228_v17  ;;  %v8071_v19 = vld [vmem:[#allocation12 + $0x94] sm:$0xf0]  ;;  %v7333_v38 = vor.u32 %v8138_v40, %v7332_v3  ;;  %v7020_v15 = vld [vmem:[#allocation12 + $0x28] sm:$0xf] }
 0x233   : > { %v3631_v27 = vpop.f32.mrf.mxu3  ;;  %v7365_v22 = vor.u32 %v8146_v18, %v7364_v16  ;;  %v8067_v49 = vld [vmem:[#allocation12 + $0x74] sm:$0xf0]  ;;  %v8122_v3 = vld [vmem:[#allocation12 + $0x22c] sm:$0xf0]  ;;  %v7396_v40 = vld [vmem:[#allocation12 + $0x320] sm:$0xf] }
 0x234   : > { %v9119_v44 = vadd.f32 %v3631_v27, %v3619_v41  ;;  %v8170_v41 = vld [vmem:[#allocation12 + $0x3ac] sm:$0xf0]  ;;  %v7069_v27 = vor.u32 %v8071_v19, %v7068_v34  ;;  %v8081_v19 = vld [vmem:[#allocation12 + $0xec] sm:$0xf] }
 0x235   : > { %4647 = vmatpush.bf16.msra.mxu0 %v7081_v63  ;;  %v7101_v63 = vor.u32 %v8079_v14, %v7100_v12  ;;  %4619 = vmatpush.bf16.msrb.mxu2 %v7365_v22  ;;  %v8162_v14 = vld [vmem:[#allocation12 + $0x36c] sm:$0xf0]  ;;  %v8059_v22 = vld [vmem:[#allocation12 + $0x34] sm:$0xf0] }
 0x236   : > { %4660 = vmatpush.bf16.msra.mxu1 %v7209_v5  ;;  %v7493_v5 = vor.u32 %v8178_v23, %v7492_v21  ;;  %v7148_v23 = vld [vmem:[#allocation12 + $0x128] sm:$0xf] }
 0x238   : > { %4632 = vmatpush.bf16.msrb.mxu3 %v7493_v5 }
 0x239   : > { %4648 = vmatpush.bf16.msra.mxu0 %v7065_v35  ;;  %v3620_v0 = vpop.f32.mrf.mxu2  ;;  %v8107_v35 = vld [vmem:[#allocation12 + $0x1b4] sm:$0xf0] }
 0x23a   : > { %4661 = vmatpush.bf16.msra.mxu1 %v7193_v30  ;;  %v7348_v30 = vld [vmem:[#allocation12 + $0x2c0] sm:$0xf]  ;;  %v7445_v0 = vor.u32 %v8166_v10, %v7444_v56 }
 0x23b   : > { %v3633_v7 = vpop.f32.mrf.mxu3  ;;  %v7349_v31 = vor.u32 %v8142_v20, %v7348_v30  ;;  %v8158_v20 = vld [vmem:[#allocation12 + $0x34c] sm:$0xf0]  ;;  %v7252_v56 = vld [vmem:[#allocation12 + $0x200] sm:$0xf] }
 0x23c   : > { %4633 = vmatpush.bf16.msrb.mxu3 %v7477_v36  ;;  %v8063_v7 = vld [vmem:[#allocation12 + $0x54] sm:$0xf0]  ;;  %v7380_v10 = vld [vmem:[#allocation12 + $0x300] sm:$0xf] }
 0x23d   : > { %4649 = vmatpush.bf16.msra.mxu0 %v7049_v25  ;;  %v7213_v25 = vor.u32 %v8107_v35, %v7212_v29  ;;  %4620 = vmatpush.bf16.msrb.mxu2 %v7349_v31  ;;  %v7037_v17 = vor.u32 %v8063_v7, %v7036_v58  ;;  %v8126_v29 = vld [vmem:[#allocation12 + $0x24c] sm:$0xf0]  ;;  %v7412_v35 = vld [vmem:[#allocation12 + $0x340] sm:$0xf]  ;;  %v7021_v31 = vor.u32 %v8059_v22, %v7020_v15  ;;  %v7366_v58 = vld [vmem:[#allocation12 + $0x2f0] sm:$0xf0] }
 0x23e   : > { %4662 = vmatpush.bf16.msra.mxu1 %v7177_v37  ;;  %v7196_v37 = vld [vmem:[#allocation12 + $0x188] sm:$0xf]  ;;  %v7285_v30 = vor.u32 %v8126_v29, %v7284_v26  ;;  %v7413_v34 = vor.u32 %v8158_v20, %v7412_v35  ;;  %v7478_v22 = vld [vmem:[#allocation12 + $0x3d0] sm:$0xf0]  ;;  %v8069_v26 = vld [vmem:[#allocation12 + $0x8c] sm:$0xf] }
 0x23f   : > { %v7197_v47 = vor.u32 %v8103_v39, %v7196_v37  ;;  %v7118_v37 = vld [vmem:[#allocation12 + $0xf8] sm:$0xf0]  ;;  %v7268_v39 = vld [vmem:[#allocation12 + $0x220] sm:$0xf]  ;;  %v8101_v20 = vld [vmem:[#allocation12 + $0x18c] sm:$0xf] }
 0x240   : > { %v7121_v50 = vor.u32 %v8081_v19, %v7118_v37  ;;  %v8065_v19 = vld [vmem:[#allocation12 + $0x6c] sm:$0xf] }
 0x241   : > { %4650 = vmatpush.bf16.msra.mxu0 %v7033_v46  ;;  %v7052_v46 = vld [vmem:[#allocation12 + $0x68] sm:$0xf]  ;;  %4621 = vmatpush.bf16.msrb.mxu2 %v7333_v38  ;;  %v7246_v38 = vld [vmem:[#allocation12 + $0x1f8] sm:$0xf0] }
 0x242   : > { %4663 = vmatpush.bf16.msra.mxu1 %v7161_v42  ;;  %v7461_v42 = vor.u32 %v8170_v41, %v7460_v43  ;;  %v7053_v61 = vor.u32 %v8067_v49, %v7052_v46  ;;  %v8113_v43 = vld [vmem:[#allocation12 + $0x1ec] sm:$0xf]  ;;  %v7269_v41 = vor.u32 %v8122_v3, %v7268_v39  ;;  %v7005_v46 = vor.u32 %v8055_v32, %v7004_v24  ;;  %v8136_v24 = vld [vmem:[#allocation12 + $0x2a4] sm:$0xf]  ;;  %v7334_v32 = vld [vmem:[#allocation12 + $0x2b0] sm:$0xf0] }
 0x243   : > { %v7054_v3 = vld [vmem:[#allocation12 + $0x78] sm:$0xf0] }
 0x244   : > { %4634 = vmatpush.bf16.msrb.mxu3 %v7461_v42  ;;  %v8077_v42 = vld [vmem:[#allocation12 + $0xcc] sm:$0xf] }
 0x245   : > { %4651 = vmatpush.bf16.msra.mxu0 %v7017_v2 }
 0x246   : > { %4664 = vmatpush.bf16.msra.mxu1 %v7145_v57  ;;  %v7316_v57 = vld [vmem:[#allocation12 + $0x280] sm:$0xf] }
 0x247   : > { %v7317_v59 = vor.u32 %v8134_v55, %v7316_v57  ;;  %v7249_v55 = vor.u32 %v8113_v43, %v7246_v38  ;;  %v7182_v43 = vld [vmem:[#allocation12 + $0x178] sm:$0xf0]  ;;  %v8132_v38 = vld [vmem:[#allocation12 + $0x284] sm:$0xf] }
 0x248   : > { %4635 = vmatpush.bf16.msrb.mxu3 %v7445_v0  ;;  %v8150_v0 = vld [vmem:[#allocation12 + $0x30c] sm:$0xf0] }
 0x249   : > { %4652 = vmatpush.bf16.msra.mxu0 %v7001_v9  ;;  %v3644_v51 = vpop.f32.mrf.mxu0  ;;  %v7164_v9 = vld [vmem:[#allocation12 + $0x148] sm:$0xf]  ;;  %4622 = vmatpush.bf16.msrb.mxu2 %v7317_v59  ;;  %v8118_v59 = vld [vmem:[#allocation12 + $0x20c] sm:$0xf0]  ;;  %v7381_v7 = vor.u32 %v8150_v0, %v7380_v10  ;;  %v8160_v10 = vld [vmem:[#allocation12 + $0x364] sm:$0xf] }
 0x24a   : > { %4665 = vmatpush.bf16.msra.mxu1 %v7129_v62  ;;  %v3645_v54 = vadd.f32 %v3644_v51, %v9119_v44  ;;  %v3657_v2 = vpop.f32.mrf.mxu1  ;;  %v8095_v62 = vld [vmem:[#allocation12 + $0x154] sm:$0xf0]  ;;  %v7300_v44 = vld [vmem:[#allocation12 + $0x260] sm:$0xf]  ;;  %v7430_v0 = vld [vmem:[#allocation12 + $0x370] sm:$0xf0] }
 0x24b   : > { %v7165_v21 = vor.u32 %v8095_v62, %v7164_v9  ;;  %v8176_v62 = vld [vmem:[#allocation12 + $0x3e4] sm:$0xf] }
 0x24c   : > { %4653 = vmatmul.bf16.vlgmr.msra.gmra.mxu0 %v9110_v45  ;;  %v9124_v60 = vadd.f32 %v3657_v2, %v3645_v54  ;;  %v8109_v54 = vld [vmem:[#allocation12 + $0x1cc] sm:$0xf]  ;;  %v7230_v2 = vld [vmem:[#allocation12 + $0x1d8] sm:$0xf0] }
 0x24d   : > { %4697 = vmatpush.bf16.msrb.mxu0 %v7117_v11  ;;  %4666 = vmatmul.bf16.vlgmr.msra.gmra.mxu1 %v9114_v48  ;;  %v8130_v11 = vld [vmem:[#allocation12 + $0x26c] sm:$0xf0]  ;;  %v7233_v15 = vor.u32 %v8109_v54, %v7230_v2  ;;  %v7038_v2 = vld [vmem:[#allocation12 + $0x58] sm:$0xf0] }
 0x24e   : > { %4710 = vmatpush.bf16.msrb.mxu1 %v7245_v13  ;;  %v7301_v12 = vor.u32 %v8130_v11, %v7300_v44  ;;  %v7428_v13 = vld [vmem:[#allocation12 + $0x360] sm:$0xf]  ;;  %v7494_v44 = vld [vmem:[#allocation12 + $0x3f0] sm:$0xf0]  ;;  %v7105_v11 = vor.u32 %v8077_v42, %v7102_v53 }
 0x24f   : > { %v7429_v18 = vor.u32 %v8162_v14, %v7428_v13  ;;  %v7497_v13 = vor.u32 %v8176_v62, %v7494_v44  ;;  %v8140_v14 = vld [vmem:[#allocation12 + $0x2c4] sm:$0xf]  ;;  %v7433_v62 = vor.u32 %v8160_v10, %v7430_v0 }
 0x250   : > { %4623 = vmatpush.bf16.msrb.mxu2 %v7301_v12  ;;  %v8073_v12 = vld [vmem:[#allocation12 + $0xac] sm:$0xf] }
 0x251   : > { %4698 = vmatpush.bf16.msrb.mxu0 %v7101_v63  ;;  %v9126_v16 = vpop.f32.mrf.mxu2  ;;  %v8091_v63 = vld [vmem:[#allocation12 + $0x134] sm:$0xf0]  ;;  %4636 = vmatpush.bf16.msrb.mxu3 %v7429_v18  ;;  %v7086_v18 = vld [vmem:[#allocation12 + $0xb8] sm:$0xf0] }
 0x252   : > { %4711 = vmatpush.bf16.msrb.mxu1 %v7229_v28  ;;  %v3646_v28 = vpop.f32.mrf.mxu0  ;;  %v3659_v52 = vpop.f32.mrf.mxu1  ;;  %v7149_v36 = vor.u32 %v8091_v63, %v7148_v23  ;;  %v8105_v23 = vld [vmem:[#allocation12 + $0x1ac] sm:$0xf]  ;;  %v7214_v63 = vld [vmem:[#allocation12 + $0x1b8] sm:$0xf0] }
 0x253   : > { %v9128_v5 = vpop.f32.mrf.mxu3  ;;  %v7089_v52 = vor.u32 %v8073_v12, %v7086_v18  ;;  %v7217_v35 = vor.u32 %v8105_v23, %v7214_v63  ;;  %v7022_v12 = vld [vmem:[#allocation12 + $0x38] sm:$0xf0]  ;;  %v8156_v18 = vld [vmem:[#allocation12 + $0x344] sm:$0xf]  ;;  %v7414_v23 = vld [vmem:[#allocation12 + $0x350] sm:$0xf0] }
 0x254   : > { %4624 = vmatpush.bf16.msrb.mxu2 %v7285_v30  ;;  %v7070_v30 = vld [vmem:[#allocation12 + $0x98] sm:$0xf0] }
 0x255   : > { %4699 = vmatpush.bf16.msrb.mxu0 %v7085_v33  ;;  %v7132_v33 = vld [vmem:[#allocation12 + $0x108] sm:$0xf]  ;;  %4637 = vmatpush.bf16.msrb.mxu3 %v7413_v34  ;;  %v7337_v34 = vor.u32 %v8136_v24, %v7334_v32  ;;  %v7270_v24 = vld [vmem:[#allocation12 + $0x230] sm:$0xf0]  ;;  %v8152_v32 = vld [vmem:[#allocation12 + $0x324] sm:$0xf] }
 0x256   : > { %4712 = vmatpush.bf16.msrb.mxu1 %v7213_v25  ;;  %v8087_v25 = vld [vmem:[#allocation12 + $0x114] sm:$0xf0] }
 0x257   : > { %v7133_v49 = vor.u32 %v8087_v25, %v7132_v33  ;;  %v8168_v33 = vld [vmem:[#allocation12 + $0x3a4] sm:$0xf]  ;;  %v7073_v25 = vor.u32 %v8069_v26, %v7070_v30  ;;  %v7417_v26 = vor.u32 %v8156_v18, %v7414_v23  ;;  %v8085_v30 = vld [vmem:[#allocation12 + $0x10c] sm:$0xf] }
 0x258   : > { %4625 = vmatpush.bf16.msrb.mxu2 %v7269_v41  ;;  %v7318_v41 = vld [vmem:[#allocation12 + $0x290] sm:$0xf0] }
 0x259   : > { %4700 = vmatpush.bf16.msrb.mxu0 %v7069_v27  ;;  %v8154_v27 = vld [vmem:[#allocation12 + $0x32c] sm:$0xf0]  ;;  %v3672_v51 = vpop.f32.mrf.mxu2  ;;  %v7321_v42 = vor.u32 %v8132_v38, %v7318_v41  ;;  %v7382_v41 = vld [vmem:[#allocation12 + $0x310] sm:$0xf0] }
 0x25a   : > { %4713 = vmatpush.bf16.msrb.mxu1 %v7197_v47  ;;  %v7397_v47 = vor.u32 %v8154_v27, %v7396_v40  ;;  %v8097_v40 = vld [vmem:[#allocation12 + $0x16c] sm:$0xf]  ;;  %v8164_v27 = vld [vmem:[#allocation12 + $0x384] sm:$0xf]  ;;  %v7446_v51 = vld [vmem:[#allocation12 + $0x390] sm:$0xf0] }
 0x25b   : > { %v3685_v57 = vpop.f32.mrf.mxu3  ;;  %v7449_v53 = vor.u32 %v8164_v27, %v7446_v51  ;;  %v7185_v54 = vor.u32 %v8097_v40, %v7182_v43  ;;  %v7254_v40 = vld [vmem:[#allocation12 + $0x210] sm:$0xf0]  ;;  %v8148_v43 = vld [vmem:[#allocation12 + $0x304] sm:$0xf] }
 0x25c   : > { %4638 = vmatpush.bf16.msrb.mxu3 %v7397_v47  ;;  %v7057_v47 = vor.u32 %v8065_v19, %v7054_v3  ;;  %v8093_v57 = vld [vmem:[#allocation12 + $0x14c] sm:$0xf]  ;;  %v8116_v3 = vld [vmem:[#allocation12 + $0x204] sm:$0xf] }
 0x25d   : > { %4701 = vmatpush.bf16.msrb.mxu0 %v7053_v61  ;;  %v7253_v61 = vor.u32 %v8118_v59, %v7252_v56  ;;  %v8128_v56 = vld [vmem:[#allocation12 + $0x264] sm:$0xf]  ;;  %v7302_v59 = vld [vmem:[#allocation12 + $0x270] sm:$0xf0]  ;;  %v7257_v38 = vor.u32 %v8116_v3, %v7254_v40 }
 0x25e   : > { %4714 = vmatpush.bf16.msrb.mxu1 %v7181_v6  ;;  %v8144_v6 = vld [vmem:[#allocation12 + $0x2e4] sm:$0xf] }
 0x25f   : > { %v7369_v9 = vor.u32 %v8144_v6, %v7366_v58  ;;  %4626 = vmatpush.bf16.msrb.mxu2 %v7253_v61  ;;  %v7305_v61 = vor.u32 %v8128_v56, %v7302_v59  ;;  %v1631_v6 = vperm.slane %v9103_v4, 3 }
 0x260   : > { %4639 = vmatpush.bf16.msrb.mxu3 %v7381_v7 }
 0x261   : > { %4702 = vmatpush.bf16.msrb.mxu0 %v7037_v17  ;;  %v7350_v17 = vld [vmem:[#allocation12 + $0x2d0] sm:$0xf0]  ;;  %v3671_v4 = vadd.f32 %v9126_v16, %v1631_v6 }
 0x262   : > { %4715 = vmatpush.bf16.msrb.mxu1 %v7165_v21  ;;  %v8172_v21 = vld [vmem:[#allocation12 + $0x3c4] sm:$0xf]  ;;  %v7353_v28 = vor.u32 %v8140_v14, %v7350_v17  ;;  %v7150_v14 = vld [vmem:[#allocation12 + $0x138] sm:$0xf0] }
 0x263   : > { %4671 = vmatpush.bf16.msra.mxu2 %v7369_v9  ;;  %v7481_v29 = vor.u32 %v8172_v21, %v7478_v22  ;;  %v8057_v9 = vld [vmem:[#allocation12 + $0x2c] sm:$0xf]  ;;  %v8124_v17 = vld [vmem:[#allocation12 + $0x244] sm:$0xf] }
 0x264   : > { %4684 = vmatpush.bf16.msra.mxu3 %v7497_v13  ;;  %v8089_v13 = vld [vmem:[#allocation12 + $0x12c] sm:$0xf]  ;;  %v7025_v63 = vor.u32 %v8057_v9, %v7022_v12  ;;  %v8179_v12 = vld [vmem:[#allocation12 + $0x3f4] sm:$0xf0] }
 0x265   : > { %4703 = vmatpush.bf16.msrb.mxu0 %v7021_v31  ;;  %v7198_v31 = vld [vmem:[#allocation12 + $0x198] sm:$0xf0] }
 0x266   : > { %4716 = vmatpush.bf16.msrb.mxu1 %v7149_v36  ;;  %v7462_v36 = vld [vmem:[#allocation12 + $0x3b0] sm:$0xf0]  ;;  %v7201_v39 = vor.u32 %v8101_v20, %v7198_v31  ;;  %v7134_v20 = vld [vmem:[#allocation12 + $0x118] sm:$0xf0]  ;;  %v8120_v31 = vld [vmem:[#allocation12 + $0x224] sm:$0xf] }
 0x267   : > { %4672 = vmatpush.bf16.msra.mxu2 %v7353_v28  ;;  %v7465_v37 = vor.u32 %v8168_v33, %v7462_v36  ;;  %v7273_v33 = vor.u32 %v8120_v31, %v7270_v24  ;;  %v3684_v36 = vadd.f32 %v9128_v5, %v3671_v4  ;;  %v8171_v31 = vld [vmem:[#allocation12 + $0x3b4] sm:$0xf0] }
 0x268   : > { %4685 = vmatpush.bf16.msra.mxu3 %v7481_v29  ;;  %v7153_v29 = vor.u32 %v8089_v13, %v7150_v14 }
 0x269   : > { %4704 = vmatpush.bf16.msrb.mxu0 %v7005_v46  ;;  %v9132_v46 = vpop.f32.mrf.mxu0 }
 0x26a   : > { %4717 = vmatpush.bf16.msrb.mxu1 %v7133_v49  ;;  %v9134_v49 = vpop.f32.mrf.mxu1  ;;  %v3697_v27 = vadd.f32 %v9132_v46, %v3684_v36  ;;  %v8135_v36 = vld [vmem:[#allocation12 + $0x294] sm:$0xf0] }
 0x26b   : > { %4673 = vmatpush.bf16.msra.mxu2 %v7337_v34  ;;  %v7398_v34 = vld [vmem:[#allocation12 + $0x330] sm:$0xf0] }
 0x26c   : > { %4705 = vmatmul.bf16.vlgmr.msrb.gmra.mxu0 %v9110_v45  ;;  %4686 = vmatpush.bf16.msra.mxu3 %v7465_v37  ;;  %v7401_v19 = vor.u32 %v8152_v32, %v7398_v34  ;;  %v7137_v37 = vor.u32 %v8085_v30, %v7134_v20  ;;  %v3710_v5 = vadd.f32 %v9134_v49, %v3697_v27  ;;  %v8139_v30 = vld [vmem:[#allocation12 + $0x2b4] sm:$0xf0]  ;;  %v7468_v20 = vld [vmem:[#allocation12 + $0x3a8] sm:$0xf] }
 0x26d   : > { %4749 = vmatpush.bf16.msra.mxu0 %v7121_v50  ;;  %4718 = vmatmul.bf16.vlgmr.msrb.gmra.mxu1 %v9114_v48  ;;  %v8061_v50 = vld [vmem:[#allocation12 + $0x4c] sm:$0xf]  ;;  %v7324_v34 = vld [vmem:[#allocation12 + $0x288] sm:$0xf] }
 0x26e   : > { %4762 = vmatpush.bf16.msra.mxu1 %v7249_v55  ;;  %v7166_v55 = vld [vmem:[#allocation12 + $0x158] sm:$0xf0]  ;;  %v7041_v58 = vor.u32 %v8061_v50, %v7038_v2  ;;  %v7325_v3 = vor.u32 %v8135_v36, %v7324_v34  ;;  %v7436_v27 = vld [vmem:[#allocation12 + $0x368] sm:$0xf] }
 0x26f   : > { %4674 = vmatpush.bf16.msra.mxu2 %v7321_v42  ;;  %v7169_v44 = vor.u32 %v8093_v57, %v7166_v55  ;;  %v7385_v42 = vor.u32 %v8148_v43, %v7382_v41  ;;  %v7308_v43 = vld [vmem:[#allocation12 + $0x268] sm:$0xf]  ;;  %v8131_v41 = vld [vmem:[#allocation12 + $0x274] sm:$0xf0] }
 0x270   : > { %4687 = vmatpush.bf16.msra.mxu3 %v7449_v53 }
 0x271   : > { %4750 = vmatpush.bf16.msra.mxu0 %v7105_v11  ;;  %v3722_v7 = vpop.f32.mrf.mxu2  ;;  %v3698_v21 = vpop.f32.mrf.mxu0 }
 0x272   : > { %4763 = vmatpush.bf16.msra.mxu1 %v7233_v15  ;;  %v7286_v15 = vld [vmem:[#allocation12 + $0x250] sm:$0xf0]  ;;  %v3711_v28 = vpop.f32.mrf.mxu1  ;;  %v3723_v51 = vadd.f32 %v3722_v7, %v3710_v5  ;;  %v3802_v7 = vunpack.c.h.bf16 %v9041_v1  ;;  %v7356_v21 = vld [vmem:[#allocation12 + $0x2c8] sm:$0xf]  ;;  %v7309_v5 = vor.u32 %v8131_v41, %v7308_v43  ;;  %v7438_v43 = vld [vmem:[#allocation12 + $0x378] sm:$0xf0] }
 0x273   : > { %v3735_v11 = vpop.f32.mrf.mxu3  ;;  %4675 = vmatpush.bf16.msra.mxu2 %v7305_v61  ;;  %v7289_v22 = vor.u32 %v8124_v17, %v7286_v15  ;;  %v8175_v28 = vld [vmem:[#allocation12 + $0x3d4] sm:$0xf0] }
 0x274   : > { %4688 = vmatpush.bf16.msra.mxu3 %v7433_v62  ;;  %v3736_v50 = vadd.f32 %v3735_v11, %v3723_v51  ;;  %v7500_v11 = vld [vmem:[#allocation12 + $0x3e8] sm:$0xf] }
 0x275   : > { %4751 = vmatpush.bf16.msra.mxu0 %v7089_v52  ;;  %v8053_v52 = vld [vmem:[#allocation12 + $0xc] sm:$0xf] }
 0x276   : > { %4764 = vmatpush.bf16.msra.mxu1 %v7217_v35  ;;  %v7006_v35 = vld [vmem:[#allocation12 + $0x18] sm:$0xf0] }
 0x277   : > { %4676 = vmatpush.bf16.msra.mxu2 %v7289_v22  ;;  %v7009_v16 = vor.u32 %v8053_v52, %v7006_v35  ;;  %v7340_v35 = vld [vmem:[#allocation12 + $0x2a8] sm:$0xf] }
 0x278   : > { %4689 = vmatpush.bf16.msra.mxu3 %v7417_v26  ;;  %v7341_v32 = vor.u32 %v8139_v30, %v7340_v35 }
 0x279   : > { %4752 = vmatpush.bf16.msra.mxu0 %v7073_v25  ;;  %v3724_v25 = vpop.f32.mrf.mxu2 }
 0x27a   : > { %4765 = vmatpush.bf16.msra.mxu1 %v7201_v39  ;;  %v8167_v25 = vld [vmem:[#allocation12 + $0x394] sm:$0xf0] }
 0x27b   : > { %v3737_v39 = vpop.f32.mrf.mxu3  ;;  %4677 = vmatpush.bf16.msra.mxu2 %v7273_v33  ;;  %v7469_v33 = vor.u32 %v8171_v31, %v7468_v20  ;;  %v8133_v31 = vld [vmem:[#allocation12 + $0x28c] sm:$0xf] }
 0x27c   : > { %4690 = vmatpush.bf16.msra.mxu3 %v7401_v19 }
 0x27d   : > { %4753 = vmatpush.bf16.msra.mxu0 %v7057_v47 }
 0x27e   : > { %4766 = vmatpush.bf16.msra.mxu1 %v7185_v54 }
 0x27f   : > { %4678 = vmatpush.bf16.msra.mxu2 %v7257_v38 }
 0x280   : > { %4691 = vmatpush.bf16.msra.mxu3 %v7385_v42  ;;  %v8163_v42 = vld [vmem:[#allocation12 + $0x374] sm:$0xf0] }
 0x281   : > { %4754 = vmatpush.bf16.msra.mxu0 %v7041_v58  ;;  %v3801_v58 = vunpack.c.l.bf16 %v9041_v1  ;;  %v7484_v1 = vld [vmem:[#allocation12 + $0x3c8] sm:$0xf]  ;;  %v7437_v51 = vor.u32 %v8163_v42, %v7436_v27  ;;  %v8125_v42 = vld [vmem:[#allocation12 + $0x24c] sm:$0xf] }
 0x282   : > { %4767 = vmatpush.bf16.msra.mxu1 %v7169_v44  ;;  %v8147_v44 = vld [vmem:[#allocation12 + $0x2f4] sm:$0xf0]  ;;  %v7485_v26 = vor.u32 %v8175_v28, %v7484_v1  ;;  %v8137_v1 = vld [vmem:[#allocation12 + $0x2ac] sm:$0xf]  ;;  %v7342_v28 = vld [vmem:[#allocation12 + $0x2b8] sm:$0xf0] }
 0x283   : > { %v7345_v30 = vor.u32 %v8137_v1, %v7342_v28  ;;  %v8185_v28 = vld [vmem:[#allocation15 + $0x28] sm:$0xff] }
 0x285   : > { %4755 = vmatpush.bf16.msra.mxu0 %v7025_v63  ;;  %v8143_v63 = vld [vmem:[#allocation12 + $0x2d4] sm:$0xf0] }
 0x286   : > { %4768 = vmatpush.bf16.msra.mxu1 %v7153_v29  ;;  %v7357_v52 = vor.u32 %v8143_v63, %v7356_v21  ;;  %v9154_v29 = vld [vmem:[#allocation13] sm:$0xf] }
 0x287   : > { %v3945_v24 = vperm.slane %v9154_v29, 0  ;;  %v3946_v35 = vperm.slane %v9154_v29, 1 }
 0x289   : > { %4756 = vmatpush.bf16.msra.mxu0 %v7009_v16  ;;  %v3748_v47 = vpop.f32.mrf.mxu0  ;;  %v7452_v16 = vld [vmem:[#allocation12 + $0x388] sm:$0xf] }
 0x28a   : > { %4769 = vmatpush.bf16.msra.mxu1 %v7137_v37  ;;  %v3761_v53 = vpop.f32.mrf.mxu1  ;;  %v3749_v54 = vadd.f32 %v3748_v47, %v3736_v50  ;;  %v7453_v40 = vor.u32 %v8167_v25, %v7452_v16  ;;  %v7292_v47 = vld [vmem:[#allocation12 + $0x248] sm:$0xf]  ;;  %v8127_v50 = vld [vmem:[#allocation12 + $0x254] sm:$0xf0] }
 0x28c   : > { %4757 = vmatmul.bf16.vlgmr.msra.gmra.mxu0 %v9110_v45  ;;  %v3762_v2 = vadd.f32 %v3761_v53, %v3749_v54  ;;  %v3793_v45 = vmax.f32 %v9124_v60, 0.0  ;;  %v7501_v60 = vor.u32 %v8179_v12, %v7500_v11  ;;  %v7420_v53 = vld [vmem:[#allocation12 + $0x348] sm:$0xf]  ;;  %v8159_v54 = vld [vmem:[#allocation12 + $0x354] sm:$0xf0] }
 0x28d   : > { %4770 = vmatmul.bf16.vlgmr.msra.gmra.mxu1 %v9114_v48  ;;  %v7372_v48 = vld [vmem:[#allocation12 + $0x2e8] sm:$0xf] }
 0x28e   : > { %v7373_v18 = vor.u32 %v8147_v44, %v7372_v48  ;;  %v7388_v48 = vld [vmem:[#allocation12 + $0x308] sm:$0xf]  ;;  %v7502_v44 = vld [vmem:[#allocation12 + $0x3f8] sm:$0xf0] }
 0x291   : > { %v3774_v57 = vpop.f32.mrf.mxu2  ;;  %v3750_v56 = vpop.f32.mrf.mxu0 }
 0x292   : > { %v3787_v46 = vpop.f32.mrf.mxu3  ;;  %v3775_v55 = vadd.f32 %v3774_v57, %v3762_v2  ;;  %v3763_v59 = vpop.f32.mrf.mxu1  ;;  %v7276_v56 = vld [vmem:[#allocation12 + $0x228] sm:$0xf] }
 0x293   : > { %v8123_v59 = vld [vmem:[#allocation12 + $0x234] sm:$0xf0] }
 0x294   : > { %v3788_v10 = vadd.f32 %v3787_v46, %v3775_v55  ;;  %v7293_v46 = vor.u32 %v8127_v50, %v7292_v47  ;;  %v7421_v55 = vor.u32 %v8159_v54, %v7420_v53  ;;  %v7422_v47 = vld [vmem:[#allocation12 + $0x358] sm:$0xf0] }
 0x296   : > { %v3794_v61 = vmax.f32 %v3788_v10, 0.0  ;;  %v7404_v10 = vld [vmem:[#allocation12 + $0x328] sm:$0xf] }
 0x298   : > { %v3798_v0 = vpack.c.bf16 %v3794_v61, %v3793_v45  ;;  %v8155_v45 = vld [vmem:[#allocation12 + $0x334] sm:$0xf0]  ;;  %v7277_v61 = vor.u32 %v8123_v59, %v7276_v56  ;;  %v7406_v56 = vld [vmem:[#allocation12 + $0x338] sm:$0xf0] }
 0x299   : > { %v3776_v49 = vpop.f32.mrf.mxu2 }
 0x29a   : > { %v3789_v6 = vpop.f32.mrf.mxu3  ;;  %v3805_v9 = vunpack.c.l.bf16 %v3798_v0  ;;  %v3806_v62 = vunpack.c.h.bf16 %v3798_v0  ;;  %v7405_v0 = vor.u32 %v8155_v45, %v7404_v10  ;;  %v7260_v49 = vld [vmem:[#allocation12 + $0x208] sm:$0xf]  ;;  %v8117_v45 = vld [vmem:[#allocation12 + $0x20c] sm:$0xf] }
 0x29b   : > { %v8119_v6 = vld [vmem:[#allocation12 + $0x214] sm:$0xf0] }
 0x29c   : > { %v3809_v13 = vmul.f32 %v3805_v9, %v3801_v58  ;;  %v3810_v14 = vmul.f32 %v3806_v62, %v3802_v7  ;;  %v4807_v17 = vadd.f32 %v3805_v9, %v3801_v58  ;;  %v4808_v15 = vadd.f32 %v3806_v62, %v3802_v7  ;;  %v8151_v58 = vld [vmem:[#allocation12 + $0x314] sm:$0xf0]  ;;  %v8145_v7 = vld [vmem:[#allocation12 + $0x2ec] sm:$0xf]  ;;  %v7374_v9 = vld [vmem:[#allocation12 + $0x2f8] sm:$0xf0] }
 0x29d   : > { %v8177_v62 = vld [vmem:[#allocation12 + $0x3ec] sm:$0xf]  ;;  %v7261_v11 = vor.u32 %v8119_v6, %v7260_v49  ;;  %v7389_v12 = vor.u32 %v8151_v58, %v7388_v48  ;;  %v7390_v49 = vld [vmem:[#allocation12 + $0x318] sm:$0xf0]  ;;  %v3947_v58 = vperm.slane %v9154_v29, 2 }
 0x29e   : > { %v9146_v22 = vpack.c.bf16 %v3809_v13, %v3809_v13  ;;  %v9148_v23 = vpack.c.bf16 %v3810_v14, %v3810_v14  ;;  %v9150_v4 = vpack.c.bf16 %v4808_v15, %v4807_v17  ;;  %v7377_v13 = vor.u32 %v8145_v7, %v7374_v9  ;;  %v8141_v17 = vld [vmem:[#allocation12 + $0x2cc] sm:$0xf]  ;;  %v7358_v15 = vld [vmem:[#allocation12 + $0x2d8] sm:$0xf0] }
 0x29f   : > { %v7505_v14 = vor.u32 %v8177_v62, %v7502_v44  ;;  %v7361_v21 = vor.u32 %v8141_v17, %v7358_v15 }
 0x2a0   : > { %4627 = vmatmul.bf16.vlgmr.msrb.gmra.mxu2 %v9146_v22  ;;  %4640 = vmatmul.bf16.vlgmr.msrb.gmra.mxu3 %v9148_v23 }
 0x2a1   : > { %4723 = vmatpush.bf16.msrb.mxu2 %v7373_v18  ;;  %4736 = vmatpush.bf16.msrb.mxu3 %v7501_v60  ;;  %v8173_v18 = vld [vmem:[#allocation12 + $0x3cc] sm:$0xf]  ;;  %v7486_v60 = vld [vmem:[#allocation12 + $0x3d8] sm:$0xf0] }
 0x2a2   : > { %v7489_v63 = vor.u32 %v8173_v18, %v7486_v60  ;;  %v8187_v60 = vld [vmem:[#allocation15 + $0x38] sm:$0xff] }
 0x2a3   : > { %5089 = vmatpush.bf16.msrb.mxu0 %v8187_v60 }
 0x2a5   : > { %4724 = vmatpush.bf16.msrb.mxu2 %v7357_v52  ;;  %4737 = vmatpush.bf16.msrb.mxu3 %v7485_v26  ;;  %v8169_v52 = vld [vmem:[#allocation12 + $0x3ac] sm:$0xf]  ;;  %v7470_v26 = vld [vmem:[#allocation12 + $0x3b8] sm:$0xf0] }
 0x2a6   : > { %v7473_v20 = vor.u32 %v8169_v52, %v7470_v26  ;;  %v8193_v52 = vld [vmem:[#allocation15 + $0x68] sm:$0xff]  ;;  %v8192_v26 = vld [vmem:[#allocation15 + $0x60] sm:$0xff] }
 0x2a9   : > { %v4602_v19 = vpop.f32.mrf.mxu0  ;;  %4725 = vmatpush.bf16.msrb.mxu2 %v7341_v32  ;;  %4738 = vmatpush.bf16.msrb.mxu3 %v7469_v33  ;;  %v8165_v32 = vld [vmem:[#allocation12 + $0x38c] sm:$0xf]  ;;  %v7454_v33 = vld [vmem:[#allocation12 + $0x398] sm:$0xf0] }
 0x2aa   : > { %v4603_v37 = vadd.f32 %v4602_v19, %v3945_v24  ;;  %v4615_v39 = vpop.f32.mrf.mxu1  ;;  %v7326_v24 = vld [vmem:[#allocation12 + $0x298] sm:$0xf0]  ;;  %v7457_v19 = vor.u32 %v8165_v32, %v7454_v33  ;;  %v8189_v32 = vld [vmem:[#allocation15 + $0x48] sm:$0xff]  ;;  %v8180_v33 = vld [vmem:[#allocation15] sm:$0xff] }
 0x2ab   : > { %v7329_v25 = vor.u32 %v8133_v31, %v7326_v24  ;;  %v8190_v31 = vld [vmem:[#allocation15 + $0x50] sm:$0xff]  ;;  %v8181_v24 = vld [vmem:[#allocation15 + $0x8] sm:$0xff] }
 0x2ac   : > { %v9157_v38 = vadd.f32 %v4615_v39, %v4603_v37  ;;  %v8129_v37 = vld [vmem:[#allocation12 + $0x26c] sm:$0xf] }
 0x2ad   : > { %4726 = vmatpush.bf16.msrb.mxu2 %v7325_v3  ;;  %4739 = vmatpush.bf16.msrb.mxu3 %v7453_v40  ;;  %v7310_v3 = vld [vmem:[#allocation12 + $0x278] sm:$0xf0]  ;;  %v8161_v40 = vld [vmem:[#allocation12 + $0x36c] sm:$0xf] }
 0x2ae   : > { %v7313_v41 = vor.u32 %v8129_v37, %v7310_v3  ;;  %v7441_v27 = vor.u32 %v8161_v40, %v7438_v43  ;;  %v8203_v37 = vld [vmem:[#allocation15 + $0xb8] sm:$0xff]  ;;  %v8202_v40 = vld [vmem:[#allocation15 + $0xb0] sm:$0xff] }
 0x2af   : > { %v8211_v3 = vld [vmem:[#allocation15 + $0xf8] sm:$0xff]  ;;  %v8210_v43 = vld [vmem:[#allocation15 + $0xf0] sm:$0xff] }
 0x2b0   : > { %4679 = vmatmul.bf16.vlgmr.msra.gmra.mxu2 %v9146_v22  ;;  %4692 = vmatmul.bf16.vlgmr.msra.gmra.mxu3 %v9148_v23 }
 0x2b1   : > { %v4604_v2 = vpop.f32.mrf.mxu0  ;;  %4727 = vmatpush.bf16.msrb.mxu2 %v7309_v5  ;;  %4740 = vmatpush.bf16.msrb.mxu3 %v7437_v51  ;;  %v7294_v5 = vld [vmem:[#allocation12 + $0x258] sm:$0xf0]  ;;  %v8157_v51 = vld [vmem:[#allocation12 + $0x34c] sm:$0xf] }
 0x2b2   : > { %v4617_v57 = vpop.f32.mrf.mxu1  ;;  %v7297_v54 = vor.u32 %v8125_v42, %v7294_v5  ;;  %v7425_v2 = vor.u32 %v8157_v51, %v7422_v47  ;;  %v8209_v42 = vld [vmem:[#allocation15 + $0xe8] sm:$0xff] }
 0x2b3   : > { %v8121_v57 = vld [vmem:[#allocation12 + $0x22c] sm:$0xf] }
 0x2b5   : > { %4728 = vmatpush.bf16.msrb.mxu2 %v7293_v46  ;;  %4741 = vmatpush.bf16.msrb.mxu3 %v7421_v55  ;;  %v7278_v46 = vld [vmem:[#allocation12 + $0x238] sm:$0xf0]  ;;  %v8153_v55 = vld [vmem:[#allocation12 + $0x32c] sm:$0xf] }
 0x2b6   : > { %v7281_v59 = vor.u32 %v8121_v57, %v7278_v46  ;;  %v7409_v10 = vor.u32 %v8153_v55, %v7406_v56 }
 0x2b9   : > { %4729 = vmatpush.bf16.msrb.mxu2 %v7277_v61  ;;  %4742 = vmatpush.bf16.msrb.mxu3 %v7405_v0  ;;  %v7262_v61 = vld [vmem:[#allocation12 + $0x218] sm:$0xf0]  ;;  %v8149_v0 = vld [vmem:[#allocation12 + $0x30c] sm:$0xf] }
 0x2ba   : > { %v7265_v6 = vor.u32 %v8117_v45, %v7262_v61  ;;  %v7393_v48 = vor.u32 %v8149_v0, %v7390_v49  ;;  %v8199_v49 = vld [vmem:[#allocation15 + $0x98] sm:$0xff] }
 0x2bd   : > { %4730 = vmatpush.bf16.msrb.mxu2 %v7261_v11  ;;  %4743 = vmatpush.bf16.msrb.mxu3 %v7389_v12 }
 0x2c0   : > { %4731 = vmatmul.bf16.vlgmr.msrb.gmra.mxu2 %v9146_v22  ;;  %4744 = vmatmul.bf16.vlgmr.msrb.gmra.mxu3 %v9148_v23 }
 0x2c1   : > { %4775 = vmatpush.bf16.msra.mxu2 %v7377_v13  ;;  %4788 = vmatpush.bf16.msra.mxu3 %v7505_v14  ;;  %v3948_v13 = vperm.slane %v9154_v29, 3  ;;  %v8184_v29 = vld [vmem:[#allocation15 + $0x20] sm:$0xff] }
 0x2c5   : > { %4776 = vmatpush.bf16.msra.mxu2 %v7361_v21  ;;  %4789 = vmatpush.bf16.msra.mxu3 %v7489_v63  ;;  %v8186_v21 = vld [vmem:[#allocation15 + $0x30] sm:$0xff] }
 0x2c6   : > { %v8194_v63 = vld [vmem:[#allocation15 + $0x70] sm:$0xff]  ;;  %5090 = vmatpush.bf16.msrb.mxu0 %v8186_v21 }
 0x2c9   : > { %v4654_v34 = vpop.f32.mrf.mxu0  ;;  %4777 = vmatpush.bf16.msra.mxu2 %v7345_v30  ;;  %4790 = vmatpush.bf16.msra.mxu3 %v7473_v20  ;;  %v8191_v30 = vld [vmem:[#allocation15 + $0x58] sm:$0xff]  ;;  %v8182_v20 = vld [vmem:[#allocation15 + $0x10] sm:$0xff] }
 0x2ca   : > { %v4655_v36 = vadd.f32 %v4654_v34, %v3946_v35  ;;  %v4667_v16 = vpop.f32.mrf.mxu1  ;;  %5091 = vmatpush.bf16.msrb.mxu0 %v8185_v28  ;;  %v8183_v35 = vld [vmem:[#allocation15 + $0x18] sm:$0xff]  ;;  %v8188_v34 = vld [vmem:[#allocation15 + $0x40] sm:$0xff] }
 0x2cc   : > { %v9164_v39 = vadd.f32 %v4667_v16, %v4655_v36 }
 0x2cd   : > { %4778 = vmatpush.bf16.msra.mxu2 %v7329_v25  ;;  %4791 = vmatpush.bf16.msra.mxu3 %v7457_v19 }
 0x2ce   : > { %5092 = vmatpush.bf16.msrb.mxu0 %v8184_v29 }
 0x2d1   : > { %v4656_v50 = vpop.f32.mrf.mxu0  ;;  %4779 = vmatpush.bf16.msra.mxu2 %v7313_v41  ;;  %4792 = vmatpush.bf16.msra.mxu3 %v7441_v27  ;;  %v8201_v27 = vld [vmem:[#allocation15 + $0xa8] sm:$0xff] }
 0x2d2   : > { %v4669_v53 = vpop.f32.mrf.mxu1  ;;  %5093 = vmatpush.bf16.msrb.mxu0 %v8183_v35 }
 0x2d3   : > { %v8200_v53 = vld [vmem:[#allocation15 + $0xa0] sm:$0xff] }
 0x2d5   : > { %4780 = vmatpush.bf16.msra.mxu2 %v7297_v54  ;;  %4793 = vmatpush.bf16.msra.mxu3 %v7425_v2  ;;  %v8208_v54 = vld [vmem:[#allocation15 + $0xe0] sm:$0xff] }
 0x2d6   : > { %5094 = vmatpush.bf16.msrb.mxu0 %v8182_v20  ;;  %v4816_v20 = vunpack.c.h.bf16 %v9150_v4 }
 0x2d9   : > { %4781 = vmatpush.bf16.msra.mxu2 %v7281_v59  ;;  %4794 = vmatpush.bf16.msra.mxu3 %v7409_v10  ;;  %v4813_v59 = vunpack.c.l.bf16 %v9097_v8  ;;  %v4814_v10 = vunpack.c.h.bf16 %v9097_v8  ;;  %v8205_v8 = vld [vmem:[#allocation15 + $0xc8] sm:$0xff] }
 0x2da   : > { %5095 = vmatpush.bf16.msrb.mxu0 %v8181_v24 }
 0x2dd   : > { %4782 = vmatpush.bf16.msra.mxu2 %v7265_v6  ;;  %4795 = vmatpush.bf16.msra.mxu3 %v7393_v48  ;;  %v8207_v6 = vld [vmem:[#allocation15 + $0xd8] sm:$0xff] }
 0x2de   : > { %5096 = vmatpush.bf16.msrb.mxu0 %v8180_v33 }
 0x2e0   : > { %4783 = vmatmul.bf16.vlgmr.msra.gmra.mxu2 %v9146_v22  ;;  %4796 = vmatmul.bf16.vlgmr.msra.gmra.mxu3 %v9148_v23  ;;  %v8195_v22 = vld [vmem:[#allocation15 + $0x78] sm:$0xff] }
 0x2e1   : > { %5102 = vmatpush.bf16.msrb.mxu1 %v8195_v22  ;;  %5115 = vmatpush.bf16.msrb.mxu2 %v8203_v37 }
 0x2e2   : > { %5128 = vmatpush.bf16.msrb.mxu3 %v8211_v3 }
 0x2e5   : > { %5103 = vmatpush.bf16.msrb.mxu1 %v8194_v63  ;;  %5116 = vmatpush.bf16.msrb.mxu2 %v8202_v40 }
 0x2e6   : > { %5129 = vmatpush.bf16.msrb.mxu3 %v8210_v43 }
 0x2e9   : > { %v4706_v7 = vpop.f32.mrf.mxu0  ;;  %5104 = vmatpush.bf16.msrb.mxu1 %v8193_v52  ;;  %5117 = vmatpush.bf16.msrb.mxu2 %v8201_v27 }
 0x2ea   : > { %v4707_v9 = vadd.f32 %v4706_v7, %v3947_v58  ;;  %v4719_v62 = vpop.f32.mrf.mxu1  ;;  %5130 = vmatpush.bf16.msrb.mxu3 %v8209_v42  ;;  %v8198_v7 = vld [vmem:[#allocation15 + $0x90] sm:$0xff] }
 0x2ec   : > { %v9169_v44 = vadd.f32 %v4719_v62, %v4707_v9  ;;  %v8206_v9 = vld [vmem:[#allocation15 + $0xd0] sm:$0xff] }
 0x2ed   : > { %5105 = vmatpush.bf16.msrb.mxu1 %v8192_v26  ;;  %5118 = vmatpush.bf16.msrb.mxu2 %v8200_v53 }
 0x2ee   : > { %5131 = vmatpush.bf16.msrb.mxu3 %v8208_v54 }
 0x2f1   : > { %v4708_v11 = vpop.f32.mrf.mxu0  ;;  %5106 = vmatpush.bf16.msrb.mxu1 %v8191_v30  ;;  %5119 = vmatpush.bf16.msrb.mxu2 %v8199_v49  ;;  %v4815_v30 = vunpack.c.l.bf16 %v9150_v4 }
 0x2f2   : > { %v4721_v12 = vpop.f32.mrf.mxu1  ;;  %5132 = vmatpush.bf16.msrb.mxu3 %v8207_v6 }
 0x2f3   : > { %v8197_v12 = vld [vmem:[#allocation15 + $0x88] sm:$0xff] }
 0x2f5   : > { %5107 = vmatpush.bf16.msrb.mxu1 %v8190_v31  ;;  %5120 = vmatpush.bf16.msrb.mxu2 %v8198_v7 }
 0x2f6   : > { %5133 = vmatpush.bf16.msrb.mxu3 %v8206_v9 }
 0x2f9   : > { %5108 = vmatpush.bf16.msrb.mxu1 %v8189_v32  ;;  %5121 = vmatpush.bf16.msrb.mxu2 %v8197_v12 }
 0x2fa   : > { %5134 = vmatpush.bf16.msrb.mxu3 %v8205_v8 }
 0x2fd   : > { %5109 = vmatpush.bf16.msrb.mxu1 %v8188_v34 }
 0x309   : > { %v4758_v14 = vpop.f32.mrf.mxu0 }
 0x30a   : > { %v4759_v17 = vadd.f32 %v4758_v14, %v3948_v13  ;;  %v4771_v15 = vpop.f32.mrf.mxu1  ;;  %v8196_v13 = vld [vmem:[#allocation15 + $0x80] sm:$0xff] }
 0x30b   : > { %v8204_v14 = vld [vmem:[#allocation15 + $0xc0] sm:$0xff]  ;;  %5122 = vmatpush.bf16.msrb.mxu2 %v8196_v13 }
 0x30c   : > { %v9172_v18 = vadd.f32 %v4771_v15, %v4759_v17  ;;  %5135 = vmatpush.bf16.msrb.mxu3 %v8204_v14 }
 0x311   : > { %v4760_v23 = vpop.f32.mrf.mxu0 }
 0x312   : > { %v4773_v1 = vpop.f32.mrf.mxu1 }
 0x323   : > { %v4628_v36 = vpop.f32.mrf.mxu2  ;;  %v4641_v16 = vpop.f32.mrf.mxu3 }
 0x324   : > { %v4629_v41 = vadd.f32 %v4628_v36, %v9157_v38 }
 0x326   : > { %v4642_v47 = vadd.f32 %v4641_v16, %v4629_v41 }
 0x328   : > { %v4801_v57 = vmax.f32 %v4642_v47, 0.0 }
 0x32b   : > { %v4630_v25 = vpop.f32.mrf.mxu2  ;;  %v4643_v19 = vpop.f32.mrf.mxu3 }
 0x32c   : > { %v8347_v19 = vld [vmem:[#allocation16] ss:$0 sm:$0xff] }
 0x333   : > { %v4680_v5 = vpop.f32.mrf.mxu2  ;;  %v4693_v51 = vpop.f32.mrf.mxu3 }
 0x334   : > { %v4681_v50 = vadd.f32 %v4680_v5, %v9164_v39 }
 0x336   : > { %v4694_v2 = vadd.f32 %v4693_v51, %v4681_v50 }
 0x338   : > { %v4802_v46 = vmax.f32 %v4694_v2, 0.0 }
 0x33a   : > { %v4811_v55 = vpack.c.bf16 %v4802_v46, %v4801_v57 }
 0x33b   : > { %v4682_v38 = vpop.f32.mrf.mxu2  ;;  %v4695_v56 = vpop.f32.mrf.mxu3 }
 0x33c   : > { %v4817_v45 = vunpack.c.l.bf16 %v4811_v55  ;;  %v4818_v61 = vunpack.c.h.bf16 %v4811_v55 }
 0x33e   : > { %v4821_v0 = vadd.f32 %v4817_v45, %v4813_v59  ;;  %v4822_v39 = vadd.f32 %v4818_v61, %v4814_v10 }
 0x340   : > { %v4825_v48 = vpack.c.bf16 %v4821_v0, %v4821_v0  ;;  %v4826_v58 = vpack.c.bf16 %v4822_v39, %v4822_v39 }
 0x342   : > { %5097 = vmatmul.bf16.vlgmr.msrb.gmra.mxu0 %v4825_v48  ;;  %5110 = vmatmul.bf16.vlgmr.msrb.gmra.mxu1 %v4826_v58 }
 0x343   : > { %v4732_v62 = vpop.f32.mrf.mxu2  ;;  %v4745_v11 = vpop.f32.mrf.mxu3 }
 0x344   : > { %v4733_v60 = vadd.f32 %v4732_v62, %v9169_v44 }
 0x346   : > { %v4746_v21 = vadd.f32 %v4745_v11, %v4733_v60 }
 0x348   : > { %v4803_v28 = vmax.f32 %v4746_v21, 0.0 }
 0x34b   : > { %v4734_v17 = vpop.f32.mrf.mxu2  ;;  %v4747_v15 = vpop.f32.mrf.mxu3 }
 0x363   : > { %v4784_v22 = vpop.f32.mrf.mxu2  ;;  %v4797_v23 = vpop.f32.mrf.mxu3 }
 0x364   : > { %v4785_v63 = vadd.f32 %v4784_v22, %v9172_v18 }
 0x366   : > { %v4798_v1 = vadd.f32 %v4797_v23, %v4785_v63 }
 0x368   : > { %v4804_v52 = vmax.f32 %v4798_v1, 0.0 }
 0x36a   : > { %v4812_v29 = vpack.c.bf16 %v4804_v52, %v4803_v28 }
 0x36b   : > { %v4786_v26 = vpop.f32.mrf.mxu2  ;;  %v4799_v35 = vpop.f32.mrf.mxu3 }
 0x36c   : > { %v4819_v31 = vunpack.c.l.bf16 %v4812_v29  ;;  %v4820_v24 = vunpack.c.h.bf16 %v4812_v29 }
 0x36e   : > { %v4823_v44 = vadd.f32 %v4819_v31, %v4815_v30  ;;  %v4824_v32 = vadd.f32 %v4820_v24, %v4816_v20 }
 0x370   : > { %v4827_v33 = vpack.c.bf16 %v4823_v44, %v4823_v44  ;;  %v4828_v34 = vpack.c.bf16 %v4824_v32, %v4824_v32 }
 0x372   : > { %5123 = vmatmul.bf16.vlgmr.msrb.gmra.mxu2 %v4827_v33  ;;  %5136 = vmatmul.bf16.vlgmr.msrb.gmra.mxu3 %v4828_v34 }
 0x3bf   : > { %v5098_v18 = vpop.f32.mrf.mxu0  ;;  %v5111_v36 = vpop.f32.mrf.mxu1 }
 0x3c0   : > { %v5099_v37 = vadd.f32 %v8347_v19, %v5098_v18 }
 0x3c2   : > { %v5112_v3 = vadd.f32 %v5111_v36, %v5099_v37 }
 0x3c7   : > { %v5100_v16 = vpop.f32.mrf.mxu0  ;;  %v5113_v25 = vpop.f32.mrf.mxu1 }
 0x3f5   : > { %v5124_v40 = vpop.f32.mrf.mxu2  ;;  %v5137_v4 = vpop.f32.mrf.mxu3 }
 0x3f6   : > { %v5125_v43 = vadd.f32 %v5124_v40, %v5112_v3 }
 0x3f8   : > { %v5138_v41 = vadd.f32 %v5137_v4, %v5125_v43 }
 0x3fa   : > { %v5141_v27 = vpack.c.bf16 %v5138_v41, %v5138_v41 }
 0x3fc   : > { %5142 = vst [vmem:[%s541_s17] sm:$0xf] %v5141_v27 }
 0x3fd   : > { %v5126_v42 = vpop.f32.mrf.mxu2  ;;  %v5139_v5 = vpop.f32.mrf.mxu3 }
 0x3fe PF: > { %p27_p3 = scmp.ge.s32.totalorder %s8864_s12, 4   ;;  %s9225_s13 = smov %s8699_s14 }
 0x3ff   : > { %s9226_s14 = smov %s8703_s15  ;;  %s9227_s15 = smov %s8876_s5 }
 0x400   : > { %s9228_s16 = smov %s8864_s12  ;;  %29 = sbr.rel (!%p27_p3) target bundleno = 15 (0xf), region = 145 }
 0x405   :  { %5162 = vsyncpa [#allocation3], 1 }
 0x406   :  { %5164 = vsyncpa [#allocation3 + $0x1], 1 }
 0x407   :  { %5165 = vsyncpa [#allocation5], 1 }
 0x408   :  { %5167 = vsyncpa [#allocation5 + $0x1], 1 }
 0x409   :  { %5168 = vsyncpa [#allocation8], 1 }
 0x40a   :  { %5169 = vsyncpa [#allocation11], 1 }
 0x40b   :  { %5170 = vsyncpa [#allocation14], 1 }
 0x40c   :  { %5171 = vsyncpa [#allocation17], 1 }

</bundles_post_ra>
